<compile_context>
chip_gen: v5e
topology: v5e:2x2
jax: 0.10.0
libtpu: 0.0.40
codegen_flags: <defaults>
</compile_context>

<pallas_src>
import math
from functools import partial

import jax
import jax.numpy as jnp
from jax.experimental import pallas as pl
from jax.experimental.pallas import tpu as pltpu

LANE = 128
GROUPS = 32
EPS = 1e-5


def _round_up(x, m):
    return ((x + m - 1) // m) * m


def _pick_batch_tile(nb, hw, max_rows=256):
    """Largest divisor of nb with bt*hw <= max_rows while keeping >= 2 grid steps."""
    best = 1
    for d in range(1, nb + 1):
        if nb % d != 0 or d * hw > max(max_rows, hw):
            continue
        if nb // d >= 2 or nb == 1:
            best = d
    return best


# ---------------------------------------------------------------------------
# In-kernel helpers
# ---------------------------------------------------------------------------

def _swish(y):
    # exp + approx reciprocal both run on the EUP slot (keeps the VALU free).
    return y * pl.reciprocal(1.0 + jnp.exp(-y), approx=True)


def _group_norm(x, gmat, gmat_t, gamma, beta, *, inv_count, eps, swish):
    """GroupNorm(32, C) on a (B, HW, CP) block; two-pass (mean-subtracted) variance."""
    s1 = jnp.sum(x, axis=1)                                             # (B, CP)
    mean_g = jnp.dot(s1, gmat, preferred_element_type=jnp.float32) * inv_count
    mean_c = jnp.dot(mean_g, gmat_t, preferred_element_type=jnp.float32)
    xc = x - mean_c[:, None, :]
    var_g = jnp.dot(jnp.sum(xc * xc, axis=1), gmat,
                    preferred_element_type=jnp.float32) * inv_count
    rstd_c = jnp.dot(jax.lax.rsqrt(var_g + eps), gmat_t,
                     preferred_element_type=jnp.float32)
    y = xc * rstd_c[:, None, :] * gamma + beta
    return _swish(y) if swish else y


def _conv3x3_from_scratch(pad_ref, w_ref, *, BT, H, W, CPout):
    """Accumulate the 9 shifted-tap matmuls from the zero-padded VMEM scratch."""
    HW = H * W
    acc = jnp.zeros((BT * HW, CPout), jnp.float32)
    for kh in range(3):
        for kw in range(3):
            xs = pad_ref[:, kh:kh + H, kw:kw + W, :]                    # (BT, H, W, CPin)
            xs = xs.reshape(BT * HW, xs.shape[-1]).astype(jnp.bfloat16)
            acc = acc + jnp.dot(xs, w_ref[kh * 3 + kw],
                                preferred_element_type=jnp.float32)
    return acc


# ---------------------------------------------------------------------------
# Pallas kernels
# ---------------------------------------------------------------------------

def _conv1_kernel(x_ref, t_ref, gmat_ref, gmatt_ref, gamma_ref, beta_ref,
                  w_ref, cb_ref, tw_ref, tb_ref, o_ref, pad_ref,
                  *, H, W, inv_count, eps):
    BT, HW, CPi = x_ref.shape
    CPo = o_ref.shape[-1]
    # GroupNorm1 + Swish (fused; no standalone GN kernel / HBM round-trip)
    y = _group_norm(x_ref[...], gmat_ref[...], gmatt_ref[...],
                    gamma_ref[...], beta_ref[...],
                    inv_count=inv_count, eps=eps, swish=True)
    # in-kernel zero halo (replaces the XLA-level jnp.pad round-trip)
    pad_ref[...] = jnp.zeros_like(pad_ref)
    pad_ref[:, 1:H + 1, 1:W + 1, :] = y.reshape(BT, H, W, CPi)
    acc = _conv3x3_from_scratch(pad_ref, w_ref, BT=BT, H=H, W=W, CPout=CPo)
    # time MLP (Swish -> Linear) folded into the conv epilogue
    t = t_ref[...].reshape(BT, -1)
    temb = jnp.dot(_swish(t).astype(jnp.bfloat16), tw_ref[...],
                   preferred_element_type=jnp.float32) + tb_ref[...]    # (BT, CPo)
    o_ref[...] = acc.reshape(BT, HW, CPo) + cb_ref[...] + temb[:, None, :]


def _conv2_kernel(h_ref, x_ref, gmat_ref, gmatt_ref, gamma_ref, beta_ref,
                  w_ref, cb_ref, *rest, H, W, inv_count, eps, identity_skip):
    if identity_skip:
        o_ref, pad_ref = rest
    else:
        sw_ref, sb_ref, o_ref, pad_ref = rest
    BT, HW, CPo = h_ref.shape
    y = _group_norm(h_ref[...], gmat_ref[...], gmatt_ref[...],
                    gamma_ref[...], beta_ref[...],
                    inv_count=inv_count, eps=eps, swish=True)
    # TODO(synk): training-mode dropout not implemented (inference identity).
    pad_ref[...] = jnp.zeros_like(pad_ref)
    pad_ref[:, 1:H + 1, 1:W + 1, :] = y.reshape(BT, H, W, CPo)
    acc = _conv3x3_from_scratch(pad_ref, w_ref, BT=BT, H=H, W=W, CPout=CPo)
    out = acc.reshape(BT, HW, CPo) + cb_ref[...]
    if identity_skip:
        out = out + x_ref[...]                                          # exact f32 residual
    else:
        xin = x_ref[...]
        skip = jnp.dot(xin.reshape(BT * HW, xin.shape[-1]).astype(jnp.bfloat16),
                       sw_ref[...], preferred_element_type=jnp.float32)  # fused 10th "tap"
        out = out + skip.reshape(BT, HW, CPo) + sb_ref[...]
    o_ref[...] = out


def _attn_kernel(v_ref, gmat_ref, gmatt_ref, gamma_ref, beta_ref,
                 wq_ref, bq_ref, wk_ref, bk_ref, wo_ref, bo_ref, o_ref,
                 *, inv_count, eps, scale):
    BT, HW, CPo = v_ref.shape
    v = v_ref[...]                                                      # residual & value
    norm = _group_norm(v, gmat_ref[...], gmatt_ref[...],
                       gamma_ref[...], beta_ref[...],
                       inv_count=inv_count, eps=eps, swish=False)
    n2 = norm.reshape(BT * HW, CPo).astype(jnp.bfloat16)
    q = (jnp.dot(n2, wq_ref[...], preferred_element_type=jnp.float32)
         + bq_ref[...]).reshape(BT, HW, -1)
    k = (jnp.dot(n2, wk_ref[...], preferred_element_type=jnp.float32)
         + bk_ref[...]).reshape(BT, HW, -1)
    s = jnp.einsum('bqd,bkd->bqk', q.astype(jnp.bfloat16), k.astype(jnp.bfloat16),
                   preferred_element_type=jnp.float32) * scale
    s = s - jnp.max(s, axis=-1, keepdims=True)
    p = jnp.exp(s)
    p = p * pl.reciprocal(jnp.sum(p, axis=-1, keepdims=True), approx=True)
    # "value" is the block input (matches the reference einsum), not the qkv value chunk.
    ctx = jnp.einsum('bqk,bkc->bqc', p.astype(jnp.bfloat16), v.astype(jnp.bfloat16),
                     preferred_element_type=jnp.float32)
    out = jnp.dot(ctx.reshape(BT * HW, CPo).astype(jnp.bfloat16), wo_ref[...],
                  preferred_element_type=jnp.float32).reshape(BT, HW, CPo)
    o_ref[...] = out + bo_ref[...] + v
    # TODO(synk): flash-style q-row tiling for large HW (v7x 64 MiB VMEM).


# ---------------------------------------------------------------------------
# pallas_call wrappers
# ---------------------------------------------------------------------------

def _fused_conv1(xin, t_in, prep, *, H, W, inv_count, eps=EPS):
    Nb, HW, CPi = xin.shape
    CPo = prep['conv1_b'].shape[-1]
    TP = t_in.shape[-1]
    G = prep['gmat1'].shape[-1]
    BT = _pick_batch_tile(Nb, HW)
    return pl.pallas_call(
        partial(_conv1_kernel, H=H, W=W, inv_count=inv_count, eps=eps),
        out_shape=jax.ShapeDtypeStruct((Nb, HW, CPo), jnp.float32),
        grid_spec=pltpu.PrefetchScalarGridSpec(
            num_scalar_prefetch=0,
            grid=(Nb // BT,),
            in_specs=[
                pl.BlockSpec((BT, HW, CPi), lambda n: (n, 0, 0)),
                pl.BlockSpec((BT, 1, TP), lambda n: (n, 0, 0)),
                pl.BlockSpec((CPi, G), lambda n: (0, 0)),
                pl.BlockSpec((G, CPi), lambda n: (0, 0)),
                pl.BlockSpec((1, CPi), lambda n: (0, 0)),
                pl.BlockSpec((1, CPi), lambda n: (0, 0)),
                pl.BlockSpec((9, CPi, CPo), lambda n: (0, 0, 0)),
                pl.BlockSpec((1, CPo), lambda n: (0, 0)),
                pl.BlockSpec((TP, CPo), lambda n: (0, 0)),
                pl.BlockSpec((1, CPo), lambda n: (0, 0)),
            ],
            out_specs=pl.BlockSpec((BT, HW, CPo), lambda n: (n, 0, 0)),
            scratch_shapes=[pltpu.VMEM((BT, H + 2, W + 2, CPi), jnp.float32)],
        ),
        compiler_params=pltpu.CompilerParams(dimension_semantics=("parallel",)),
        cost_estimate=pl.CostEstimate(
            flops=2 * Nb * HW * CPi * CPo * 9,
            transcendentals=2 * Nb * HW * CPi,
            bytes_accessed=4 * Nb * HW * (CPi + CPo) + 2 * 9 * CPi * CPo),
    )(xin, t_in, prep['gmat1'], prep['gmat1_t'], prep['norm1_g'], prep['norm1_b'],
      prep['conv1_w'], prep['conv1_b'], prep['time_w'], prep['time_b'])


def _fused_conv2(h, xin, prep, *, H, W, inv_count, eps=EPS):
    Nb, HW, CPo = h.shape
    CPi = xin.shape[-1]
    G = prep['gmat2'].shape[-1]
    identity_skip = 'skip_w' not in prep
    BT = _pick_batch_tile(Nb, HW)
    in_specs = [
        pl.BlockSpec((BT, HW, CPo), lambda n: (n, 0, 0)),
        pl.BlockSpec((BT, HW, CPi), lambda n: (n, 0, 0)),
        pl.BlockSpec((CPo, G), lambda n: (0, 0)),
        pl.BlockSpec((G, CPo), lambda n: (0, 0)),
        pl.BlockSpec((1, CPo), lambda n: (0, 0)),
        pl.BlockSpec((1, CPo), lambda n: (0, 0)),
        pl.BlockSpec((9, CPo, CPo), lambda n: (0, 0, 0)),
        pl.BlockSpec((1, CPo), lambda n: (0, 0)),
    ]
    args = [h, xin, prep['gmat2'], prep['gmat2_t'], prep['norm2_g'], prep['norm2_b'],
            prep['conv2_w'], prep['conv2_b']]
    if not identity_skip:
        in_specs += [pl.BlockSpec((CPi, CPo), lambda n: (0, 0)),
                     pl.BlockSpec((1, CPo), lambda n: (0, 0))]
        args += [prep['skip_w'], prep['skip_b']]
    return pl.pallas_call(
        partial(_conv2_kernel, H=H, W=W, inv_count=inv_count, eps=eps,
                identity_skip=identity_skip),
        out_shape=jax.ShapeDtypeStruct((Nb, HW, CPo), jnp.float32),
        grid_spec=pltpu.PrefetchScalarGridSpec(
            num_scalar_prefetch=0,
            grid=(Nb // BT,),
            in_specs=in_specs,
            out_specs=pl.BlockSpec((BT, HW, CPo), lambda n: (n, 0, 0)),
            scratch_shapes=[pltpu.VMEM((BT, H + 2, W + 2, CPo), jnp.float32)],
        ),
        compiler_params=pltpu.CompilerParams(dimension_semantics=("parallel",)),
        cost_estimate=pl.CostEstimate(
            flops=2 * Nb * HW * CPo * CPo * 9 + 2 * Nb * HW * CPi * CPo,
            transcendentals=2 * Nb * HW * CPo,
            bytes_accessed=4 * Nb * HW * (CPi + 2 * CPo) + 2 * 9 * CPo * CPo),
    )(*args)


def _fused_attention(v, prep, *, channel, inv_count, eps=EPS):
    Nb, HW, CPo = v.shape
    G = prep['gmat2'].shape[-1]
    CQP = prep['attn_q_w'].shape[-1]
    BT = _pick_batch_tile(Nb, HW)
    return pl.pallas_call(
        partial(_attn_kernel, inv_count=inv_count, eps=eps,
                scale=1.0 / math.sqrt(channel)),
        out_shape=jax.ShapeDtypeStruct((Nb, HW, CPo), jnp.float32),
        grid_spec=pltpu.PrefetchScalarGridSpec(
            num_scalar_prefetch=0,
            grid=(Nb // BT,),
            in_specs=[
                pl.BlockSpec((BT, HW, CPo), lambda n: (n, 0, 0)),
                pl.BlockSpec((CPo, G), lambda n: (0, 0)),
                pl.BlockSpec((G, CPo), lambda n: (0, 0)),
                pl.BlockSpec((1, CPo), lambda n: (0, 0)),
                pl.BlockSpec((1, CPo), lambda n: (0, 0)),
                pl.BlockSpec((CPo, CQP), lambda n: (0, 0)),
                pl.BlockSpec((1, CQP), lambda n: (0, 0)),
                pl.BlockSpec((CPo, CQP), lambda n: (0, 0)),
                pl.BlockSpec((1, CQP), lambda n: (0, 0)),
                pl.BlockSpec((CPo, CPo), lambda n: (0, 0)),
                pl.BlockSpec((1, CPo), lambda n: (0, 0)),
            ],
            out_specs=pl.BlockSpec((BT, HW, CPo), lambda n: (n, 0, 0)),
        ),
        compiler_params=pltpu.CompilerParams(dimension_semantics=("parallel",)),
        cost_estimate=pl.CostEstimate(
            flops=2 * Nb * HW * CPo * (2 * CQP + CPo) + 2 * Nb * HW * HW * (CQP + CPo),
            transcendentals=Nb * HW * HW,
            bytes_accessed=8 * Nb * HW * CPo + 2 * CPo * (2 * CQP + CPo)),
    )(v, prep['gmat2'], prep['gmat2_t'], prep['attn_norm_g'], prep['attn_norm_b'],
      prep['attn_q_w'], prep['attn_q_b'], prep['attn_k_w'], prep['attn_k_b'],
      prep['attn_out_w'], prep['attn_out_b'])


# ---------------------------------------------------------------------------
# Deterministic parameter init (variance_scaling, fan_avg, uniform) + prep
# ---------------------------------------------------------------------------

def variance_scaling_uniform(key, shape, scale=1.0):
    if len(shape) == 2:                                   # Linear weight (out, in)
        fan_in, fan_out = shape[1], shape[0]
    else:                                                 # Conv weight (O, I, kh, kw)
        rf = 1
        for s in shape[2:]:
            rf *= s
        fan_in = shape[1] * rf
        fan_out = shape[0] * rf
    scale = scale / ((fan_in + fan_out) / 2.0)
    bound = math.sqrt(3.0 * scale)
    return jax.random.uniform(key, shape, jnp.float32, -bound, bound)


def init_params(key, in_channel, out_channel, time_dim, use_attention=True):
    keys = jax.random.split(key, 6)
    p = {}
    p['norm1_w'] = jnp.ones((in_channel,), jnp.float32)
    p['norm1_b'] = jnp.zeros((in_channel,), jnp.float32)
    p['conv1_w'] = variance_scaling_uniform(keys[0], (out_channel, in_channel, 3, 3))
    p['conv1_b'] = jnp.zeros((out_channel,), jnp.float32)
    p['time_w'] = variance_scaling_uniform(keys[1], (out_channel, time_dim))
    p['time_b'] = jnp.zeros((out_channel,), jnp.float32)
    p['norm2_w'] = jnp.ones((out_channel,), jnp.float32)
    p['norm2_b'] = jnp.zeros((out_channel,), jnp.float32)
    p['conv2_w'] = variance_scaling_uniform(keys[2], (out_channel, out_channel, 3, 3),
                                            scale=1e-10)
    p['conv2_b'] = jnp.zeros((out_channel,), jnp.float32)
    if in_channel != out_channel:
        p['skip_w'] = variance_scaling_uniform(keys[3], (out_channel, in_channel, 1, 1))
        p['skip_b'] = jnp.zeros((out_channel,), jnp.float32)
    if use_attention:
        p['attn_norm_w'] = jnp.ones((out_channel,), jnp.float32)
        p['attn_norm_b'] = jnp.zeros((out_channel,), jnp.float32)
        p['qkv_w'] = variance_scaling_uniform(keys[4], (out_channel * 4, out_channel, 1, 1))
        p['qkv_b'] = jnp.zeros((out_channel * 4,), jnp.float32)
        p['attn_out_w'] = variance_scaling_uniform(keys[5], (out_channel, out_channel, 1, 1),
                                                   scale=1e-10)
        p['attn_out_b'] = jnp.zeros((out_channel,), jnp.float32)
    return p


def prepare_params(p, in_channel, out_channel, time_dim, use_attention,
                   num_groups=GROUPS):
    """One-time conversion to kernel-friendly, channel-padded, bf16-weight layouts."""
    CPi = _round_up(in_channel, LANE)
    CPo = _round_up(out_channel, LANE)
    TP = _round_up(time_dim, LANE)

    def vec_pad(v, cp):
        return jnp.pad(v, (0, cp - v.shape[0])).reshape(1, cp).astype(jnp.float32)

    def mat_pad(w, rp, cp):
        return jnp.pad(w, ((0, rp - w.shape[0]), (0, cp - w.shape[1]))).astype(jnp.bfloat16)

    def conv3x3_taps(w, cpi, cpo):
        co, ci = w.shape[0], w.shape[1]
        t = jnp.transpose(w, (2, 3, 1, 0)).reshape(9, ci, co)       # (9, Ci, Co)
        return jnp.pad(t, ((0, 0), (0, cpi - ci), (0, cpo - co))).astype(jnp.bfloat16)

    def gmat(c, cp):
        cg = c // num_groups
        ci = jnp.arange(cp)
        gi = jnp.arange(num_groups)
        m = ((ci[:, None] // cg) == gi[None, :]) & (ci[:, None] < c)
        return m.astype(jnp.float32)                                 # (cp, G)

    g1 = gmat(in_channel, CPi)
    g2 = gmat(out_channel, CPo)
    q = {
        'CPi': CPi, 'CPo': CPo, 'TP': TP,
        'gmat1': g1, 'gmat1_t': g1.T, 'gmat2': g2, 'gmat2_t': g2.T,
        'norm1_g': vec_pad(p['norm1_w'], CPi), 'norm1_b': vec_pad(p['norm1_b'], CPi),
        'conv1_w': conv3x3_taps(p['conv1_w'], CPi, CPo),
        'conv1_b': vec_pad(p['conv1_b'], CPo),
        'time_w': mat_pad(p['time_w'].T, TP, CPo),
        'time_b': vec_pad(p['time_b'], CPo),
        'norm2_g': vec_pad(p['norm2_w'], CPo), 'norm2_b': vec_pad(p['norm2_b'], CPo),
        'conv2_w': conv3x3_taps(p['conv2_w'], CPo, CPo),
        'conv2_b': vec_pad(p['conv2_b'], CPo),
    }
    if 'skip_w' in p:
        q['skip_w'] = mat_pad(p['skip_w'][:, :, 0, 0].T, CPi, CPo)
        q['skip_b'] = vec_pad(p['skip_b'], CPo)
    if use_attention:
        C = out_channel
        chunk = -(-4 * C // 3)             # torch.chunk(3) on 4C channels
        CQP = _round_up(chunk, LANE)
        w_full = p['qkv_w'][:, :, 0, 0].T  # (C, 4C)
        b_full = p['qkv_b']
        q['CQP'] = CQP
        q['attn_norm_g'] = vec_pad(p['attn_norm_w'], CPo)
        q['attn_norm_b'] = vec_pad(p['attn_norm_b'], CPo)
        # q/k weight slabs split at prep time; the value chunk is unused by the
        # reference einsum (it attends over the raw input), so it is dropped here.
        q['attn_q_w'] = mat_pad(w_full[:, :chunk], CPo, CQP)
        q['attn_q_b'] = vec_pad(b_full[:chunk], CQP)
        q['attn_k_w'] = mat_pad(w_full[:, chunk:2 * chunk], CPo, CQP)
        q['attn_k_b'] = vec_pad(b_full[chunk:2 * chunk], CQP)
        q['attn_out_w'] = mat_pad(p['attn_out_w'][:, :, 0, 0].T, CPo, CPo)
        q['attn_out_b'] = vec_pad(p['attn_out_b'], CPo)
    return q


# ---------------------------------------------------------------------------
# Forward pass
# ---------------------------------------------------------------------------

def res_block_with_attention(prep, x, time, *, in_channel, out_channel,
                             use_attention=True, num_groups=GROUPS):
    Nb, Cin, H, W = x.shape
    HW = H * W
    CPi, CPo, TP = prep['CPi'], prep['CPo'], prep['TP']

    # NCHW -> channel-last, lane-dense padded slab (layout work only at the boundary)
    xin = jnp.transpose(x, (0, 2, 3, 1)).astype(jnp.float32)
    xin = jnp.pad(xin, ((0, 0), (0, 0), (0, 0), (0, CPi - Cin))).reshape(Nb, HW, CPi)
    t_in = jnp.pad(time.astype(jnp.float32),
                   ((0, 0), (0, TP - time.shape[1]))).reshape(Nb, 1, TP)

    inv1 = 1.0 / float((in_channel // num_groups) * HW)
    inv2 = 1.0 / float((out_channel // num_groups) * HW)

    out1 = _fused_conv1(xin, t_in, prep, H=H, W=W, inv_count=inv1)       # (N, HW, CPo)
    out = _fused_conv2(out1, xin, prep, H=H, W=W, inv_count=inv2)        # (N, HW, CPo)
    if use_attention:
        out = _fused_attention(out, prep, channel=out_channel, inv_count=inv2)

    y = out[:, :, :out_channel].reshape(Nb, H, W, out_channel)
    return jnp.transpose(y, (0, 3, 1, 2))


def build_forward(params, in_channel, out_channel, use_attention=True):
    time_dim = params['time_w'].shape[1]
    prep = prepare_params(params, in_channel, out_channel, time_dim, use_attention)
    fwd = partial(res_block_with_attention, prep,
                  in_channel=in_channel, out_channel=out_channel,
                  use_attention=use_attention)
    return jax.jit(fwd)


if __name__ == "__main__":
    key = jax.random.PRNGKey(0)
    k_params, k_x, k_t = jax.random.split(key, 3)

    # GroupNorm(32, C) requires C % 32 == 0, so channels must be >= 32.
    N, Cin, Cout, H, W, Tdim = 2, 32, 64, 8, 8, 16

    params = init_params(k_params, Cin, Cout, Tdim, use_attention=True)
    x = jax.random.normal(k_x, (N, Cin, H, W), jnp.float32)
    t = jax.random.normal(k_t, (N, Tdim), jnp.float32)

    fwd = build_forward(params, Cin, Cout, use_attention=True)
    out = jax.block_until_ready(fwd(x, t))

    assert out.shape == (N, Cout, H, W)
    assert bool(jnp.isfinite(out).all())
    print("KERNEL_OK")
</pallas_src>

<mosaic_0001>
module attributes {stable_mosaic.version = 11 : i64} {
  func.func @_conv1_kernel(%arg0: i32, %arg1: memref<1x64x128xf32, #tpu.memory_space<vmem>>, %arg2: memref<1x1x128xf32, #tpu.memory_space<vmem>>, %arg3: memref<128x32xf32, #tpu.memory_space<vmem>>, %arg4: memref<32x128xf32, #tpu.memory_space<vmem>>, %arg5: memref<1x128xf32, #tpu.memory_space<vmem>>, %arg6: memref<1x128xf32, #tpu.memory_space<vmem>>, %arg7: memref<9x128x128xbf16, #tpu.memory_space<vmem>>, %arg8: memref<1x128xf32, #tpu.memory_space<vmem>>, %arg9: memref<128x128xbf16, #tpu.memory_space<vmem>>, %arg10: memref<1x128xf32, #tpu.memory_space<vmem>>, %arg11: memref<1x64x128xf32, #tpu.memory_space<vmem>>, %arg12: memref<1x10x10x128xf32, #tpu.memory_space<vmem>>) attributes {dimension_semantics = [#tpu.dimension_semantics<parallel>], iteration_bounds = array<i64: 2>, scalar_prefetch = 0 : i64, scratch_operands = 1 : i64, tpu.core_type = #tpu.core_type<tc>, window_params = [{transform_indices = @transform_0, window_bounds = array<i64: 1, 64, 128>}, {transform_indices = @transform_1, window_bounds = array<i64: 1, 1, 128>}, {pipeline_mode = #tpu.pipeline_mode<synchronous>, transform_indices = @transform_2, window_bounds = array<i64: 128, 32>}, {pipeline_mode = #tpu.pipeline_mode<synchronous>, transform_indices = @transform_3, window_bounds = array<i64: 32, 128>}, {pipeline_mode = #tpu.pipeline_mode<synchronous>, transform_indices = @transform_4, window_bounds = array<i64: 1, 128>}, {pipeline_mode = #tpu.pipeline_mode<synchronous>, transform_indices = @transform_5, window_bounds = array<i64: 1, 128>}, {pipeline_mode = #tpu.pipeline_mode<synchronous>, transform_indices = @transform_6, window_bounds = array<i64: 9, 128, 128>}, {pipeline_mode = #tpu.pipeline_mode<synchronous>, transform_indices = @transform_7, window_bounds = array<i64: 1, 128>}, {pipeline_mode = #tpu.pipeline_mode<synchronous>, transform_indices = @transform_8, window_bounds = array<i64: 128, 128>}, {pipeline_mode = #tpu.pipeline_mode<synchronous>, transform_indices = @transform_9, window_bounds = array<i64: 1, 128>}, {transform_indices = @transform_10, window_bounds = array<i64: 1, 64, 128>}]} {
    %c0 = arith.constant 0 : index
    %c0_0 = arith.constant 0 : index
    %c0_1 = arith.constant 0 : index
    %0 = vector.load %arg1[%c0, %c0_0, %c0_1] : memref<1x64x128xf32, #tpu.memory_space<vmem>>, vector<1x64x128xf32>
    %c0_2 = arith.constant 0 : index
    %c0_3 = arith.constant 0 : index
    %1 = vector.load %arg3[%c0_2, %c0_3] : memref<128x32xf32, #tpu.memory_space<vmem>>, vector<128x32xf32>
    %c0_4 = arith.constant 0 : index
    %c0_5 = arith.constant 0 : index
    %2 = vector.load %arg4[%c0_4, %c0_5] : memref<32x128xf32, #tpu.memory_space<vmem>>, vector<32x128xf32>
    %c0_6 = arith.constant 0 : index
    %c0_7 = arith.constant 0 : index
    %3 = vector.load %arg5[%c0_6, %c0_7] : memref<1x128xf32, #tpu.memory_space<vmem>>, vector<1x128xf32>
    %c0_8 = arith.constant 0 : index
    %c0_9 = arith.constant 0 : index
    %4 = vector.load %arg6[%c0_8, %c0_9] : memref<1x128xf32, #tpu.memory_space<vmem>>, vector<1x128xf32>
    %cst = arith.constant dense<0.000000e+00> : vector<1x128xf32>
    %5 = vector.multi_reduction <add>, %0, %cst [1] : vector<1x64x128xf32> to vector<1x128xf32>
    %cst_10 = arith.constant dense<0.000000e+00> : vector<1x32xf32>
    %6 = tpu.matmul %5, %1, %cst_10 {dimension_numbers = #tpu.dot_dimension_numbers<[1], [0], [0], [1], [0, 0, 1, 1], [], []>} : vector<1x128xf32>, vector<128x32xf32>, vector<1x32xf32> -> vector<1x32xf32>
    %cst_11 = arith.constant 1.562500e-02 : f32
    %7 = vector.broadcast %cst_11 : f32 to vector<1x32xf32>
    %8 = arith.mulf %6, %7 : vector<1x32xf32>
    %cst_12 = arith.constant dense<0.000000e+00> : vector<1x128xf32>
    %9 = tpu.matmul %8, %2, %cst_12 {dimension_numbers = #tpu.dot_dimension_numbers<[1], [0], [0], [1], [0, 0, 1, 1], [], []>} : vector<1x32xf32>, vector<32x128xf32>, vector<1x128xf32> -> vector<1x128xf32>
    %10 = vector.shape_cast %9 : vector<1x128xf32> to vector<1x1x128xf32>
    %11 = vector.broadcast %10 : vector<1x1x128xf32> to vector<1x64x128xf32>
    %12 = arith.subf %0, %11 : vector<1x64x128xf32>
    %13 = arith.mulf %12, %12 : vector<1x64x128xf32>
    %cst_13 = arith.constant dense<0.000000e+00> : vector<1x128xf32>
    %14 = vector.multi_reduction <add>, %13, %cst_13 [1] : vector<1x64x128xf32> to vector<1x128xf32>
    %cst_14 = arith.constant dense<0.000000e+00> : vector<1x32xf32>
    %15 = tpu.matmul %14, %1, %cst_14 {dimension_numbers = #tpu.dot_dimension_numbers<[1], [0], [0], [1], [0, 0, 1, 1], [], []>} : vector<1x128xf32>, vector<128x32xf32>, vector<1x32xf32> -> vector<1x32xf32>
    %cst_15 = arith.constant 1.562500e-02 : f32
    %16 = vector.broadcast %cst_15 : f32 to vector<1x32xf32>
    %17 = arith.mulf %15, %16 : vector<1x32xf32>
    %cst_16 = arith.constant 9.99999974E-6 : f32
    %18 = vector.broadcast %cst_16 : f32 to vector<1x32xf32>
    %19 = arith.addf %17, %18 : vector<1x32xf32>
    %20 = math.rsqrt %19 : vector<1x32xf32>
    %cst_17 = arith.constant dense<0.000000e+00> : vector<1x128xf32>
    %21 = tpu.matmul %20, %2, %cst_17 {dimension_numbers = #tpu.dot_dimension_numbers<[1], [0], [0], [1], [0, 0, 1, 1], [], []>} : vector<1x32xf32>, vector<32x128xf32>, vector<1x128xf32> -> vector<1x128xf32>
    %22 = vector.shape_cast %21 : vector<1x128xf32> to vector<1x1x128xf32>
    %23 = vector.broadcast %22 : vector<1x1x128xf32> to vector<1x64x128xf32>
    %24 = arith.mulf %12, %23 : vector<1x64x128xf32>
    %25 = vector.shape_cast %3 : vector<1x128xf32> to vector<1x1x128xf32>
    %26 = vector.broadcast %25 : vector<1x1x128xf32> to vector<1x64x128xf32>
    %27 = arith.mulf %24, %26 : vector<1x64x128xf32>
    %28 = vector.shape_cast %4 : vector<1x128xf32> to vector<1x1x128xf32>
    %29 = vector.broadcast %28 : vector<1x1x128xf32> to vector<1x64x128xf32>
    %30 = arith.addf %27, %29 : vector<1x64x128xf32>
    %cst_18 = arith.constant 0.000000e+00 : f32
    %31 = vector.broadcast %cst_18 : f32 to vector<1x64x128xf32>
    %32 = arith.subf %31, %30 : vector<1x64x128xf32>
    %33 = math.exp %32 : vector<1x64x128xf32>
    %cst_19 = arith.constant 1.000000e+00 : f32
    %34 = vector.broadcast %cst_19 : f32 to vector<1x64x128xf32>
    %35 = arith.addf %34, %33 : vector<1x64x128xf32>
    %36 = tpu.reciprocal %35 {approx = true} : vector<1x64x128xf32> -> vector<1x64x128xf32>
    %37 = arith.mulf %30, %36 : vector<1x64x128xf32>
    %cst_20 = arith.constant 0.000000e+00 : f32
    %38 = vector.broadcast %cst_20 : f32 to vector<1x10x10x128xf32>
    %c0_21 = arith.constant 0 : index
    %c0_22 = arith.constant 0 : index
    %c0_23 = arith.constant 0 : index
    %c0_24 = arith.constant 0 : index
    %39 = vector.load %arg12[%c0_21, %c0_22, %c0_23, %c0_24] : memref<1x10x10x128xf32, #tpu.memory_space<vmem>>, vector<1x10x10x128xf32>
    tpu.vector_store %arg12[%c0_21, %c0_22, %c0_23, %c0_24], %38 {strides = array<i32>} : memref<1x10x10x128xf32, #tpu.memory_space<vmem>>, vector<1x10x10x128xf32>,
    %40 = vector.shape_cast %37 : vector<1x64x128xf32> to vector<1x8x8x128xf32>
    %c0_25 = arith.constant 0 : index
    %c1 = arith.constant 1 : index
    %c1_26 = arith.constant 1 : index
    %c0_27 = arith.constant 0 : index
    %41 = vector.load %arg12[%c0_25, %c1, %c1_26, %c0_27] : memref<1x10x10x128xf32, #tpu.memory_space<vmem>>, vector<1x8x8x128xf32>
    tpu.vector_store %arg12[%c0_25, %c1, %c1_26, %c0_27], %40 {strides = array<i32>} : memref<1x10x10x128xf32, #tpu.memory_space<vmem>>, vector<1x8x8x128xf32>,
    %cst_28 = arith.constant 0.000000e+00 : f32
    %42 = vector.broadcast %cst_28 : f32 to vector<64x128xf32>
    %c0_29 = arith.constant 0 : index
    %c0_30 = arith.constant 0 : index
    %c0_31 = arith.constant 0 : index
    %c0_32 = arith.constant 0 : index
    %43 = vector.load %arg12[%c0_29, %c0_30, %c0_31, %c0_32] : memref<1x10x10x128xf32, #tpu.memory_space<vmem>>, vector<1x8x8x128xf32>
    %44 = vector.shape_cast %43 : vector<1x8x8x128xf32> to vector<64x128xf32>
    %45 = arith.truncf %44 : vector<64x128xf32> to vector<64x128xbf16>
    %c0_33 = arith.constant 0 : index
    %c0_34 = arith.constant 0 : index
    %c0_35 = arith.constant 0 : index
    %46 = vector.load %arg7[%c0_33, %c0_34, %c0_35] : memref<9x128x128xbf16, #tpu.memory_space<vmem>>, vector<1x128x128xbf16>
    %47 = vector.shape_cast %46 : vector<1x128x128xbf16> to vector<128x128xbf16>
    %cst_36 = arith.constant dense<0.000000e+00> : vector<64x128xf32>
    %48 = tpu.matmul %45, %47, %cst_36 {dimension_numbers = #tpu.dot_dimension_numbers<[1], [0], [0], [1], [0, 0, 1, 1], [], []>} : vector<64x128xbf16>, vector<128x128xbf16>, vector<64x128xf32> -> vector<64x128xf32>
    %49 = arith.addf %42, %48 : vector<64x128xf32>
    %c0_37 = arith.constant 0 : index
    %c0_38 = arith.constant 0 : index
    %c1_39 = arith.constant 1 : index
    %c0_40 = arith.constant 0 : index
    %50 = vector.load %arg12[%c0_37, %c0_38, %c1_39, %c0_40] : memref<1x10x10x128xf32, #tpu.memory_space<vmem>>, vector<1x8x8x128xf32>
    %51 = vector.shape_cast %50 : vector<1x8x8x128xf32> to vector<64x128xf32>
    %52 = arith.truncf %51 : vector<64x128xf32> to vector<64x128xbf16>
    %c1_41 = arith.constant 1 : index
    %c0_42 = arith.constant 0 : index
    %c0_43 = arith.constant 0 : index
    %53 = vector.load %arg7[%c1_41, %c0_42, %c0_43] : memref<9x128x128xbf16, #tpu.memory_space<vmem>>, vector<1x128x128xbf16>
    %54 = vector.shape_cast %53 : vector<1x128x128xbf16> to vector<128x128xbf16>
    %cst_44 = arith.constant dense<0.000000e+00> : vector<64x128xf32>
    %55 = tpu.matmul %52, %54, %cst_44 {dimension_numbers = #tpu.dot_dimension_numbers<[1], [0], [0], [1], [0, 0, 1, 1], [], []>} : vector<64x128xbf16>, vector<128x128xbf16>, vector<64x128xf32> -> vector<64x128xf32>
    %56 = arith.addf %49, %55 : vector<64x128xf32>
    %c0_45 = arith.constant 0 : index
    %c0_46 = arith.constant 0 : index
    %c2 = arith.constant 2 : index
    %c0_47 = arith.constant 0 : index
    %57 = vector.load %arg12[%c0_45, %c0_46, %c2, %c0_47] : memref<1x10x10x128xf32, #tpu.memory_space<vmem>>, vector<1x8x8x128xf32>
    %58 = vector.shape_cast %57 : vector<1x8x8x128xf32> to vector<64x128xf32>
    %59 = arith.truncf %58 : vector<64x128xf32> to vector<64x128xbf16>
    %c2_48 = arith.constant 2 : index
    %c0_49 = arith.constant 0 : index
    %c0_50 = arith.constant 0 : index
    %60 = vector.load %arg7[%c2_48, %c0_49, %c0_50] : memref<9x128x128xbf16, #tpu.memory_space<vmem>>, vector<1x128x128xbf16>
    %61 = vector.shape_cast %60 : vector<1x128x128xbf16> to vector<128x128xbf16>
    %cst_51 = arith.constant dense<0.000000e+00> : vector<64x128xf32>
    %62 = tpu.matmul %59, %61, %cst_51 {dimension_numbers = #tpu.dot_dimension_numbers<[1], [0], [0], [1], [0, 0, 1, 1], [], []>} : vector<64x128xbf16>, vector<128x128xbf16>, vector<64x128xf32> -> vector<64x128xf32>
    %63 = arith.addf %56, %62 : vector<64x128xf32>
    %c0_52 = arith.constant 0 : index
    %c1_53 = arith.constant 1 : index
    %c0_54 = arith.constant 0 : index
    %c0_55 = arith.constant 0 : index
    %64 = vector.load %arg12[%c0_52, %c1_53, %c0_54, %c0_55] : memref<1x10x10x128xf32, #tpu.memory_space<vmem>>, vector<1x8x8x128xf32>
    %65 = vector.shape_cast %64 : vector<1x8x8x128xf32> to vector<64x128xf32>
    %66 = arith.truncf %65 : vector<64x128xf32> to vector<64x128xbf16>
    %c3 = arith.constant 3 : index
    %c0_56 = arith.constant 0 : index
    %c0_57 = arith.constant 0 : index
    %67 = vector.load %arg7[%c3, %c0_56, %c0_57] : memref<9x128x128xbf16, #tpu.memory_space<vmem>>, vector<1x128x128xbf16>
    %68 = vector.shape_cast %67 : vector<1x128x128xbf16> to vector<128x128xbf16>
    %cst_58 = arith.constant dense<0.000000e+00> : vector<64x128xf32>
    %69 = tpu.matmul %66, %68, %cst_58 {dimension_numbers = #tpu.dot_dimension_numbers<[1], [0], [0], [1], [0, 0, 1, 1], [], []>} : vector<64x128xbf16>, vector<128x128xbf16>, vector<64x128xf32> -> vector<64x128xf32>
    %70 = arith.addf %63, %69 : vector<64x128xf32>
    %c0_59 = arith.constant 0 : index
    %c1_60 = arith.constant 1 : index
    %c1_61 = arith.constant 1 : index
    %c0_62 = arith.constant 0 : index
    %71 = vector.load %arg12[%c0_59, %c1_60, %c1_61, %c0_62] : memref<1x10x10x128xf32, #tpu.memory_space<vmem>>, vector<1x8x8x128xf32>
    %72 = vector.shape_cast %71 : vector<1x8x8x128xf32> to vector<64x128xf32>
    %73 = arith.truncf %72 : vector<64x128xf32> to vector<64x128xbf16>
    %c4 = arith.constant 4 : index
    %c0_63 = arith.constant 0 : index
    %c0_64 = arith.constant 0 : index
    %74 = vector.load %arg7[%c4, %c0_63, %c0_64] : memref<9x128x128xbf16, #tpu.memory_space<vmem>>, vector<1x128x128xbf16>
    %75 = vector.shape_cast %74 : vector<1x128x128xbf16> to vector<128x128xbf16>
    %cst_65 = arith.constant dense<0.000000e+00> : vector<64x128xf32>
    %76 = tpu.matmul %73, %75, %cst_65 {dimension_numbers = #tpu.dot_dimension_numbers<[1], [0], [0], [1], [0, 0, 1, 1], [], []>} : vector<64x128xbf16>, vector<128x128xbf16>, vector<64x128xf32> -> vector<64x128xf32>
    %77 = arith.addf %70, %76 : vector<64x128xf32>
    %c0_66 = arith.constant 0 : index
    %c1_67 = arith.constant 1 : index
    %c2_68 = arith.constant 2 : index
    %c0_69 = arith.constant 0 : index
    %78 = vector.load %arg12[%c0_66, %c1_67, %c2_68, %c0_69] : memref<1x10x10x128xf32, #tpu.memory_space<vmem>>, vector<1x8x8x128xf32>
    %79 = vector.shape_cast %78 : vector<1x8x8x128xf32> to vector<64x128xf32>
    %80 = arith.truncf %79 : vector<64x128xf32> to vector<64x128xbf16>
    %c5 = arith.constant 5 : index
    %c0_70 = arith.constant 0 : index
    %c0_71 = arith.constant 0 : index
    %81 = vector.load %arg7[%c5, %c0_70, %c0_71] : memref<9x128x128xbf16, #tpu.memory_space<vmem>>, vector<1x128x128xbf16>
    %82 = vector.shape_cast %81 : vector<1x128x128xbf16> to vector<128x128xbf16>
    %cst_72 = arith.constant dense<0.000000e+00> : vector<64x128xf32>
    %83 = tpu.matmul %80, %82, %cst_72 {dimension_numbers = #tpu.dot_dimension_numbers<[1], [0], [0], [1], [0, 0, 1, 1], [], []>} : vector<64x128xbf16>, vector<128x128xbf16>, vector<64x128xf32> -> vector<64x128xf32>
    %84 = arith.addf %77, %83 : vector<64x128xf32>
    %c0_73 = arith.constant 0 : index
    %c2_74 = arith.constant 2 : index
    %c0_75 = arith.constant 0 : index
    %c0_76 = arith.constant 0 : index
    %85 = vector.load %arg12[%c0_73, %c2_74, %c0_75, %c0_76] : memref<1x10x10x128xf32, #tpu.memory_space<vmem>>, vector<1x8x8x128xf32>
    %86 = vector.shape_cast %85 : vector<1x8x8x128xf32> to vector<64x128xf32>
    %87 = arith.truncf %86 : vector<64x128xf32> to vector<64x128xbf16>
    %c6 = arith.constant 6 : index
    %c0_77 = arith.constant 0 : index
    %c0_78 = arith.constant 0 : index
    %88 = vector.load %arg7[%c6, %c0_77, %c0_78] : memref<9x128x128xbf16, #tpu.memory_space<vmem>>, vector<1x128x128xbf16>
    %89 = vector.shape_cast %88 : vector<1x128x128xbf16> to vector<128x128xbf16>
    %cst_79 = arith.constant dense<0.000000e+00> : vector<64x128xf32>
    %90 = tpu.matmul %87, %89, %cst_79 {dimension_numbers = #tpu.dot_dimension_numbers<[1], [0], [0], [1], [0, 0, 1, 1], [], []>} : vector<64x128xbf16>, vector<128x128xbf16>, vector<64x128xf32> -> vector<64x128xf32>
    %91 = arith.addf %84, %90 : vector<64x128xf32>
    %c0_80 = arith.constant 0 : index
    %c2_81 = arith.constant 2 : index
    %c1_82 = arith.constant 1 : index
    %c0_83 = arith.constant 0 : index
    %92 = vector.load %arg12[%c0_80, %c2_81, %c1_82, %c0_83] : memref<1x10x10x128xf32, #tpu.memory_space<vmem>>, vector<1x8x8x128xf32>
    %93 = vector.shape_cast %92 : vector<1x8x8x128xf32> to vector<64x128xf32>
    %94 = arith.truncf %93 : vector<64x128xf32> to vector<64x128xbf16>
    %c7 = arith.constant 7 : index
    %c0_84 = arith.constant 0 : index
    %c0_85 = arith.constant 0 : index
    %95 = vector.load %arg7[%c7, %c0_84, %c0_85] : memref<9x128x128xbf16, #tpu.memory_space<vmem>>, vector<1x128x128xbf16>
    %96 = vector.shape_cast %95 : vector<1x128x128xbf16> to vector<128x128xbf16>
    %cst_86 = arith.constant dense<0.000000e+00> : vector<64x128xf32>
    %97 = tpu.matmul %94, %96, %cst_86 {dimension_numbers = #tpu.dot_dimension_numbers<[1], [0], [0], [1], [0, 0, 1, 1], [], []>} : vector<64x128xbf16>, vector<128x128xbf16>, vector<64x128xf32> -> vector<64x128xf32>
    %98 = arith.addf %91, %97 : vector<64x128xf32>
    %c0_87 = arith.constant 0 : index
    %c2_88 = arith.constant 2 : index
    %c2_89 = arith.constant 2 : index
    %c0_90 = arith.constant 0 : index
    %99 = vector.load %arg12[%c0_87, %c2_88, %c2_89, %c0_90] : memref<1x10x10x128xf32, #tpu.memory_space<vmem>>, vector<1x8x8x128xf32>
    %100 = vector.shape_cast %99 : vector<1x8x8x128xf32> to vector<64x128xf32>
    %101 = arith.truncf %100 : vector<64x128xf32> to vector<64x128xbf16>
    %c8 = arith.constant 8 : index
    %c0_91 = arith.constant 0 : index
    %c0_92 = arith.constant 0 : index
    %102 = vector.load %arg7[%c8, %c0_91, %c0_92] : memref<9x128x128xbf16, #tpu.memory_space<vmem>>, vector<1x128x128xbf16>
    %103 = vector.shape_cast %102 : vector<1x128x128xbf16> to vector<128x128xbf16>
    %cst_93 = arith.constant dense<0.000000e+00> : vector<64x128xf32>
    %104 = tpu.matmul %101, %103, %cst_93 {dimension_numbers = #tpu.dot_dimension_numbers<[1], [0], [0], [1], [0, 0, 1, 1], [], []>} : vector<64x128xbf16>, vector<128x128xbf16>, vector<64x128xf32> -> vector<64x128xf32>
    %105 = arith.addf %98, %104 : vector<64x128xf32>
    %c0_94 = arith.constant 0 : index
    %c0_95 = arith.constant 0 : index
    %c0_96 = arith.constant 0 : index
    %106 = vector.load %arg2[%c0_94, %c0_95, %c0_96] : memref<1x1x128xf32, #tpu.memory_space<vmem>>, vector<1x1x128xf32>
    %107 = vector.shape_cast %106 : vector<1x1x128xf32> to vector<1x128xf32>
    %cst_97 = arith.constant 0.000000e+00 : f32
    %108 = vector.broadcast %cst_97 : f32 to vector<1x128xf32>
    %109 = arith.subf %108, %107 : vector<1x128xf32>
    %110 = math.exp %109 : vector<1x128xf32>
    %cst_98 = arith.constant 1.000000e+00 : f32
    %111 = vector.broadcast %cst_98 : f32 to vector<1x128xf32>
    %112 = arith.addf %111, %110 : vector<1x128xf32>
    %113 = tpu.reciprocal %112 {approx = true} : vector<1x128xf32> -> vector<1x128xf32>
    %114 = arith.mulf %107, %113 : vector<1x128xf32>
    %115 = arith.truncf %114 : vector<1x128xf32> to vector<1x128xbf16>
    %c0_99 = arith.constant 0 : index
    %c0_100 = arith.constant 0 : index
    %116 = vector.load %arg9[%c0_99, %c0_100] : memref<128x128xbf16, #tpu.memory_space<vmem>>, vector<128x128xbf16>
    %cst_101 = arith.constant dense<0.000000e+00> : vector<1x128xf32>
    %117 = tpu.matmul %115, %116, %cst_101 {dimension_numbers = #tpu.dot_dimension_numbers<[1], [0], [0], [1], [0, 0, 1, 1], [], []>} : vector<1x128xbf16>, vector<128x128xbf16>, vector<1x128xf32> -> vector<1x128xf32>
    %c0_102 = arith.constant 0 : index
    %c0_103 = arith.constant 0 : index
    %118 = vector.load %arg10[%c0_102, %c0_103] : memref<1x128xf32, #tpu.memory_space<vmem>>, vector<1x128xf32>
    %119 = arith.addf %117, %118 : vector<1x128xf32>
    %120 = vector.shape_cast %105 : vector<64x128xf32> to vector<1x64x128xf32>
    %c0_104 = arith.constant 0 : index
    %c0_105 = arith.constant 0 : index
    %121 = vector.load %arg8[%c0_104, %c0_105] : memref<1x128xf32, #tpu.memory_space<vmem>>, vector<1x128xf32>
    %122 = vector.shape_cast %121 : vector<1x128xf32> to vector<1x1x128xf32>
    %123 = vector.broadcast %122 : vector<1x1x128xf32> to vector<1x64x128xf32>
    %124 = arith.addf %120, %123 : vector<1x64x128xf32>
    %125 = vector.shape_cast %119 : vector<1x128xf32> to vector<1x1x128xf32>
    %126 = vector.broadcast %125 : vector<1x1x128xf32> to vector<1x64x128xf32>
    %127 = arith.addf %124, %126 : vector<1x64x128xf32>
    %c0_106 = arith.constant 0 : index
    %c0_107 = arith.constant 0 : index
    %c0_108 = arith.constant 0 : index
    %128 = vector.load %arg11[%c0_106, %c0_107, %c0_108] : memref<1x64x128xf32, #tpu.memory_space<vmem>>, vector<1x64x128xf32>
    tpu.vector_store %arg11[%c0_106, %c0_107, %c0_108], %127 {strides = array<i32>} : memref<1x64x128xf32, #tpu.memory_space<vmem>>, vector<1x64x128xf32>,
    return
  }
  func.func @transform_0(%arg0: i32) -> (i32, i32, i32) {
    %c0_i32 = arith.constant 0 : i32
    %c0_i32_0 = arith.constant 0 : i32
    %c0_i32_1 = arith.constant 0 : i32
    return %arg0, %c0_i32, %c0_i32_0 : i32, i32, i32
  }
  func.func @transform_1(%arg0: i32) -> (i32, i32, i32) {
    %c0_i32 = arith.constant 0 : i32
    %c0_i32_0 = arith.constant 0 : i32
    %c0_i32_1 = arith.constant 0 : i32
    return %arg0, %c0_i32, %c0_i32_0 : i32, i32, i32
  }
  func.func @transform_2(%arg0: i32) -> (i32, i32) {
    %c0_i32 = arith.constant 0 : i32
    %c0_i32_0 = arith.constant 0 : i32
    %c0_i32_1 = arith.constant 0 : i32
    return %c0_i32, %c0_i32_0 : i32, i32
  }
  func.func @transform_3(%arg0: i32) -> (i32, i32) {
    %c0_i32 = arith.constant 0 : i32
    %c0_i32_0 = arith.constant 0 : i32
    %c0_i32_1 = arith.constant 0 : i32
    return %c0_i32, %c0_i32_0 : i32, i32
  }
  func.func @transform_4(%arg0: i32) -> (i32, i32) {
    %c0_i32 = arith.constant 0 : i32
    %c0_i32_0 = arith.constant 0 : i32
    %c0_i32_1 = arith.constant 0 : i32
    return %c0_i32, %c0_i32_0 : i32, i32
  }
  func.func @transform_5(%arg0: i32) -> (i32, i32) {
    %c0_i32 = arith.constant 0 : i32
    %c0_i32_0 = arith.constant 0 : i32
    %c0_i32_1 = arith.constant 0 : i32
    return %c0_i32, %c0_i32_0 : i32, i32
  }
  func.func @transform_6(%arg0: i32) -> (i32, i32, i32) {
    %c0_i32 = arith.constant 0 : i32
    %c0_i32_0 = arith.constant 0 : i32
    %c0_i32_1 = arith.constant 0 : i32
    %c0_i32_2 = arith.constant 0 : i32
    return %c0_i32, %c0_i32_0, %c0_i32_1 : i32, i32, i32
  }
  func.func @transform_7(%arg0: i32) -> (i32, i32) {
    %c0_i32 = arith.constant 0 : i32
    %c0_i32_0 = arith.constant 0 : i32
    %c0_i32_1 = arith.constant 0 : i32
    return %c0_i32, %c0_i32_0 : i32, i32
  }
  func.func @transform_8(%arg0: i32) -> (i32, i32) {
    %c0_i32 = arith.constant 0 : i32
    %c0_i32_0 = arith.constant 0 : i32
    %c0_i32_1 = arith.constant 0 : i32
    return %c0_i32, %c0_i32_0 : i32, i32
  }
  func.func @transform_9(%arg0: i32) -> (i32, i32) {
    %c0_i32 = arith.constant 0 : i32
    %c0_i32_0 = arith.constant 0 : i32
    %c0_i32_1 = arith.constant 0 : i32
    return %c0_i32, %c0_i32_0 : i32, i32
  }
  func.func @transform_10(%arg0: i32) -> (i32, i32, i32) {
    %c0_i32 = arith.constant 0 : i32
    %c0_i32_0 = arith.constant 0 : i32
    %c0_i32_1 = arith.constant 0 : i32
    return %arg0, %c0_i32, %c0_i32_0 : i32, i32, i32
  }
}

module attributes {stable_mosaic.version = 11 : i64} {
  func.func @_conv2_kernel(%arg0: i32, %arg1: memref<1x64x128xf32, #tpu.memory_space<vmem>>, %arg2: memref<1x64x128xf32, #tpu.memory_space<vmem>>, %arg3: memref<128x32xf32, #tpu.memory_space<vmem>>, %arg4: memref<32x128xf32, #tpu.memory_space<vmem>>, %arg5: memref<1x128xf32, #tpu.memory_space<vmem>>, %arg6: memref<1x128xf32, #tpu.memory_space<vmem>>, %arg7: memref<9x128x128xbf16, #tpu.memory_space<vmem>>, %arg8: memref<1x128xf32, #tpu.memory_space<vmem>>, %arg9: memref<128x128xbf16, #tpu.memory_space<vmem>>, %arg10: memref<1x128xf32, #tpu.memory_space<vmem>>, %arg11: memref<1x64x128xf32, #tpu.memory_space<vmem>>, %arg12: memref<1x10x10x128xf32, #tpu.memory_space<vmem>>) attributes {dimension_semantics = [#tpu.dimension_semantics<parallel>], iteration_bounds = array<i64: 2>, scalar_prefetch = 0 : i64, scratch_operands = 1 : i64, tpu.core_type = #tpu.core_type<tc>, window_params = [{transform_indices = @transform_0, window_bounds = array<i64: 1, 64, 128>}, {transform_indices = @transform_1, window_bounds = array<i64: 1, 64, 128>}, {pipeline_mode = #tpu.pipeline_mode<synchronous>, transform_indices = @transform_2, window_bounds = array<i64: 128, 32>}, {pipeline_mode = #tpu.pipeline_mode<synchronous>, transform_indices = @transform_3, window_bounds = array<i64: 32, 128>}, {pipeline_mode = #tpu.pipeline_mode<synchronous>, transform_indices = @transform_4, window_bounds = array<i64: 1, 128>}, {pipeline_mode = #tpu.pipeline_mode<synchronous>, transform_indices = @transform_5, window_bounds = array<i64: 1, 128>}, {pipeline_mode = #tpu.pipeline_mode<synchronous>, transform_indices = @transform_6, window_bounds = array<i64: 9, 128, 128>}, {pipeline_mode = #tpu.pipeline_mode<synchronous>, transform_indices = @transform_7, window_bounds = array<i64: 1, 128>}, {pipeline_mode = #tpu.pipeline_mode<synchronous>, transform_indices = @transform_8, window_bounds = array<i64: 128, 128>}, {pipeline_mode = #tpu.pipeline_mode<synchronous>, transform_indices = @transform_9, window_bounds = array<i64: 1, 128>}, {transform_indices = @transform_10, window_bounds = array<i64: 1, 64, 128>}]} {
    %c0 = arith.constant 0 : index
    %c0_0 = arith.constant 0 : index
    %c0_1 = arith.constant 0 : index
    %0 = vector.load %arg1[%c0, %c0_0, %c0_1] : memref<1x64x128xf32, #tpu.memory_space<vmem>>, vector<1x64x128xf32>
    %c0_2 = arith.constant 0 : index
    %c0_3 = arith.constant 0 : index
    %1 = vector.load %arg3[%c0_2, %c0_3] : memref<128x32xf32, #tpu.memory_space<vmem>>, vector<128x32xf32>
    %c0_4 = arith.constant 0 : index
    %c0_5 = arith.constant 0 : index
    %2 = vector.load %arg4[%c0_4, %c0_5] : memref<32x128xf32, #tpu.memory_space<vmem>>, vector<32x128xf32>
    %c0_6 = arith.constant 0 : index
    %c0_7 = arith.constant 0 : index
    %3 = vector.load %arg5[%c0_6, %c0_7] : memref<1x128xf32, #tpu.memory_space<vmem>>, vector<1x128xf32>
    %c0_8 = arith.constant 0 : index
    %c0_9 = arith.constant 0 : index
    %4 = vector.load %arg6[%c0_8, %c0_9] : memref<1x128xf32, #tpu.memory_space<vmem>>, vector<1x128xf32>
    %cst = arith.constant dense<0.000000e+00> : vector<1x128xf32>
    %5 = vector.multi_reduction <add>, %0, %cst [1] : vector<1x64x128xf32> to vector<1x128xf32>
    %cst_10 = arith.constant dense<0.000000e+00> : vector<1x32xf32>
    %6 = tpu.matmul %5, %1, %cst_10 {dimension_numbers = #tpu.dot_dimension_numbers<[1], [0], [0], [1], [0, 0, 1, 1], [], []>} : vector<1x128xf32>, vector<128x32xf32>, vector<1x32xf32> -> vector<1x32xf32>
    %cst_11 = arith.constant 7.812500e-03 : f32
    %7 = vector.broadcast %cst_11 : f32 to vector<1x32xf32>
    %8 = arith.mulf %6, %7 : vector<1x32xf32>
    %cst_12 = arith.constant dense<0.000000e+00> : vector<1x128xf32>
    %9 = tpu.matmul %8, %2, %cst_12 {dimension_numbers = #tpu.dot_dimension_numbers<[1], [0], [0], [1], [0, 0, 1, 1], [], []>} : vector<1x32xf32>, vector<32x128xf32>, vector<1x128xf32> -> vector<1x128xf32>
    %10 = vector.shape_cast %9 : vector<1x128xf32> to vector<1x1x128xf32>
    %11 = vector.broadcast %10 : vector<1x1x128xf32> to vector<1x64x128xf32>
    %12 = arith.subf %0, %11 : vector<1x64x128xf32>
    %13 = arith.mulf %12, %12 : vector<1x64x128xf32>
    %cst_13 = arith.constant dense<0.000000e+00> : vector<1x128xf32>
    %14 = vector.multi_reduction <add>, %13, %cst_13 [1] : vector<1x64x128xf32> to vector<1x128xf32>
    %cst_14 = arith.constant dense<0.000000e+00> : vector<1x32xf32>
    %15 = tpu.matmul %14, %1, %cst_14 {dimension_numbers = #tpu.dot_dimension_numbers<[1], [0], [0], [1], [0, 0, 1, 1], [], []>} : vector<1x128xf32>, vector<128x32xf32>, vector<1x32xf32> -> vector<1x32xf32>
    %cst_15 = arith.constant 7.812500e-03 : f32
    %16 = vector.broadcast %cst_15 : f32 to vector<1x32xf32>
    %17 = arith.mulf %15, %16 : vector<1x32xf32>
    %cst_16 = arith.constant 9.99999974E-6 : f32
    %18 = vector.broadcast %cst_16 : f32 to vector<1x32xf32>
    %19 = arith.addf %17, %18 : vector<1x32xf32>
    %20 = math.rsqrt %19 : vector<1x32xf32>
    %cst_17 = arith.constant dense<0.000000e+00> : vector<1x128xf32>
    %21 = tpu.matmul %20, %2, %cst_17 {dimension_numbers = #tpu.dot_dimension_numbers<[1], [0], [0], [1], [0, 0, 1, 1], [], []>} : vector<1x32xf32>, vector<32x128xf32>, vector<1x128xf32> -> vector<1x128xf32>
    %22 = vector.shape_cast %21 : vector<1x128xf32> to vector<1x1x128xf32>
    %23 = vector.broadcast %22 : vector<1x1x128xf32> to vector<1x64x128xf32>
    %24 = arith.mulf %12, %23 : vector<1x64x128xf32>
    %25 = vector.shape_cast %3 : vector<1x128xf32> to vector<1x1x128xf32>
    %26 = vector.broadcast %25 : vector<1x1x128xf32> to vector<1x64x128xf32>
    %27 = arith.mulf %24, %26 : vector<1x64x128xf32>
    %28 = vector.shape_cast %4 : vector<1x128xf32> to vector<1x1x128xf32>
    %29 = vector.broadcast %28 : vector<1x1x128xf32> to vector<1x64x128xf32>
    %30 = arith.addf %27, %29 : vector<1x64x128xf32>
    %cst_18 = arith.constant 0.000000e+00 : f32
    %31 = vector.broadcast %cst_18 : f32 to vector<1x64x128xf32>
    %32 = arith.subf %31, %30 : vector<1x64x128xf32>
    %33 = math.exp %32 : vector<1x64x128xf32>
    %cst_19 = arith.constant 1.000000e+00 : f32
    %34 = vector.broadcast %cst_19 : f32 to vector<1x64x128xf32>
    %35 = arith.addf %34, %33 : vector<1x64x128xf32>
    %36 = tpu.reciprocal %35 {approx = true} : vector<1x64x128xf32> -> vector<1x64x128xf32>
    %37 = arith.mulf %30, %36 : vector<1x64x128xf32>
    %cst_20 = arith.constant 0.000000e+00 : f32
    %38 = vector.broadcast %cst_20 : f32 to vector<1x10x10x128xf32>
    %c0_21 = arith.constant 0 : index
    %c0_22 = arith.constant 0 : index
    %c0_23 = arith.constant 0 : index
    %c0_24 = arith.constant 0 : index
    %39 = vector.load %arg12[%c0_21, %c0_22, %c0_23, %c0_24] : memref<1x10x10x128xf32, #tpu.memory_space<vmem>>, vector<1x10x10x128xf32>
    tpu.vector_store %arg12[%c0_21, %c0_22, %c0_23, %c0_24], %38 {strides = array<i32>} : memref<1x10x10x128xf32, #tpu.memory_space<vmem>>, vector<1x10x10x128xf32>,
    %40 = vector.shape_cast %37 : vector<1x64x128xf32> to vector<1x8x8x128xf32>
    %c0_25 = arith.constant 0 : index
    %c1 = arith.constant 1 : index
    %c1_26 = arith.constant 1 : index
    %c0_27 = arith.constant 0 : index
    %41 = vector.load %arg12[%c0_25, %c1, %c1_26, %c0_27] : memref<1x10x10x128xf32, #tpu.memory_space<vmem>>, vector<1x8x8x128xf32>
    tpu.vector_store %arg12[%c0_25, %c1, %c1_26, %c0_27], %40 {strides = array<i32>} : memref<1x10x10x128xf32, #tpu.memory_space<vmem>>, vector<1x8x8x128xf32>,
    %cst_28 = arith.constant 0.000000e+00 : f32
    %42 = vector.broadcast %cst_28 : f32 to vector<64x128xf32>
    %c0_29 = arith.constant 0 : index
    %c0_30 = arith.constant 0 : index
    %c0_31 = arith.constant 0 : index
    %c0_32 = arith.constant 0 : index
    %43 = vector.load %arg12[%c0_29, %c0_30, %c0_31, %c0_32] : memref<1x10x10x128xf32, #tpu.memory_space<vmem>>, vector<1x8x8x128xf32>
    %44 = vector.shape_cast %43 : vector<1x8x8x128xf32> to vector<64x128xf32>
    %45 = arith.truncf %44 : vector<64x128xf32> to vector<64x128xbf16>
    %c0_33 = arith.constant 0 : index
    %c0_34 = arith.constant 0 : index
    %c0_35 = arith.constant 0 : index
    %46 = vector.load %arg7[%c0_33, %c0_34, %c0_35] : memref<9x128x128xbf16, #tpu.memory_space<vmem>>, vector<1x128x128xbf16>
    %47 = vector.shape_cast %46 : vector<1x128x128xbf16> to vector<128x128xbf16>
    %cst_36 = arith.constant dense<0.000000e+00> : vector<64x128xf32>
    %48 = tpu.matmul %45, %47, %cst_36 {dimension_numbers = #tpu.dot_dimension_numbers<[1], [0], [0], [1], [0, 0, 1, 1], [], []>} : vector<64x128xbf16>, vector<128x128xbf16>, vector<64x128xf32> -> vector<64x128xf32>
    %49 = arith.addf %42, %48 : vector<64x128xf32>
    %c0_37 = arith.constant 0 : index
    %c0_38 = arith.constant 0 : index
    %c1_39 = arith.constant 1 : index
    %c0_40 = arith.constant 0 : index
    %50 = vector.load %arg12[%c0_37, %c0_38, %c1_39, %c0_40] : memref<1x10x10x128xf32, #tpu.memory_space<vmem>>, vector<1x8x8x128xf32>
    %51 = vector.shape_cast %50 : vector<1x8x8x128xf32> to vector<64x128xf32>
    %52 = arith.truncf %51 : vector<64x128xf32> to vector<64x128xbf16>
    %c1_41 = arith.constant 1 : index
    %c0_42 = arith.constant 0 : index
    %c0_43 = arith.constant 0 : index
    %53 = vector.load %arg7[%c1_41, %c0_42, %c0_43] : memref<9x128x128xbf16, #tpu.memory_space<vmem>>, vector<1x128x128xbf16>
    %54 = vector.shape_cast %53 : vector<1x128x128xbf16> to vector<128x128xbf16>
    %cst_44 = arith.constant dense<0.000000e+00> : vector<64x128xf32>
    %55 = tpu.matmul %52, %54, %cst_44 {dimension_numbers = #tpu.dot_dimension_numbers<[1], [0], [0], [1], [0, 0, 1, 1], [], []>} : vector<64x128xbf16>, vector<128x128xbf16>, vector<64x128xf32> -> vector<64x128xf32>
    %56 = arith.addf %49, %55 : vector<64x128xf32>
    %c0_45 = arith.constant 0 : index
    %c0_46 = arith.constant 0 : index
    %c2 = arith.constant 2 : index
    %c0_47 = arith.constant 0 : index
    %57 = vector.load %arg12[%c0_45, %c0_46, %c2, %c0_47] : memref<1x10x10x128xf32, #tpu.memory_space<vmem>>, vector<1x8x8x128xf32>
    %58 = vector.shape_cast %57 : vector<1x8x8x128xf32> to vector<64x128xf32>
    %59 = arith.truncf %58 : vector<64x128xf32> to vector<64x128xbf16>
    %c2_48 = arith.constant 2 : index
    %c0_49 = arith.constant 0 : index
    %c0_50 = arith.constant 0 : index
    %60 = vector.load %arg7[%c2_48, %c0_49, %c0_50] : memref<9x128x128xbf16, #tpu.memory_space<vmem>>, vector<1x128x128xbf16>
    %61 = vector.shape_cast %60 : vector<1x128x128xbf16> to vector<128x128xbf16>
    %cst_51 = arith.constant dense<0.000000e+00> : vector<64x128xf32>
    %62 = tpu.matmul %59, %61, %cst_51 {dimension_numbers = #tpu.dot_dimension_numbers<[1], [0], [0], [1], [0, 0, 1, 1], [], []>} : vector<64x128xbf16>, vector<128x128xbf16>, vector<64x128xf32> -> vector<64x128xf32>
    %63 = arith.addf %56, %62 : vector<64x128xf32>
    %c0_52 = arith.constant 0 : index
    %c1_53 = arith.constant 1 : index
    %c0_54 = arith.constant 0 : index
    %c0_55 = arith.constant 0 : index
    %64 = vector.load %arg12[%c0_52, %c1_53, %c0_54, %c0_55] : memref<1x10x10x128xf32, #tpu.memory_space<vmem>>, vector<1x8x8x128xf32>
    %65 = vector.shape_cast %64 : vector<1x8x8x128xf32> to vector<64x128xf32>
    %66 = arith.truncf %65 : vector<64x128xf32> to vector<64x128xbf16>
    %c3 = arith.constant 3 : index
    %c0_56 = arith.constant 0 : index
    %c0_57 = arith.constant 0 : index
    %67 = vector.load %arg7[%c3, %c0_56, %c0_57] : memref<9x128x128xbf16, #tpu.memory_space<vmem>>, vector<1x128x128xbf16>
    %68 = vector.shape_cast %67 : vector<1x128x128xbf16> to vector<128x128xbf16>
    %cst_58 = arith.constant dense<0.000000e+00> : vector<64x128xf32>
    %69 = tpu.matmul %66, %68, %cst_58 {dimension_numbers = #tpu.dot_dimension_numbers<[1], [0], [0], [1], [0, 0, 1, 1], [], []>} : vector<64x128xbf16>, vector<128x128xbf16>, vector<64x128xf32> -> vector<64x128xf32>
    %70 = arith.addf %63, %69 : vector<64x128xf32>
    %c0_59 = arith.constant 0 : index
    %c1_60 = arith.constant 1 : index
    %c1_61 = arith.constant 1 : index
    %c0_62 = arith.constant 0 : index
    %71 = vector.load %arg12[%c0_59, %c1_60, %c1_61, %c0_62] : memref<1x10x10x128xf32, #tpu.memory_space<vmem>>, vector<1x8x8x128xf32>
    %72 = vector.shape_cast %71 : vector<1x8x8x128xf32> to vector<64x128xf32>
    %73 = arith.truncf %72 : vector<64x128xf32> to vector<64x128xbf16>
    %c4 = arith.constant 4 : index
    %c0_63 = arith.constant 0 : index
    %c0_64 = arith.constant 0 : index
    %74 = vector.load %arg7[%c4, %c0_63, %c0_64] : memref<9x128x128xbf16, #tpu.memory_space<vmem>>, vector<1x128x128xbf16>
    %75 = vector.shape_cast %74 : vector<1x128x128xbf16> to vector<128x128xbf16>
    %cst_65 = arith.constant dense<0.000000e+00> : vector<64x128xf32>
    %76 = tpu.matmul %73, %75, %cst_65 {dimension_numbers = #tpu.dot_dimension_numbers<[1], [0], [0], [1], [0, 0, 1, 1], [], []>} : vector<64x128xbf16>, vector<128x128xbf16>, vector<64x128xf32> -> vector<64x128xf32>
    %77 = arith.addf %70, %76 : vector<64x128xf32>
    %c0_66 = arith.constant 0 : index
    %c1_67 = arith.constant 1 : index
    %c2_68 = arith.constant 2 : index
    %c0_69 = arith.constant 0 : index
    %78 = vector.load %arg12[%c0_66, %c1_67, %c2_68, %c0_69] : memref<1x10x10x128xf32, #tpu.memory_space<vmem>>, vector<1x8x8x128xf32>
    %79 = vector.shape_cast %78 : vector<1x8x8x128xf32> to vector<64x128xf32>
    %80 = arith.truncf %79 : vector<64x128xf32> to vector<64x128xbf16>
    %c5 = arith.constant 5 : index
    %c0_70 = arith.constant 0 : index
    %c0_71 = arith.constant 0 : index
    %81 = vector.load %arg7[%c5, %c0_70, %c0_71] : memref<9x128x128xbf16, #tpu.memory_space<vmem>>, vector<1x128x128xbf16>
    %82 = vector.shape_cast %81 : vector<1x128x128xbf16> to vector<128x128xbf16>
    %cst_72 = arith.constant dense<0.000000e+00> : vector<64x128xf32>
    %83 = tpu.matmul %80, %82, %cst_72 {dimension_numbers = #tpu.dot_dimension_numbers<[1], [0], [0], [1], [0, 0, 1, 1], [], []>} : vector<64x128xbf16>, vector<128x128xbf16>, vector<64x128xf32> -> vector<64x128xf32>
    %84 = arith.addf %77, %83 : vector<64x128xf32>
    %c0_73 = arith.constant 0 : index
    %c2_74 = arith.constant 2 : index
    %c0_75 = arith.constant 0 : index
    %c0_76 = arith.constant 0 : index
    %85 = vector.load %arg12[%c0_73, %c2_74, %c0_75, %c0_76] : memref<1x10x10x128xf32, #tpu.memory_space<vmem>>, vector<1x8x8x128xf32>
    %86 = vector.shape_cast %85 : vector<1x8x8x128xf32> to vector<64x128xf32>
    %87 = arith.truncf %86 : vector<64x128xf32> to vector<64x128xbf16>
    %c6 = arith.constant 6 : index
    %c0_77 = arith.constant 0 : index
    %c0_78 = arith.constant 0 : index
    %88 = vector.load %arg7[%c6, %c0_77, %c0_78] : memref<9x128x128xbf16, #tpu.memory_space<vmem>>, vector<1x128x128xbf16>
    %89 = vector.shape_cast %88 : vector<1x128x128xbf16> to vector<128x128xbf16>
    %cst_79 = arith.constant dense<0.000000e+00> : vector<64x128xf32>
    %90 = tpu.matmul %87, %89, %cst_79 {dimension_numbers = #tpu.dot_dimension_numbers<[1], [0], [0], [1], [0, 0, 1, 1], [], []>} : vector<64x128xbf16>, vector<128x128xbf16>, vector<64x128xf32> -> vector<64x128xf32>
    %91 = arith.addf %84, %90 : vector<64x128xf32>
    %c0_80 = arith.constant 0 : index
    %c2_81 = arith.constant 2 : index
    %c1_82 = arith.constant 1 : index
    %c0_83 = arith.constant 0 : index
    %92 = vector.load %arg12[%c0_80, %c2_81, %c1_82, %c0_83] : memref<1x10x10x128xf32, #tpu.memory_space<vmem>>, vector<1x8x8x128xf32>
    %93 = vector.shape_cast %92 : vector<1x8x8x128xf32> to vector<64x128xf32>
    %94 = arith.truncf %93 : vector<64x128xf32> to vector<64x128xbf16>
    %c7 = arith.constant 7 : index
    %c0_84 = arith.constant 0 : index
    %c0_85 = arith.constant 0 : index
    %95 = vector.load %arg7[%c7, %c0_84, %c0_85] : memref<9x128x128xbf16, #tpu.memory_space<vmem>>, vector<1x128x128xbf16>
    %96 = vector.shape_cast %95 : vector<1x128x128xbf16> to vector<128x128xbf16>
    %cst_86 = arith.constant dense<0.000000e+00> : vector<64x128xf32>
    %97 = tpu.matmul %94, %96, %cst_86 {dimension_numbers = #tpu.dot_dimension_numbers<[1], [0], [0], [1], [0, 0, 1, 1], [], []>} : vector<64x128xbf16>, vector<128x128xbf16>, vector<64x128xf32> -> vector<64x128xf32>
    %98 = arith.addf %91, %97 : vector<64x128xf32>
    %c0_87 = arith.constant 0 : index
    %c2_88 = arith.constant 2 : index
    %c2_89 = arith.constant 2 : index
    %c0_90 = arith.constant 0 : index
    %99 = vector.load %arg12[%c0_87, %c2_88, %c2_89, %c0_90] : memref<1x10x10x128xf32, #tpu.memory_space<vmem>>, vector<1x8x8x128xf32>
    %100 = vector.shape_cast %99 : vector<1x8x8x128xf32> to vector<64x128xf32>
    %101 = arith.truncf %100 : vector<64x128xf32> to vector<64x128xbf16>
    %c8 = arith.constant 8 : index
    %c0_91 = arith.constant 0 : index
    %c0_92 = arith.constant 0 : index
    %102 = vector.load %arg7[%c8, %c0_91, %c0_92] : memref<9x128x128xbf16, #tpu.memory_space<vmem>>, vector<1x128x128xbf16>
    %103 = vector.shape_cast %102 : vector<1x128x128xbf16> to vector<128x128xbf16>
    %cst_93 = arith.constant dense<0.000000e+00> : vector<64x128xf32>
    %104 = tpu.matmul %101, %103, %cst_93 {dimension_numbers = #tpu.dot_dimension_numbers<[1], [0], [0], [1], [0, 0, 1, 1], [], []>} : vector<64x128xbf16>, vector<128x128xbf16>, vector<64x128xf32> -> vector<64x128xf32>
    %105 = arith.addf %98, %104 : vector<64x128xf32>
    %106 = vector.shape_cast %105 : vector<64x128xf32> to vector<1x64x128xf32>
    %c0_94 = arith.constant 0 : index
    %c0_95 = arith.constant 0 : index
    %107 = vector.load %arg8[%c0_94, %c0_95] : memref<1x128xf32, #tpu.memory_space<vmem>>, vector<1x128xf32>
    %108 = vector.shape_cast %107 : vector<1x128xf32> to vector<1x1x128xf32>
    %109 = vector.broadcast %108 : vector<1x1x128xf32> to vector<1x64x128xf32>
    %110 = arith.addf %106, %109 : vector<1x64x128xf32>
    %c0_96 = arith.constant 0 : index
    %c0_97 = arith.constant 0 : index
    %c0_98 = arith.constant 0 : index
    %111 = vector.load %arg2[%c0_96, %c0_97, %c0_98] : memref<1x64x128xf32, #tpu.memory_space<vmem>>, vector<1x64x128xf32>
    %112 = vector.shape_cast %111 : vector<1x64x128xf32> to vector<64x128xf32>
    %113 = arith.truncf %112 : vector<64x128xf32> to vector<64x128xbf16>
    %c0_99 = arith.constant 0 : index
    %c0_100 = arith.constant 0 : index
    %114 = vector.load %arg9[%c0_99, %c0_100] : memref<128x128xbf16, #tpu.memory_space<vmem>>, vector<128x128xbf16>
    %cst_101 = arith.constant dense<0.000000e+00> : vector<64x128xf32>
    %115 = tpu.matmul %113, %114, %cst_101 {dimension_numbers = #tpu.dot_dimension_numbers<[1], [0], [0], [1], [0, 0, 1, 1], [], []>} : vector<64x128xbf16>, vector<128x128xbf16>, vector<64x128xf32> -> vector<64x128xf32>
    %116 = vector.shape_cast %115 : vector<64x128xf32> to vector<1x64x128xf32>
    %117 = arith.addf %110, %116 : vector<1x64x128xf32>
    %c0_102 = arith.constant 0 : index
    %c0_103 = arith.constant 0 : index
    %118 = vector.load %arg10[%c0_102, %c0_103] : memref<1x128xf32, #tpu.memory_space<vmem>>, vector<1x128xf32>
    %119 = vector.shape_cast %118 : vector<1x128xf32> to vector<1x1x128xf32>
    %120 = vector.broadcast %119 : vector<1x1x128xf32> to vector<1x64x128xf32>
    %121 = arith.addf %117, %120 : vector<1x64x128xf32>
    %c0_104 = arith.constant 0 : index
    %c0_105 = arith.constant 0 : index
    %c0_106 = arith.constant 0 : index
    %122 = vector.load %arg11[%c0_104, %c0_105, %c0_106] : memref<1x64x128xf32, #tpu.memory_space<vmem>>, vector<1x64x128xf32>
    tpu.vector_store %arg11[%c0_104, %c0_105, %c0_106], %121 {strides = array<i32>} : memref<1x64x128xf32, #tpu.memory_space<vmem>>, vector<1x64x128xf32>,
    return
  }
  func.func @transform_0(%arg0: i32) -> (i32, i32, i32) {
    %c0_i32 = arith.constant 0 : i32
    %c0_i32_0 = arith.constant 0 : i32
    %c0_i32_1 = arith.constant 0 : i32
    return %arg0, %c0_i32, %c0_i32_0 : i32, i32, i32
  }
  func.func @transform_1(%arg0: i32) -> (i32, i32, i32) {
    %c0_i32 = arith.constant 0 : i32
    %c0_i32_0 = arith.constant 0 : i32
    %c0_i32_1 = arith.constant 0 : i32
    return %arg0, %c0_i32, %c0_i32_0 : i32, i32, i32
  }
  func.func @transform_2(%arg0: i32) -> (i32, i32) {
    %c0_i32 = arith.constant 0 : i32
    %c0_i32_0 = arith.constant 0 : i32
    %c0_i32_1 = arith.constant 0 : i32
    return %c0_i32, %c0_i32_0 : i32, i32
  }
  func.func @transform_3(%arg0: i32) -> (i32, i32) {
    %c0_i32 = arith.constant 0 : i32
    %c0_i32_0 = arith.constant 0 : i32
    %c0_i32_1 = arith.constant 0 : i32
    return %c0_i32, %c0_i32_0 : i32, i32
  }
  func.func @transform_4(%arg0: i32) -> (i32, i32) {
    %c0_i32 = arith.constant 0 : i32
    %c0_i32_0 = arith.constant 0 : i32
    %c0_i32_1 = arith.constant 0 : i32
    return %c0_i32, %c0_i32_0 : i32, i32
  }
  func.func @transform_5(%arg0: i32) -> (i32, i32) {
    %c0_i32 = arith.constant 0 : i32
    %c0_i32_0 = arith.constant 0 : i32
    %c0_i32_1 = arith.constant 0 : i32
    return %c0_i32, %c0_i32_0 : i32, i32
  }
  func.func @transform_6(%arg0: i32) -> (i32, i32, i32) {
    %c0_i32 = arith.constant 0 : i32
    %c0_i32_0 = arith.constant 0 : i32
    %c0_i32_1 = arith.constant 0 : i32
    %c0_i32_2 = arith.constant 0 : i32
    return %c0_i32, %c0_i32_0, %c0_i32_1 : i32, i32, i32
  }
  func.func @transform_7(%arg0: i32) -> (i32, i32) {
    %c0_i32 = arith.constant 0 : i32
    %c0_i32_0 = arith.constant 0 : i32
    %c0_i32_1 = arith.constant 0 : i32
    return %c0_i32, %c0_i32_0 : i32, i32
  }
  func.func @transform_8(%arg0: i32) -> (i32, i32) {
    %c0_i32 = arith.constant 0 : i32
    %c0_i32_0 = arith.constant 0 : i32
    %c0_i32_1 = arith.constant 0 : i32
    return %c0_i32, %c0_i32_0 : i32, i32
  }
  func.func @transform_9(%arg0: i32) -> (i32, i32) {
    %c0_i32 = arith.constant 0 : i32
    %c0_i32_0 = arith.constant 0 : i32
    %c0_i32_1 = arith.constant 0 : i32
    return %c0_i32, %c0_i32_0 : i32, i32
  }
  func.func @transform_10(%arg0: i32) -> (i32, i32, i32) {
    %c0_i32 = arith.constant 0 : i32
    %c0_i32_0 = arith.constant 0 : i32
    %c0_i32_1 = arith.constant 0 : i32
    return %arg0, %c0_i32, %c0_i32_0 : i32, i32, i32
  }
}

module attributes {stable_mosaic.version = 11 : i64} {
  func.func @_attn_kernel(%arg0: i32, %arg1: memref<1x64x128xf32, #tpu.memory_space<vmem>>, %arg2: memref<128x32xf32, #tpu.memory_space<vmem>>, %arg3: memref<32x128xf32, #tpu.memory_space<vmem>>, %arg4: memref<1x128xf32, #tpu.memory_space<vmem>>, %arg5: memref<1x128xf32, #tpu.memory_space<vmem>>, %arg6: memref<128x128xbf16, #tpu.memory_space<vmem>>, %arg7: memref<1x128xf32, #tpu.memory_space<vmem>>, %arg8: memref<128x128xbf16, #tpu.memory_space<vmem>>, %arg9: memref<1x128xf32, #tpu.memory_space<vmem>>, %arg10: memref<128x128xbf16, #tpu.memory_space<vmem>>, %arg11: memref<1x128xf32, #tpu.memory_space<vmem>>, %arg12: memref<1x64x128xf32, #tpu.memory_space<vmem>>) attributes {dimension_semantics = [#tpu.dimension_semantics<parallel>], iteration_bounds = array<i64: 2>, scalar_prefetch = 0 : i64, scratch_operands = 0 : i64, tpu.core_type = #tpu.core_type<tc>, window_params = [{transform_indices = @transform_0, window_bounds = array<i64: 1, 64, 128>}, {pipeline_mode = #tpu.pipeline_mode<synchronous>, transform_indices = @transform_1, window_bounds = array<i64: 128, 32>}, {pipeline_mode = #tpu.pipeline_mode<synchronous>, transform_indices = @transform_2, window_bounds = array<i64: 32, 128>}, {pipeline_mode = #tpu.pipeline_mode<synchronous>, transform_indices = @transform_3, window_bounds = array<i64: 1, 128>}, {pipeline_mode = #tpu.pipeline_mode<synchronous>, transform_indices = @transform_4, window_bounds = array<i64: 1, 128>}, {pipeline_mode = #tpu.pipeline_mode<synchronous>, transform_indices = @transform_5, window_bounds = array<i64: 128, 128>}, {pipeline_mode = #tpu.pipeline_mode<synchronous>, transform_indices = @transform_6, window_bounds = array<i64: 1, 128>}, {pipeline_mode = #tpu.pipeline_mode<synchronous>, transform_indices = @transform_7, window_bounds = array<i64: 128, 128>}, {pipeline_mode = #tpu.pipeline_mode<synchronous>, transform_indices = @transform_8, window_bounds = array<i64: 1, 128>}, {pipeline_mode = #tpu.pipeline_mode<synchronous>, transform_indices = @transform_9, window_bounds = array<i64: 128, 128>}, {pipeline_mode = #tpu.pipeline_mode<synchronous>, transform_indices = @transform_10, window_bounds = array<i64: 1, 128>}, {transform_indices = @transform_11, window_bounds = array<i64: 1, 64, 128>}]} {
    %c0 = arith.constant 0 : index
    %c0_0 = arith.constant 0 : index
    %c0_1 = arith.constant 0 : index
    %0 = vector.load %arg1[%c0, %c0_0, %c0_1] : memref<1x64x128xf32, #tpu.memory_space<vmem>>, vector<1x64x128xf32>
    %c0_2 = arith.constant 0 : index
    %c0_3 = arith.constant 0 : index
    %1 = vector.load %arg2[%c0_2, %c0_3] : memref<128x32xf32, #tpu.memory_space<vmem>>, vector<128x32xf32>
    %c0_4 = arith.constant 0 : index
    %c0_5 = arith.constant 0 : index
    %2 = vector.load %arg3[%c0_4, %c0_5] : memref<32x128xf32, #tpu.memory_space<vmem>>, vector<32x128xf32>
    %c0_6 = arith.constant 0 : index
    %c0_7 = arith.constant 0 : index
    %3 = vector.load %arg4[%c0_6, %c0_7] : memref<1x128xf32, #tpu.memory_space<vmem>>, vector<1x128xf32>
    %c0_8 = arith.constant 0 : index
    %c0_9 = arith.constant 0 : index
    %4 = vector.load %arg5[%c0_8, %c0_9] : memref<1x128xf32, #tpu.memory_space<vmem>>, vector<1x128xf32>
    %cst = arith.constant dense<0.000000e+00> : vector<1x128xf32>
    %5 = vector.multi_reduction <add>, %0, %cst [1] : vector<1x64x128xf32> to vector<1x128xf32>
    %cst_10 = arith.constant dense<0.000000e+00> : vector<1x32xf32>
    %6 = tpu.matmul %5, %1, %cst_10 {dimension_numbers = #tpu.dot_dimension_numbers<[1], [0], [0], [1], [0, 0, 1, 1], [], []>} : vector<1x128xf32>, vector<128x32xf32>, vector<1x32xf32> -> vector<1x32xf32>
    %cst_11 = arith.constant 7.812500e-03 : f32
    %7 = vector.broadcast %cst_11 : f32 to vector<1x32xf32>
    %8 = arith.mulf %6, %7 : vector<1x32xf32>
    %cst_12 = arith.constant dense<0.000000e+00> : vector<1x128xf32>
    %9 = tpu.matmul %8, %2, %cst_12 {dimension_numbers = #tpu.dot_dimension_numbers<[1], [0], [0], [1], [0, 0, 1, 1], [], []>} : vector<1x32xf32>, vector<32x128xf32>, vector<1x128xf32> -> vector<1x128xf32>
    %10 = vector.shape_cast %9 : vector<1x128xf32> to vector<1x1x128xf32>
    %11 = vector.broadcast %10 : vector<1x1x128xf32> to vector<1x64x128xf32>
    %12 = arith.subf %0, %11 : vector<1x64x128xf32>
    %13 = arith.mulf %12, %12 : vector<1x64x128xf32>
    %cst_13 = arith.constant dense<0.000000e+00> : vector<1x128xf32>
    %14 = vector.multi_reduction <add>, %13, %cst_13 [1] : vector<1x64x128xf32> to vector<1x128xf32>
    %cst_14 = arith.constant dense<0.000000e+00> : vector<1x32xf32>
    %15 = tpu.matmul %14, %1, %cst_14 {dimension_numbers = #tpu.dot_dimension_numbers<[1], [0], [0], [1], [0, 0, 1, 1], [], []>} : vector<1x128xf32>, vector<128x32xf32>, vector<1x32xf32> -> vector<1x32xf32>
    %cst_15 = arith.constant 7.812500e-03 : f32
    %16 = vector.broadcast %cst_15 : f32 to vector<1x32xf32>
    %17 = arith.mulf %15, %16 : vector<1x32xf32>
    %cst_16 = arith.constant 9.99999974E-6 : f32
    %18 = vector.broadcast %cst_16 : f32 to vector<1x32xf32>
    %19 = arith.addf %17, %18 : vector<1x32xf32>
    %20 = math.rsqrt %19 : vector<1x32xf32>
    %cst_17 = arith.constant dense<0.000000e+00> : vector<1x128xf32>
    %21 = tpu.matmul %20, %2, %cst_17 {dimension_numbers = #tpu.dot_dimension_numbers<[1], [0], [0], [1], [0, 0, 1, 1], [], []>} : vector<1x32xf32>, vector<32x128xf32>, vector<1x128xf32> -> vector<1x128xf32>
    %22 = vector.shape_cast %21 : vector<1x128xf32> to vector<1x1x128xf32>
    %23 = vector.broadcast %22 : vector<1x1x128xf32> to vector<1x64x128xf32>
    %24 = arith.mulf %12, %23 : vector<1x64x128xf32>
    %25 = vector.shape_cast %3 : vector<1x128xf32> to vector<1x1x128xf32>
    %26 = vector.broadcast %25 : vector<1x1x128xf32> to vector<1x64x128xf32>
    %27 = arith.mulf %24, %26 : vector<1x64x128xf32>
    %28 = vector.shape_cast %4 : vector<1x128xf32> to vector<1x1x128xf32>
    %29 = vector.broadcast %28 : vector<1x1x128xf32> to vector<1x64x128xf32>
    %30 = arith.addf %27, %29 : vector<1x64x128xf32>
    %31 = vector.shape_cast %30 : vector<1x64x128xf32> to vector<64x128xf32>
    %32 = arith.truncf %31 : vector<64x128xf32> to vector<64x128xbf16>
    %c0_18 = arith.constant 0 : index
    %c0_19 = arith.constant 0 : index
    %33 = vector.load %arg6[%c0_18, %c0_19] : memref<128x128xbf16, #tpu.memory_space<vmem>>, vector<128x128xbf16>
    %cst_20 = arith.constant dense<0.000000e+00> : vector<64x128xf32>
    %34 = tpu.matmul %32, %33, %cst_20 {dimension_numbers = #tpu.dot_dimension_numbers<[1], [0], [0], [1], [0, 0, 1, 1], [], []>} : vector<64x128xbf16>, vector<128x128xbf16>, vector<64x128xf32> -> vector<64x128xf32>
    %c0_21 = arith.constant 0 : index
    %c0_22 = arith.constant 0 : index
    %35 = vector.load %arg7[%c0_21, %c0_22] : memref<1x128xf32, #tpu.memory_space<vmem>>, vector<1x128xf32>
    %36 = vector.broadcast %35 : vector<1x128xf32> to vector<64x128xf32>
    %37 = arith.addf %34, %36 : vector<64x128xf32>
    %38 = vector.shape_cast %37 : vector<64x128xf32> to vector<1x64x128xf32>
    %c0_23 = arith.constant 0 : index
    %c0_24 = arith.constant 0 : index
    %39 = vector.load %arg8[%c0_23, %c0_24] : memref<128x128xbf16, #tpu.memory_space<vmem>>, vector<128x128xbf16>
    %cst_25 = arith.constant dense<0.000000e+00> : vector<64x128xf32>
    %40 = tpu.matmul %32, %39, %cst_25 {dimension_numbers = #tpu.dot_dimension_numbers<[1], [0], [0], [1], [0, 0, 1, 1], [], []>} : vector<64x128xbf16>, vector<128x128xbf16>, vector<64x128xf32> -> vector<64x128xf32>
    %c0_26 = arith.constant 0 : index
    %c0_27 = arith.constant 0 : index
    %41 = vector.load %arg9[%c0_26, %c0_27] : memref<1x128xf32, #tpu.memory_space<vmem>>, vector<1x128xf32>
    %42 = vector.broadcast %41 : vector<1x128xf32> to vector<64x128xf32>
    %43 = arith.addf %40, %42 : vector<64x128xf32>
    %44 = vector.shape_cast %43 : vector<64x128xf32> to vector<1x64x128xf32>
    %45 = arith.truncf %38 : vector<1x64x128xf32> to vector<1x64x128xbf16>
    %46 = arith.truncf %44 : vector<1x64x128xf32> to vector<1x64x128xbf16>
    "tpu.trace_start"() <{level = 10 : i32, message = "bqd,bkd->bqk"}> : () -> ()
    %cst_28 = arith.constant dense<0.000000e+00> : vector<1x64x64xf32>
    %47 = tpu.matmul %45, %46, %cst_28 {dimension_numbers = #tpu.dot_dimension_numbers<[2], [2], [1], [1], [0, 0, 0, 1, 1, 1], [0], [0]>} : vector<1x64x128xbf16>, vector<1x64x128xbf16>, vector<1x64x64xf32> -> vector<1x64x64xf32>
    "tpu.trace_stop"() : () -> ()
    %cst_29 = arith.constant 1.250000e-01 : f32
    %48 = vector.broadcast %cst_29 : f32 to vector<1x64x64xf32>
    %49 = arith.mulf %47, %48 : vector<1x64x64xf32>
    %cst_30 = arith.constant dense<0xFF800000> : vector<1x64xf32>
    %50 = vector.multi_reduction <maximumf>, %49, %cst_30 [2] : vector<1x64x64xf32> to vector<1x64xf32>
    %51 = vector.shape_cast %50 : vector<1x64xf32> to vector<1x64x1xf32>
    %52 = vector.broadcast %51 : vector<1x64x1xf32> to vector<1x64x64xf32>
    %53 = arith.subf %49, %52 : vector<1x64x64xf32>
    %54 = math.exp %53 : vector<1x64x64xf32>
    %cst_31 = arith.constant dense<0.000000e+00> : vector<1x64xf32>
    %55 = vector.multi_reduction <add>, %54, %cst_31 [2] : vector<1x64x64xf32> to vector<1x64xf32>
    %56 = vector.shape_cast %55 : vector<1x64xf32> to vector<1x64x1xf32>
    %57 = tpu.reciprocal %56 {approx = true} : vector<1x64x1xf32> -> vector<1x64x1xf32>
    %58 = vector.broadcast %57 : vector<1x64x1xf32> to vector<1x64x64xf32>
    %59 = arith.mulf %54, %58 : vector<1x64x64xf32>
    %60 = arith.truncf %59 : vector<1x64x64xf32> to vector<1x64x64xbf16>
    %61 = arith.truncf %0 : vector<1x64x128xf32> to vector<1x64x128xbf16>
    "tpu.trace_start"() <{level = 10 : i32, message = "bqk,bkc->bqc"}> : () -> ()
    %cst_32 = arith.constant dense<0.000000e+00> : vector<1x64x128xf32>
    %62 = tpu.matmul %60, %61, %cst_32 {dimension_numbers = #tpu.dot_dimension_numbers<[2], [1], [1], [2], [0, 0, 0, 1, 1, 2], [0], [0]>} : vector<1x64x64xbf16>, vector<1x64x128xbf16>, vector<1x64x128xf32> -> vector<1x64x128xf32>
    "tpu.trace_stop"() : () -> ()
    %63 = vector.shape_cast %62 : vector<1x64x128xf32> to vector<64x128xf32>
    %64 = arith.truncf %63 : vector<64x128xf32> to vector<64x128xbf16>
    %c0_33 = arith.constant 0 : index
    %c0_34 = arith.constant 0 : index
    %65 = vector.load %arg10[%c0_33, %c0_34] : memref<128x128xbf16, #tpu.memory_space<vmem>>, vector<128x128xbf16>
    %cst_35 = arith.constant dense<0.000000e+00> : vector<64x128xf32>
    %66 = tpu.matmul %64, %65, %cst_35 {dimension_numbers = #tpu.dot_dimension_numbers<[1], [0], [0], [1], [0, 0, 1, 1], [], []>} : vector<64x128xbf16>, vector<128x128xbf16>, vector<64x128xf32> -> vector<64x128xf32>
    %67 = vector.shape_cast %66 : vector<64x128xf32> to vector<1x64x128xf32>
    %c0_36 = arith.constant 0 : index
    %c0_37 = arith.constant 0 : index
    %68 = vector.load %arg11[%c0_36, %c0_37] : memref<1x128xf32, #tpu.memory_space<vmem>>, vector<1x128xf32>
    %69 = vector.shape_cast %68 : vector<1x128xf32> to vector<1x1x128xf32>
    %70 = vector.broadcast %69 : vector<1x1x128xf32> to vector<1x64x128xf32>
    %71 = arith.addf %67, %70 : vector<1x64x128xf32>
    %72 = arith.addf %71, %0 : vector<1x64x128xf32>
    %c0_38 = arith.constant 0 : index
    %c0_39 = arith.constant 0 : index
    %c0_40 = arith.constant 0 : index
    %73 = vector.load %arg12[%c0_38, %c0_39, %c0_40] : memref<1x64x128xf32, #tpu.memory_space<vmem>>, vector<1x64x128xf32>
    tpu.vector_store %arg12[%c0_38, %c0_39, %c0_40], %72 {strides = array<i32>} : memref<1x64x128xf32, #tpu.memory_space<vmem>>, vector<1x64x128xf32>,
    return
  }
  func.func @transform_0(%arg0: i32) -> (i32, i32, i32) {
    %c0_i32 = arith.constant 0 : i32
    %c0_i32_0 = arith.constant 0 : i32
    %c0_i32_1 = arith.constant 0 : i32
    return %arg0, %c0_i32, %c0_i32_0 : i32, i32, i32
  }
  func.func @transform_1(%arg0: i32) -> (i32, i32) {
    %c0_i32 = arith.constant 0 : i32
    %c0_i32_0 = arith.constant 0 : i32
    %c0_i32_1 = arith.constant 0 : i32
    return %c0_i32, %c0_i32_0 : i32, i32
  }
  func.func @transform_2(%arg0: i32) -> (i32, i32) {
    %c0_i32 = arith.constant 0 : i32
    %c0_i32_0 = arith.constant 0 : i32
    %c0_i32_1 = arith.constant 0 : i32
    return %c0_i32, %c0_i32_0 : i32, i32
  }
  func.func @transform_3(%arg0: i32) -> (i32, i32) {
    %c0_i32 = arith.constant 0 : i32
    %c0_i32_0 = arith.constant 0 : i32
    %c0_i32_1 = arith.constant 0 : i32
    return %c0_i32, %c0_i32_0 : i32, i32
  }
  func.func @transform_4(%arg0: i32) -> (i32, i32) {
    %c0_i32 = arith.constant 0 : i32
    %c0_i32_0 = arith.constant 0 : i32
    %c0_i32_1 = arith.constant 0 : i32
    return %c0_i32, %c0_i32_0 : i32, i32
  }
  func.func @transform_5(%arg0: i32) -> (i32, i32) {
    %c0_i32 = arith.constant 0 : i32
    %c0_i32_0 = arith.constant 0 : i32
    %c0_i32_1 = arith.constant 0 : i32
    return %c0_i32, %c0_i32_0 : i32, i32
  }
  func.func @transform_6(%arg0: i32) -> (i32, i32) {
    %c0_i32 = arith.constant 0 : i32
    %c0_i32_0 = arith.constant 0 : i32
    %c0_i32_1 = arith.constant 0 : i32
    return %c0_i32, %c0_i32_0 : i32, i32
  }
  func.func @transform_7(%arg0: i32) -> (i32, i32) {
    %c0_i32 = arith.constant 0 : i32
    %c0_i32_0 = arith.constant 0 : i32
    %c0_i32_1 = arith.constant 0 : i32
    return %c0_i32, %c0_i32_0 : i32, i32
  }
  func.func @transform_8(%arg0: i32) -> (i32, i32) {
    %c0_i32 = arith.constant 0 : i32
    %c0_i32_0 = arith.constant 0 : i32
    %c0_i32_1 = arith.constant 0 : i32
    return %c0_i32, %c0_i32_0 : i32, i32
  }
  func.func @transform_9(%arg0: i32) -> (i32, i32) {
    %c0_i32 = arith.constant 0 : i32
    %c0_i32_0 = arith.constant 0 : i32
    %c0_i32_1 = arith.constant 0 : i32
    return %c0_i32, %c0_i32_0 : i32, i32
  }
  func.func @transform_10(%arg0: i32) -> (i32, i32) {
    %c0_i32 = arith.constant 0 : i32
    %c0_i32_0 = arith.constant 0 : i32
    %c0_i32_1 = arith.constant 0 : i32
    return %c0_i32, %c0_i32_0 : i32, i32
  }
  func.func @transform_11(%arg0: i32) -> (i32, i32, i32) {
    %c0_i32 = arith.constant 0 : i32
    %c0_i32_0 = arith.constant 0 : i32
    %c0_i32_1 = arith.constant 0 : i32
    return %arg0, %c0_i32, %c0_i32_0 : i32, i32, i32
  }
}

</mosaic_0001>

<bundles_post_ra>
// kernel: res_block_with_attention.5
= control target key start
LH: loop header
LB: loop body
LE: loop exit
PB: predicated region body
PF: predicated region fallthrough
CT: control target
= control target key end

     0   :  { %s1523_s17 = smov 0   ;;  %s1889_s0 = inlined_call_operand.vmem [shape: f32[2,64,128], index: 0, kind: input, shape index: {}]   ;;  %s1890_s1 = inlined_call_operand.vmem [shape: f32[128,32], index: 1, kind: input, shape index: {}]   ;;  %s1891_s2 = inlined_call_operand.vmem [shape: f32[32,128], index: 2, kind: input, shape index: {}]   ;;  %s1892_s3 = inlined_call_operand.vmem [shape: f32[1,128], index: 3, kind: input, shape index: {}]   ;;  %s1893_s4 = inlined_call_operand.vmem [shape: f32[1,128], index: 4, kind: input, shape index: {}, may-alias: {4,6,8,10}]   ;;  %s1894_s5 = inlined_call_operand.vmem [shape: bf16[128,128], index: 5, kind: input, shape index: {}]   ;;  %s1895_s6 = inlined_call_operand.vmem [shape: f32[1,128], index: 6, kind: input, shape index: {}, may-alias: {4,6,8,10}]   ;;  %s1896_s7 = inlined_call_operand.vmem [shape: bf16[128,128], index: 7, kind: input, shape index: {}]   ;;  %s1897_s8 = inlined_call_operand.vmem [shape: f32[1,128], index: 8, kind: input, shape index: {}, may-alias: {4,6,8,10}]   ;;  %s1898_s9 = inlined_call_operand.vmem [shape: bf16[128,128], index: 9, kind: input, shape index: {}]   ;;  %s1899_s10 = inlined_call_operand.vmem [shape: f32[1,128], index: 10, kind: input, shape index: {}, may-alias: {4,6,8,10}]   ;;  %s1900_s11 = inlined_call_operand.vmem [shape: f32[2,64,128], index: 11, kind: output, shape index: {}]  }
   0x1 LB: > { %s1261_s18 = sadd.s32 4294967295, %s1461_s17   ;;  %p1265_p0 = scmp.ge.s32.totalorder %s1461_s17, 1  ;;  %s1461_s17 = sphi %s1523_s17, %s21_s17  }
   0x2   : > { %p337_p1 = scmp.lt.s32.totalorder %s1461_s17, 3 }
   0x4   : > { %p338_p2 = pnand %p1265_p0, %p337_p1 }
   0x5   : > { %p377_p3 = scmp.lt.s32.totalorder (!%p338_p2), %s1261_s18, 1 }
   0x6   : > { %341 = sbr.rel (%p338_p2) target bundleno = 1615 (0x64f), region = 64 }
   0xb   : > { %v1534_v0 = vld [vmem:[%s1890_s1 + $0x78] sm:$0xff]  ;;  %v1539_v1 = vld [vmem:[%s1890_s1 + $0x70] sm:$0xff]  ;;  %v1545_v2 = vld [vmem:[%s1890_s1 + $0x68] sm:$0xff]  ;;  %s1902_s18 = smov (!%p377_p3, %s1261_s18), 1  ;;  %vm452_vm0 = vcmask 261120   ;;  %vm891_vm4 = vcmask 523264  }
   0xc   : > { %431 = vmatpush.msra.mxu0 %v1534_v0  ;;  %v408_v3 = vld [vmem:[%s1890_s1 + $0x60] sm:$0xff]  ;;  %s1374_s27 = sshll.u32 %s1902_s18, 6  ;;  %v407_v4 = vld [vmem:[%s1890_s1 + $0x58] sm:$0xff]  ;;  %v1571_v6 = vld [vmem:[%s1891_s2 + $0x10] sm:$0xff] }
   0xd   : > { %s381_s13 = scalar_lea.vmem %s1889_s0, %s1374_s27  ;;  %v1566_v5 = vld [vmem:[%s1891_s2 + $0x18] sm:$0xff]  ;;  %v406_v11 = vld [vmem:[%s1890_s1 + $0x50] sm:$0xff]  ;;  %v405_v14 = vld [vmem:[%s1890_s1 + $0x48] sm:$0xff]  ;;  %s386_s26 = scalar_lea.vmem %s1900_s11, %s1374_s27 }
   0xe   : > { %432 = vmatpush.msra.mxu0 %v1539_v1  ;;  %v1573_v7 = vld [vmem:[%s381_s13] sm:$0xff]  ;;  %v1575_v8 = vld [vmem:[%s381_s13 + $0x8] sm:$0xff]  ;;  %v1577_v9 = vld [vmem:[%s381_s13 + $0x10] sm:$0xff]  ;;  %468 = vmatpush.msra.mxu2 %v1566_v5 }
   0xf   : > { %v418_v10 = vadd.f32 %v1575_v8, %v1573_v7  ;;  %v1585_v12 = vld [vmem:[%s381_s13 + $0x18] sm:$0xff]  ;;  %v1592_v15 = vld [vmem:[%s381_s13 + $0x20] sm:$0xff]  ;;  %v1598_v18 = vld [vmem:[%s381_s13 + $0x28] sm:$0xff] }
  0x10   : > { %433 = vmatpush.msra.mxu0 %v1545_v2  ;;  %469 = vmatpush.msra.mxu2 %v1571_v6  ;;  %v404_v17 = vld [vmem:[%s1890_s1 + $0x40] sm:$0xff]  ;;  %v403_v20 = vld [vmem:[%s1890_s1 + $0x38] sm:$0xff]  ;;  %v1604_v21 = vld [vmem:[%s381_s13 + $0x30] sm:$0xff] }
  0x11   : > { %v419_v13 = vadd.f32 %v418_v10, %v1577_v9  ;;  %v402_v23 = vld [vmem:[%s1890_s1 + $0x30] sm:$0xff]  ;;  %v1610_v24 = vld [vmem:[%s381_s13 + $0x38] sm:$0xff]  ;;  %v401_v26 = vld [vmem:[%s1890_s1 + $0x28] sm:$0xff] }
  0x12   : > { %434 = vmatpush.msra.mxu0 %v408_v3  ;;  %v400_v28 = vld [vmem:[%s1890_s1 + $0x20] sm:$0xff]  ;;  %v399_v30 = vld [vmem:[%s1890_s1 + $0x18] sm:$0xff]  ;;  %v398_v32 = vld [vmem:[%s1890_s1 + $0x10] sm:$0xff] }
  0x13   : > { %v420_v16 = vadd.f32 %v419_v13, %v1585_v12  ;;  %v397_v34 = vld [vmem:[%s1890_s1 + $0x8] sm:$0xff]  ;;  %v396_v36 = vld [vmem:[%s1890_s1] sm:$0xff] }
  0x14   : > { %435 = vmatpush.msra.mxu0 %v407_v4  ;;  %v413_v39 = vld [vmem:[%s1891_s2 + $0x8] sm:$0xff]  ;;  %v412_v40 = vld [vmem:[%s1891_s2] sm:$0xff] }
  0x15   : > { %v421_v19 = vadd.f32 %v420_v16, %v1592_v15  ;;  %470 = vmatpush.msra.mxu2 %v413_v39  ;;  %v1382_v16 = vld [vmem:[%s1894_s5 + $0x30] sm:$0xff] }
  0x16   : > { %436 = vmatpush.msra.mxu0 %v406_v11 }
  0x17   : > { %v422_v22 = vadd.f32 %v421_v19, %v1598_v18  ;;  %471 = vmatpush.msra.mxu2 %v412_v40 }
  0x18   : > { %437 = vmatpush.msra.mxu0 %v405_v14 }
  0x19   : > { %v423_v25 = vadd.f32 %v422_v22, %v1604_v21  ;;  %506 = vmatpush.msrb.mxu2 %v1534_v0  ;;  %v1380_v22 = vld [vmem:[%s1894_s5 + $0x20] sm:$0xff] }
  0x1a   : > { %438 = vmatpush.msra.mxu0 %v404_v17 }
  0x1b   : > { %v424_v27 = vadd.f32 %v423_v25, %v1610_v24  ;;  %507 = vmatpush.msrb.mxu2 %v1539_v1  ;;  %v1379_v25 = vld [vmem:[%s1894_s5 + $0x18] sm:$0xff] }
  0x1c   : > { %439 = vmatpush.msra.mxu0 %v403_v20 }
  0x1d   : > { %v425_v29 = vrot.slane %v424_v27, 4  ;;  %508 = vmatpush.msrb.mxu2 %v1545_v2 }
  0x1e   : > { %440 = vmatpush.msra.mxu0 %v402_v23 }
  0x1f   : > { %v426_v31 = vadd.f32 %v425_v29, %v424_v27  ;;  %509 = vmatpush.msrb.mxu2 %v408_v3 }
  0x20   : > { %441 = vmatpush.msra.mxu0 %v401_v26 }
  0x21   : > { %v427_v33 = vrot.slane %v426_v31, 2  ;;  %510 = vmatpush.msrb.mxu2 %v407_v4 }
  0x22   : > { %442 = vmatpush.msra.mxu0 %v400_v28 }
  0x23   : > { %v428_v35 = vadd.f32 %v427_v33, %v426_v31  ;;  %511 = vmatpush.msrb.mxu2 %v406_v11  ;;  %v1378_v33 = vld [vmem:[%s1894_s5 + $0x10] sm:$0xff] }
  0x24   : > { %443 = vmatpush.msra.mxu0 %v399_v30 }
  0x25   : > { %v429_v37 = vrot.slane %v428_v35, 1  ;;  %512 = vmatpush.msrb.mxu2 %v405_v14  ;;  %v1383_v14 = vld [vmem:[%s1894_s5 + $0x38] sm:$0xff] }
  0x26   : > { %444 = vmatpush.msra.mxu0 %v398_v32  ;;  %664 = vmatpush.bf16.msra.mxu1 %v1383_v14 }
  0x27   : > { %v430_v38 = vadd.f32 %v429_v37, %v428_v35  ;;  %513 = vmatpush.msrb.mxu2 %v404_v17  ;;  %1400 = vmatpush.bf16.msra.mxu3 %v1383_v14  ;;  %v1381_v17 = vld [vmem:[%s1894_s5 + $0x28] sm:$0xff]  ;;  %v1376_v35 = vld [vmem:[%s1894_s5] sm:$0xff]  ;;  %v1390_v37 = vld [vmem:[%s1896_s7 + $0x30] sm:$0xff] }
  0x28   : > { %445 = vmatpush.msra.mxu0 %v397_v34 }
  0x29   : > { %514 = vmatpush.msrb.mxu2 %v403_v20 }
  0x2a   : > { %446 = vmatpush.msra.mxu0 %v396_v36  ;;  %665 = vmatpush.bf16.msra.mxu1 %v1382_v16 }
  0x2b   : > { %447 = vmatmul.f32.vlgmr.msra.gmra.mxu0 %v430_v38  ;;  %515 = vmatpush.msrb.mxu2 %v402_v23  ;;  %v1389_v38 = vld [vmem:[%s1896_s7 + $0x28] sm:$0xff] }
  0x2c   : > { %1401 = vmatpush.bf16.msra.mxu3 %v1382_v16 }
  0x2d   : > { %516 = vmatpush.msrb.mxu2 %v401_v26 }
  0x2e   : > { %666 = vmatpush.bf16.msra.mxu1 %v1381_v17 }
  0x2f   : > { %517 = vmatpush.msrb.mxu2 %v400_v28 }
  0x30   : > { %1402 = vmatpush.bf16.msra.mxu3 %v1381_v17 }
  0x31   : > { %518 = vmatpush.msrb.mxu2 %v399_v30 }
  0x32   : > { %667 = vmatpush.bf16.msra.mxu1 %v1380_v22 }
  0x33   : > { %519 = vmatpush.msrb.mxu2 %v398_v32 }
  0x34   : > { %1403 = vmatpush.bf16.msra.mxu3 %v1380_v22 }
  0x35   : > { %520 = vmatpush.msrb.mxu2 %v397_v34  ;;  %v1377_v34 = vld [vmem:[%s1894_s5 + $0x8] sm:$0xff] }
  0x36   : > { %668 = vmatpush.bf16.msra.mxu1 %v1379_v25 }
  0x37   : > { %521 = vmatpush.msrb.mxu2 %v396_v36  ;;  %v1391_v36 = vld [vmem:[%s1896_s7 + $0x38] sm:$0xff] }
  0x38   : > { %1404 = vmatpush.bf16.msra.mxu3 %v1379_v25 }
  0x3a   : > { %669 = vmatpush.bf16.msra.mxu1 %v1378_v33 }
  0x3c   : > { %1405 = vmatpush.bf16.msra.mxu3 %v1378_v33 }
  0x3e   : > { %670 = vmatpush.bf16.msra.mxu1 %v1377_v34 }
  0x40   : > { %1406 = vmatpush.bf16.msra.mxu3 %v1377_v34 }
  0x42   : > { %671 = vmatpush.bf16.msra.mxu1 %v1376_v35 }
  0x44   : > { %1407 = vmatpush.bf16.msra.mxu3 %v1376_v35 }
  0x48   : > { %761 = vmatpush.bf16.msrb.mxu3 %v1391_v36 }
  0x4c   : > { %762 = vmatpush.bf16.msrb.mxu3 %v1390_v37 }
  0x50   : > { %763 = vmatpush.bf16.msrb.mxu3 %v1389_v38 }
  0xa8   : > { %v448_v41 = vpop.f32.mrf.mxu0 }
  0xa9   : > { %v451_v42 = vmul.f32 0.0078125, %v448_v41  ;;  %v1386_v41 = vld [vmem:[%s1896_s7 + $0x10] sm:$0xff] }
  0xab   : > { %1270 = vmatmul.msk.f32.vlgmr.msra.gmra.mxu2 %vm452_vm0, %v451_v42 }
  0xac   : > { %553 = vmatpush.msra.mxu2 %v1566_v5 }
  0xae   : > { %554 = vmatpush.msra.mxu2 %v1571_v6 }
  0xb0   : > { %555 = vmatpush.msra.mxu2 %v413_v39  ;;  %v1388_v39 = vld [vmem:[%s1896_s7 + $0x20] sm:$0xff] }
  0xb1   : > { %764 = vmatpush.bf16.msrb.mxu3 %v1388_v39 }
  0xb2   : > { %556 = vmatpush.msra.mxu2 %v412_v40  ;;  %v1387_v40 = vld [vmem:[%s1896_s7 + $0x18] sm:$0xff] }
  0xb5   : > { %765 = vmatpush.bf16.msrb.mxu3 %v1387_v40  ;;  %v1419_v40 = vld [vmem:[%s1897_s8] ss:$0 sm:$0xff] }
  0xb9   : > { %766 = vmatpush.bf16.msrb.mxu3 %v1386_v41 }
 0x12e   : > { %v473_v43 = vpop.f32.mrf.mxu2 }
 0x12f   : > { %v476_v44 = vperm.slane %v473_v43, 0 }
 0x131   : > { %v1645_v45 = vsub.f32 %v1573_v7, %v476_v44  ;;  %v1648_v46 = vsub.f32 %v1575_v8, %v476_v44  ;;  %v1651_v47 = vsub.f32 %v1577_v9, %v476_v44  ;;  %v1654_v48 = vsub.f32 %v1585_v12, %v476_v44 }
 0x132   : > { %v1661_v51 = vsub.f32 %v1592_v15, %v476_v44  ;;  %v1666_v54 = vsub.f32 %v1598_v18, %v476_v44  ;;  %v1671_v57 = vsub.f32 %v1604_v21, %v476_v44  ;;  %v1676_v60 = vsub.f32 %v1610_v24, %v476_v44  ;;  %v1416_v44 = vld [vmem:[%s1892_s3] ss:$0 sm:$0xff] }
 0x133   : > { %v485_v49 = vmul.f32 %v1645_v45, %v1645_v45  ;;  %v486_v50 = vmul.f32 %v1648_v46, %v1648_v46  ;;  %v487_v52 = vmul.f32 %v1651_v47, %v1651_v47  ;;  %v488_v55 = vmul.f32 %v1654_v48, %v1654_v48 }
 0x134   : > { %v489_v58 = vmul.f32 %v1661_v51, %v1661_v51  ;;  %v490_v61 = vmul.f32 %v1666_v54, %v1666_v54  ;;  %v491_v63 = vmul.f32 %v1671_v57, %v1671_v57  ;;  %v492_v1 = vmul.f32 %v1676_v60, %v1676_v60 }
 0x135   : > { %v493_v53 = vadd.f32 %v486_v50, %v485_v49  ;;  %v1385_v49 = vld [vmem:[%s1896_s7 + $0x8] sm:$0xff] }
 0x136   : > { %767 = vmatpush.bf16.msrb.mxu3 %v1385_v49 }
 0x137   : > { %v494_v56 = vadd.f32 %v493_v53, %v487_v52  ;;  %v1417_v53 = vld [vmem:[%s1893_s4] ss:$0 sm:$0xff] }
 0x139   : > { %v495_v59 = vadd.f32 %v494_v56, %v488_v55 }
 0x13b   : > { %v496_v62 = vadd.f32 %v495_v59, %v489_v58 }
 0x13d   : > { %v497_v0 = vadd.f32 %v496_v62, %v490_v61 }
 0x13f   : > { %v498_v2 = vadd.f32 %v497_v0, %v491_v63  ;;  %v1384_v63 = vld [vmem:[%s1896_s7] sm:$0xff] }
 0x140   : > { %768 = vmatpush.bf16.msrb.mxu3 %v1384_v63 }
 0x141   : > { %v499_v3 = vadd.f32 %v498_v2, %v492_v1 }
 0x143   : > { %v500_v4 = vrot.slane %v499_v3, 4 }
 0x145   : > { %v501_v5 = vadd.f32 %v500_v4, %v499_v3 }
 0x147   : > { %v502_v6 = vrot.slane %v501_v5, 2 }
 0x149   : > { %v503_v10 = vadd.f32 %v502_v6, %v501_v5 }
 0x14b   : > { %v504_v11 = vrot.slane %v503_v10, 1 }
 0x14d   : > { %v505_v13 = vadd.f32 %v504_v11, %v503_v10 }
 0x14f   : > { %522 = vmatmul.f32.vlgmr.msrb.gmra.mxu2 %v505_v13 }
 0x1d2   : > { %v523_v19 = vpop.f32.mrf.mxu2 }
 0x1d3   : > { %v526_v20 = vmul.f32 0.0078125, %v523_v19 }
 0x1d5   : > { %v527_v23 = vadd.f32 1e-05, %v526_v20 }
 0x1d7   : > { %1421 = vrsqrt.f32 %v527_v23  ;;  %vm534_vm2 = vweird.f32 %v527_v23 }
 0x1dd   : > { %v1422_v26 = vpop.eup %1421 }
 0x1de   : > { %v529_v27 = vmul.f32 %v1422_v26, %v527_v23  ;;  %vm535_vm1 = vweird.f32 %v1422_v26 }
 0x1df   : > { %vm536_vm3 = vmor %vm534_vm2, %vm535_vm1 }
 0x1e0   : > { %v530_v28 = vmul.f32 %v1422_v26, %v529_v27 }
 0x1e2   : > { %v531_v29 = vmul.f32 0.5, %v530_v28 }
 0x1e4   : > { %v532_v30 = vsub.f32 1.5, %v531_v29 }
 0x1e6   : > { %v533_v31 = vmul.f32 %v1422_v26, %v532_v30 }
 0x1e8   : > { %v537_v32 = vsel %vm536_vm3, %v1422_v26, %v533_v31 }
 0x1e9   : > { %1271 = vmatmul.msk.f32.vlgmr.msra.gmra.mxu2 %vm452_vm0, %v537_v32 }
 0x26c   : > { %v558_v42 = vpop.f32.mrf.mxu2 }
 0x26d   : > { %v561_v43 = vperm.slane %v558_v42, 0 }
 0x26f   : > { %v562_v50 = vmul.f32 %v561_v43, %v1645_v45  ;;  %v563_v52 = vmul.f32 %v561_v43, %v1648_v46  ;;  %v566_v55 = vmul.f32 %v561_v43, %v1661_v51  ;;  %v567_v56 = vmul.f32 %v561_v43, %v1666_v54 }
 0x270   : > { %v564_v51 = vmul.f32 %v561_v43, %v1651_v47  ;;  %v565_v54 = vmul.f32 %v561_v43, %v1654_v48  ;;  %v568_v4 = vmul.f32 %v561_v43, %v1671_v57  ;;  %v569_v5 = vmul.f32 %v561_v43, %v1676_v60  ;;  %v1750_v48 = vld [vmem:[%s1895_s6] ss:$0 sm:$0xff] }
 0x271   : > { %v573_v58 = vmul.f32 %v1416_v44, %v562_v50  ;;  %v574_v59 = vmul.f32 %v1416_v44, %v563_v52  ;;  %v577_v61 = vmul.f32 %v1416_v44, %v566_v55  ;;  %v578_v62 = vmul.f32 %v1416_v44, %v567_v56 }
 0x272   : > { %v575_v6 = vmul.f32 %v1416_v44, %v564_v51  ;;  %v576_v10 = vmul.f32 %v1416_v44, %v565_v54  ;;  %v579_v11 = vmul.f32 %v1416_v44, %v568_v4  ;;  %v580_v13 = vmul.f32 %v1416_v44, %v569_v5 }
 0x273   : > { %v584_v45 = vadd.f32 %v1417_v53, %v573_v58  ;;  %v585_v0 = vadd.f32 %v1417_v53, %v574_v59  ;;  %v588_v46 = vadd.f32 %v1417_v53, %v577_v61  ;;  %v589_v1 = vadd.f32 %v1417_v53, %v578_v62 }
 0x274   : > { %v586_v14 = vadd.f32 %v1417_v53, %v575_v6  ;;  %v587_v16 = vadd.f32 %v1417_v53, %v576_v10  ;;  %v590_v17 = vadd.f32 %v1417_v53, %v579_v11  ;;  %v591_v19 = vadd.f32 %v1417_v53, %v580_v13 }
 0x275   : > { %v592_v2 = vpack.c.bf16 %v585_v0, %v584_v45  ;;  %v594_v3 = vpack.c.bf16 %v589_v1, %v588_v46 }
 0x276   : > { %v593_v20 = vpack.c.bf16 %v587_v16, %v586_v14  ;;  %v595_v22 = vpack.c.bf16 %v591_v19, %v590_v17 }
 0x277   : > { %672 = vmatmul.bf16.vlgmr.msra.gmra.mxu1 %v592_v2  ;;  %682 = vmatmul.bf16.vlgmr.msra.gmra.mxu3 %v594_v3 }
 0x287   : > { %677 = vmatmul.bf16.gmra.mxu1 %v593_v20  ;;  %687 = vmatmul.bf16.gmra.mxu3 %v595_v22 }
 0x297   : > { %769 = vmatmul.bf16.vlgmr.msrb.gmra.mxu3 %v592_v2 }
 0x2a7   : > { %774 = vmatmul.bf16.gmra.mxu3 %v593_v20 }
 0x2b7   : > { %779 = vmatmul.bf16.gmra.mxu3 %v594_v3 }
 0x2c7   : > { %784 = vmatmul.bf16.gmra.mxu3 %v595_v22 }
 0x2f4   : > { %v673_v5 = vpop.f32.mrf.mxu1 }
 0x2fa   : > { %v683_v47 = vpop.f32.mrf.mxu3 }
 0x2fb   : > { %v684_v57 = vadd.f32 %v1750_v48, %v683_v47 }
 0x2fc   : > { %v675_v20 = vpop.f32.mrf.mxu1 }
 0x2fd   : > { %v794_v23 = vpack.c.bf16 %v684_v57, %v684_v57 }
 0x2ff   : > { %v1754_v27 = vunpack.c.l.b16 %v794_v23  ;;  %v674_v23 = vadd.f32 %v1750_v48, %v673_v5 }
 0x302   : > { %v685_v60 = vpop.f32.mrf.mxu3 }
 0x303   : > { %v686_v25 = vadd.f32 %v1750_v48, %v685_v60  ;;  %v676_v60 = vadd.f32 %v1750_v48, %v675_v20 }
 0x305   : > { %v795_v26 = vpack.c.bf16 %v686_v25, %v686_v25  ;;  %v678_v25 = vpop.f32.mrf.mxu1 }
 0x307   : > { %v1756_v28 = vunpack.c.l.b16 %v795_v26  ;;  %v791_v26 = vpack.c.bf16 %v676_v60, %v676_v60 }
 0x309   : > { %v824_v29 = vpack.c.b16 %v1756_v28, %v1754_v27 }
 0x30a   : > { %v688_v30 = vpop.f32.mrf.mxu3 }
 0x30b   : > { %v689_v31 = vadd.f32 %v1750_v48, %v688_v30  ;;  %v790_v30 = vpack.c.bf16 %v674_v23, %v674_v23 }
 0x30d   : > { %v796_v33 = vpack.c.bf16 %v689_v31, %v689_v31  ;;  %v815_v31 = vunpack.c.l.b16 %v791_v26 }
 0x30f   : > { %v1762_v36 = vunpack.c.l.b16 %v796_v33 }
 0x312   : > { %v690_v32 = vpop.f32.mrf.mxu3 }
 0x313   : > { %v691_v34 = vadd.f32 %v1750_v48, %v690_v32  ;;  %v814_v32 = vunpack.c.l.b16 %v790_v30 }
 0x315   : > { %v797_v35 = vpack.c.bf16 %v691_v34, %v691_v34  ;;  %v822_v33 = vpack.c.b16 %v815_v31, %v814_v32  ;;  %v680_v34 = vpop.f32.mrf.mxu1 }
 0x317   : > { %v1764_v37 = vunpack.c.l.b16 %v797_v35  ;;  %v681_v35 = vadd.f32 %v1750_v48, %v680_v34 }
 0x319   : > { %v825_v38 = vpack.c.b16 %v1764_v37, %v1762_v36  ;;  %v679_v36 = vadd.f32 %v1750_v48, %v678_v25  ;;  %v793_v37 = vpack.c.bf16 %v681_v35, %v681_v35 }
 0x31a   : > { %v770_v39 = vpop.f32.mrf.mxu3 }
 0x31b   : > { %v771_v41 = vadd.f32 %v1419_v40, %v770_v39  ;;  %v792_v39 = vpack.c.bf16 %v679_v36, %v679_v36 }
 0x31d   : > { %v798_v43 = vpack.c.bf16 %v771_v41, %v771_v41  ;;  %v816_v41 = vunpack.c.l.b16 %v792_v39 }
 0x31f   : > { %v838_v50 = vunpack.c.l.b16 %v798_v43 }
 0x322   : > { %v772_v42 = vpop.f32.mrf.mxu3 }
 0x323   : > { %v773_v44 = vadd.f32 %v1419_v40, %v772_v42 }
 0x325   : > { %v799_v49 = vpack.c.bf16 %v773_v44, %v773_v44 }
 0x327   : > { %v839_v52 = vunpack.c.l.b16 %v799_v49 }
 0x329   : > { %v846_v53 = vpack.c.b16 %v839_v52, %v838_v50 }
 0x32a   : > { %v775_v55 = vpop.f32.mrf.mxu3 }
 0x32b   : > { %v776_v13 = vadd.f32 %v1419_v40, %v775_v55 }
 0x32d   : > { %v800_v19 = vpack.c.bf16 %v776_v13, %v776_v13 }
 0x32f   : > { %v840_v47 = vunpack.c.l.b16 %v800_v19 }
 0x332   : > { %v777_v56 = vpop.f32.mrf.mxu3 }
 0x333   : > { %v778_v10 = vadd.f32 %v1419_v40, %v777_v56 }
 0x335   : > { %v801_v16 = vpack.c.bf16 %v778_v10, %v778_v10 }
 0x337   : > { %v841_v22 = vunpack.c.l.b16 %v801_v16 }
 0x339   : > { %v847_v57 = vpack.c.b16 %v841_v22, %v840_v47 }
 0x33a   : > { %v780_v58 = vpop.f32.mrf.mxu3 }
 0x33b   : > { %v781_v2 = vadd.f32 %v1419_v40, %v780_v58 }
 0x33d   : > { %v802_v6 = vpack.c.bf16 %v781_v2, %v781_v2 }
 0x33f   : > { %v842_v14 = vunpack.c.l.b16 %v802_v6 }
 0x342   : > { %v782_v59 = vpop.f32.mrf.mxu3 }
 0x343   : > { %v783_v46 = vadd.f32 %v1419_v40, %v782_v59 }
 0x345   : > { %v803_v54 = vpack.c.bf16 %v783_v46, %v783_v46 }
 0x347   : > { %v843_v11 = vunpack.c.l.b16 %v803_v54 }
 0x349   : > { %v848_v17 = vpack.c.b16 %v843_v11, %v842_v14 }
 0x34a   : > { %v785_v61 = vpop.f32.mrf.mxu3 }
 0x34b   : > { %v786_v62 = vadd.f32 %v1419_v40, %v785_v61 }
 0x34d   : > { %v804_v45 = vpack.c.bf16 %v786_v62, %v786_v62 }
 0x34f   : > { %v844_v3 = vunpack.c.l.b16 %v804_v45 }
 0x352   : > { %v787_v63 = vpop.f32.mrf.mxu3 }
 0x353   : > { %v788_v0 = vadd.f32 %v1419_v40, %v787_v63  ;;  %v817_v40 = vunpack.c.l.b16 %v793_v37 }
 0x355   : > { %v805_v1 = vpack.c.bf16 %v788_v0, %v788_v0  ;;  %v823_v42 = vpack.c.b16 %v817_v40, %v816_v41 }
 0x357   : > { %v845_v51 = vunpack.c.l.b16 %v805_v1 }
 0x359   : > { %v849_v4 = vpack.c.b16 %v845_v51, %v844_v3 }
 0x35b   : > { %858 = vmatpush.bf16.xpose.msrb.mxu0 %v849_v4 }
 0x363   : > { %859 = vmatpush.bf16.xpose.msrb.mxu0 %v848_v17 }
 0x36b   : > { %860 = vmatpush.bf16.xpose.msrb.mxu0 %v847_v57 }
 0x373   : > { %861 = vmatpush.bf16.xpose.msrb.mxu0 %v846_v53 }
 0x37a   : > { %862 = vmatmul.bf16.vlgmr.msrb.gmra.mxu0 %v822_v33 }
 0x38a   : > { %867 = vmatmul.bf16.gmra.mxu0 %v823_v42 }
 0x39a   : > { %872 = vmatmul.bf16.gmra.mxu0 %v824_v29 }
 0x3aa   : > { %877 = vmatmul.bf16.gmra.mxu0 %v825_v38 }
 0x3f7   : > { %v863_v43 = vpop.f32.mrf.mxu0 }
 0x3f8   : > { %v883_v44 = vmul.f32 0.125, %v863_v43 }
 0x3fa   : > { %v892_v49 = vsel %vm891_vm4, %v883_v44, -inf }
 0x3fb   : > { %893 = vmax.xlane.f32.xlu0 %v892_v49 }
 0x3ff   : > { %v865_v50 = vpop.f32.mrf.mxu0 }
 0x400   : > { %v884_v52 = vmul.f32 0.125, %v865_v50 }
 0x402   : > { %v895_v48 = vsel %vm891_vm4, %v884_v52, -inf }
 0x403   : > { %896 = vmax.xlane.f32.xlu0 %v895_v48 }
 0x407   : > { %v868_v53 = vpop.f32.mrf.mxu0 }
 0x408   : > { %v885_v55 = vmul.f32 0.125, %v868_v53 }
 0x40a   : > { %v898_v56 = vsel %vm891_vm4, %v885_v55, -inf }
 0x40b   : > { %899 = vmax.xlane.f32.xlu1 %v898_v56  ;;  %v994_v56 = vpack.c.bf16 %v1604_v21, %v1604_v21 }
 0x40f   : > { %v870_v58 = vpop.f32.mrf.mxu0 }
 0x410   : > { %v886_v27 = vmul.f32 0.125, %v870_v58  ;;  %v995_v58 = vpack.c.bf16 %v1610_v24, %v1610_v24 }
 0x412   : > { %v901_v28 = vsel %vm891_vm4, %v886_v27, -inf }
 0x413   : > { %902 = vmax.xlane.f32.xlu1 %v901_v28  ;;  %v1031_v28 = vunpack.c.l.b16 %v995_v58 }
 0x417   : > { %v873_v29 = vpop.f32.mrf.mxu0 }
 0x418   : > { %v887_v38 = vmul.f32 0.125, %v873_v29 }
 0x41a   : > { %v904_v59 = vsel %vm891_vm4, %v887_v38, -inf }
 0x41b   : > { %905 = vmax.xlane.f32.xlu2 %v904_v59  ;;  %v993_v59 = vpack.c.bf16 %v1598_v18, %v1598_v18 }
 0x41f   : > { %v875_v61 = vpop.f32.mrf.mxu0 }
 0x420   : > { %v888_v62 = vmul.f32 0.125, %v875_v61 }
 0x422   : > { %v907_v63 = vsel %vm891_vm4, %v888_v62, -inf }
 0x423   : > { %908 = vmax.xlane.f32.xlu2 %v907_v63 }
 0x427   : > { %v878_v45 = vpop.f32.mrf.mxu0 }
 0x428   : > { %v889_v0 = vmul.f32 0.125, %v878_v45  ;;  %v990_v45 = vpack.c.bf16 %v1577_v9, %v1577_v9 }
 0x42a   : > { %v910_v46 = vsel %vm891_vm4, %v889_v0, -inf }
 0x42b   : > { %911 = vmax.xlane.f32.xlu0 %v910_v46  ;;  %v1026_v46 = vunpack.c.l.b16 %v990_v45 }
 0x42f   : > { %v880_v1 = vpop.f32.mrf.mxu0 }
 0x430   : > { %v890_v2 = vmul.f32 0.125, %v880_v1 }
 0x432   : > { %v913_v3 = vsel %vm891_vm4, %v890_v2, -inf }
 0x433   : > { %914 = vmax.xlane.f32.xlu1 %v913_v3  ;;  %v988_v3 = vpack.c.bf16 %v1573_v7, %v1573_v7 }
 0x46e   : > { %v894_v51 = vpop.xlane.xlu0 %893 }
 0x46f   : > { %v916_v54 = vsub.f32 %v883_v44, %v894_v51  ;;  %v989_v51 = vpack.c.bf16 %v1575_v8, %v1575_v8 }
 0x471   : > { %v924_v4 = vmul.f32 1.442695, %v916_v54  ;;  %v1024_v54 = vunpack.c.l.b16 %v988_v3 }
 0x473   : > { %1423 = vpow2.f32 %v924_v4  ;;  %v1025_v4 = vunpack.c.l.b16 %v989_v51  ;;  %v1393_v51 = vld [vmem:[%s1898_s9 + $0x8] sm:$0xff] }
 0x476   : > { %v897_v5 = vpop.xlane.xlu0 %896 }
 0x477   : > { %v917_v6 = vsub.f32 %v884_v52, %v897_v5  ;;  %v1032_v5 = vpack.c.b16 %v1025_v4, %v1024_v54 }
 0x479   : > { %v1786_v10 = vpop.eup %1423  ;;  %v926_v11 = vmul.f32 1.442695, %v917_v6 }
 0x47a   : > { %v940_v13 = vsel %vm891_vm4, %v1786_v10, 0.0 }
 0x47b   : > { %1425 = vpow2.f32 %v926_v11  ;;  %941 = vadd.xlane.f32.xlu2 %v940_v13 }
 0x47e   : > { %v900_v14 = vpop.xlane.xlu1 %899 }
 0x47f   : > { %v918_v16 = vsub.f32 %v885_v55, %v900_v14 }
 0x481   : > { %v1790_v17 = vpop.eup %1425  ;;  %v928_v19 = vmul.f32 1.442695, %v918_v16 }
 0x482   : > { %v943_v20 = vsel %vm891_vm4, %v1790_v17, 0.0 }
 0x483   : > { %1427 = vpow2.f32 %v928_v19  ;;  %944 = vadd.xlane.f32.xlu0 %v943_v20 }
 0x486   : > { %v903_v22 = vpop.xlane.xlu1 %902 }
 0x487   : > { %v919_v47 = vsub.f32 %v886_v27, %v903_v22  ;;  %v1030_v27 = vunpack.c.l.b16 %v994_v56 }
 0x489   : > { %v1794_v57 = vpop.eup %1427  ;;  %v930_v60 = vmul.f32 1.442695, %v919_v47  ;;  %v1035_v29 = vpack.c.b16 %v1031_v28, %v1030_v27  ;;  %v1396_v27 = vld [vmem:[%s1898_s9 + $0x20] sm:$0xff] }
 0x48a   : > { %v946_v23 = vsel %vm891_vm4, %v1794_v57, 0.0 }
 0x48b   : > { %1429 = vpow2.f32 %v930_v60  ;;  %947 = vadd.xlane.f32.xlu1 %v946_v23  ;;  %1056 = vmatpush.bf16.msrb.mxu2 %v1035_v29 }
 0x48e   : > { %v906_v25 = vpop.xlane.xlu2 %905 }
 0x48f   : > { %v920_v26 = vsub.f32 %v887_v38, %v906_v25  ;;  %v992_v38 = vpack.c.bf16 %v1592_v15, %v1592_v15 }
 0x491   : > { %v1798_v30 = vpop.eup %1429  ;;  %v932_v31 = vmul.f32 1.442695, %v920_v26  ;;  %v1028_v61 = vunpack.c.l.b16 %v992_v38  ;;  %v1395_v38 = vld [vmem:[%s1898_s9 + $0x18] sm:$0xff] }
 0x492   : > { %v949_v32 = vsel %vm891_vm4, %v1798_v30, 0.0 }
 0x493   : > { %1431 = vpow2.f32 %v932_v31  ;;  %950 = vadd.xlane.f32.xlu2 %v949_v32 }
 0x496   : > { %v909_v33 = vpop.xlane.xlu2 %908 }
 0x497   : > { %v921_v34 = vsub.f32 %v888_v62, %v909_v33  ;;  %v1029_v62 = vunpack.c.l.b16 %v993_v59 }
 0x499   : > { %v1802_v35 = vpop.eup %1431  ;;  %v934_v36 = vmul.f32 1.442695, %v921_v34  ;;  %v1034_v63 = vpack.c.b16 %v1029_v62, %v1028_v61  ;;  %v1394_v61 = vld [vmem:[%s1898_s9 + $0x10] sm:$0xff] }
 0x49a   : > { %v952_v37 = vsel %vm891_vm4, %v1802_v35, 0.0 }
 0x49b   : > { %1433 = vpow2.f32 %v934_v36  ;;  %953 = vadd.xlane.f32.xlu0 %v952_v37  ;;  %1057 = vmatpush.bf16.msrb.mxu2 %v1034_v63 }
 0x49e   : > { %v912_v39 = vpop.xlane.xlu0 %911 }
 0x49f   : > { %v922_v40 = vsub.f32 %v889_v0, %v912_v39  ;;  %v991_v0 = vpack.c.bf16 %v1585_v12, %v1585_v12 }
 0x4a1   : > { %v1806_v41 = vpop.eup %1433  ;;  %v936_v42 = vmul.f32 1.442695, %v922_v40  ;;  %v1027_v1 = vunpack.c.l.b16 %v991_v0 }
 0x4a2   : > { %v955_v43 = vsel %vm891_vm4, %v1806_v41, 0.0 }
 0x4a3   : > { %1435 = vpow2.f32 %v936_v42  ;;  %956 = vadd.xlane.f32.xlu1 %v955_v43  ;;  %v1399_v43 = vld [vmem:[%s1898_s9 + $0x38] sm:$0xff] }
 0x4a4   : > { %1149 = vmatpush.bf16.msrb.mxu1 %v1399_v43 }
 0x4a6   : > { %v915_v44 = vpop.xlane.xlu1 %914 }
 0x4a7   : > { %v923_v49 = vsub.f32 %v890_v2, %v915_v44  ;;  %v1033_v2 = vpack.c.b16 %v1027_v1, %v1026_v46 }
 0x4a9   : > { %v1810_v50 = vpop.eup %1435  ;;  %v938_v52 = vmul.f32 1.442695, %v923_v49  ;;  %1058 = vmatpush.bf16.msrb.mxu2 %v1033_v2  ;;  %v1397_v49 = vld [vmem:[%s1898_s9 + $0x28] sm:$0xff] }
 0x4aa   : > { %v958_v48 = vsel %vm891_vm4, %v1810_v50, 0.0 }
 0x4ab   : > { %1437 = vpow2.f32 %v938_v52  ;;  %959 = vadd.xlane.f32.xlu2 %v958_v48 }
 0x4ad   : > { %1059 = vmatpush.bf16.msrb.mxu2 %v1032_v5 }
 0x4b1   : > { %v1814_v53 = vpop.eup %1437 }
 0x4b2   : > { %v961_v55 = vsel %vm891_vm4, %v1814_v53, 0.0 }
 0x4b3   : > { %962 = vadd.xlane.f32.xlu0 %v961_v55 }
 0x4ee   : > { %v942_v6 = vpop.xlane.xlu2 %941 }
 0x4ef   : > { %1439 = vrcp.f32 %v942_v6 }
 0x4f5   : > { %v1440_v13 = vpop.eup %1439 }
 0x4f6   : > { %v945_v11 = vpop.xlane.xlu0 %944  ;;  %v972_v14 = vmul.f32 %v1440_v13, %v1786_v10 }
 0x4f7   : > { %1441 = vrcp.f32 %v945_v11 }
 0x4f8   : > { %v980_v19 = vpack.c.bf16 %v972_v14, %v972_v14 }
 0x4fa   : > { %v1004_v60 = vunpack.c.l.b16 %v980_v19 }
 0x4fd   : > { %v1442_v16 = vpop.eup %1441 }
 0x4fe   : > { %v973_v20 = vmul.f32 %v1442_v16, %v1790_v17  ;;  %v948_v22 = vpop.xlane.xlu1 %947 }
 0x4ff   : > { %1443 = vrcp.f32 %v948_v22 }
 0x500   : > { %v981_v47 = vpack.c.bf16 %v973_v20, %v973_v20 }
 0x502   : > { %v1005_v23 = vunpack.c.l.b16 %v981_v47  ;;  %v1420_v47 = vld [vmem:[%s1899_s10] ss:$0 sm:$0xff] }
 0x504   : > { %v1012_v25 = vpack.c.b16 %v1005_v23, %v1004_v60 }
 0x505   : > { %v1444_v31 = vpop.eup %1443 }
 0x506   : > { %v951_v26 = vpop.xlane.xlu2 %950  ;;  %1336 = vmatmul.msk.bf16.vlgmr.msrb.gmra.mxu2 %vm891_vm4, %v1012_v25  ;;  %v974_v32 = vmul.f32 %v1444_v31, %v1794_v57  ;;  %v1398_v57 = vld [vmem:[%s1898_s9 + $0x30] sm:$0xff] }
 0x507   : > { %1445 = vrcp.f32 %v951_v26  ;;  %1150 = vmatpush.bf16.msrb.mxu1 %v1398_v57 }
 0x508   : > { %v982_v36 = vpack.c.bf16 %v974_v32, %v974_v32 }
 0x50a   : > { %v1006_v17 = vunpack.c.l.b16 %v982_v36 }
 0x50b   : > { %1151 = vmatpush.bf16.msrb.mxu1 %v1397_v49 }
 0x50d   : > { %v1446_v33 = vpop.eup %1445 }
 0x50e   : > { %v954_v34 = vpop.xlane.xlu0 %953  ;;  %v975_v10 = vmul.f32 %v1446_v33, %v1798_v30 }
 0x50f   : > { %1447 = vrcp.f32 %v954_v34  ;;  %1152 = vmatpush.bf16.msrb.mxu1 %v1396_v27 }
 0x510   : > { %v983_v37 = vpack.c.bf16 %v975_v10, %v975_v10 }
 0x512   : > { %v1007_v39 = vunpack.c.l.b16 %v983_v37 }
 0x513   : > { %1153 = vmatpush.bf16.msrb.mxu1 %v1395_v38 }
 0x514   : > { %v1013_v40 = vpack.c.b16 %v1007_v39, %v1006_v17 }
 0x515   : > { %v1448_v44 = vpop.eup %1447 }
 0x516   : > { %1337 = vmatmul.msk.bf16.gmra.mxu2 %vm891_vm4, %v1013_v40  ;;  %v957_v42 = vpop.xlane.xlu1 %956  ;;  %v976_v30 = vmul.f32 %v1448_v44, %v1802_v35 }
 0x517   : > { %1449 = vrcp.f32 %v957_v42  ;;  %1154 = vmatpush.bf16.msrb.mxu1 %v1394_v61 }
 0x518   : > { %v984_v56 = vpack.c.bf16 %v976_v30, %v976_v30 }
 0x51a   : > { %v1008_v28 = vunpack.c.l.b16 %v984_v56 }
 0x51b   : > { %1155 = vmatpush.bf16.msrb.mxu1 %v1393_v51 }
 0x51d   : > { %v1450_v52 = vpop.eup %1449 }
 0x51e   : > { %v977_v48 = vmul.f32 %v1450_v52, %v1806_v41  ;;  %v960_v55 = vpop.xlane.xlu2 %959 }
 0x51f   : > { %1451 = vrcp.f32 %v960_v55 }
 0x520   : > { %v985_v58 = vpack.c.bf16 %v977_v48, %v977_v48 }
 0x522   : > { %v1009_v29 = vunpack.c.l.b16 %v985_v58 }
 0x524   : > { %v1014_v35 = vpack.c.b16 %v1009_v29, %v1008_v28 }
 0x525   : > { %v1452_v41 = vpop.eup %1451 }
 0x526   : > { %v963_v59 = vpop.xlane.xlu0 %962  ;;  %1338 = vmatmul.msk.bf16.gmra.mxu2 %vm891_vm4, %v1014_v35  ;;  %v978_v62 = vmul.f32 %v1452_v41, %v1810_v50  ;;  %v1392_v50 = vld [vmem:[%s1898_s9] sm:$0xff] }
 0x527   : > { %1453 = vrcp.f32 %v963_v59  ;;  %1156 = vmatpush.bf16.msrb.mxu1 %v1392_v50 }
 0x528   : > { %v986_v0 = vpack.c.bf16 %v978_v62, %v978_v62 }
 0x52a   : > { %v1010_v1 = vunpack.c.l.b16 %v986_v0 }
 0x52d   : > { %v1454_v63 = vpop.eup %1453 }
 0x52e   : > { %v979_v45 = vmul.f32 %v1454_v63, %v1814_v53 }
 0x530   : > { %v987_v46 = vpack.c.bf16 %v979_v45, %v979_v45 }
 0x532   : > { %v1011_v2 = vunpack.c.l.b16 %v987_v46 }
 0x534   : > { %v1015_v3 = vpack.c.b16 %v1011_v2, %v1010_v1 }
 0x536   : > { %1339 = vmatmul.msk.bf16.gmra.mxu2 %vm891_vm4, %v1015_v3 }
 0x589   : > { %v1061_v54 = vpop.f32.mrf.mxu2 }
 0x591   : > { %v1063_v4 = vpop.f32.mrf.mxu2 }
 0x592   : > { %v1081_v53 = vpack.c.bf16 %v1063_v4, %v1061_v54 }
 0x594   : > { %1157 = vmatmul.bf16.vlgmr.msrb.gmra.mxu1 %v1081_v53 }
 0x599   : > { %v1066_v5 = vpop.f32.mrf.mxu2 }
 0x5a1   : > { %v1068_v6 = vpop.f32.mrf.mxu2 }
 0x5a2   : > { %v1082_v11 = vpack.c.bf16 %v1068_v6, %v1066_v5 }
 0x5a4   : > { %1162 = vmatmul.bf16.gmra.mxu1 %v1082_v11 }
 0x5a9   : > { %v1071_v13 = vpop.f32.mrf.mxu2 }
 0x5b1   : > { %v1073_v14 = vpop.f32.mrf.mxu2 }
 0x5b2   : > { %v1083_v16 = vpack.c.bf16 %v1073_v14, %v1071_v13 }
 0x5b4   : > { %1167 = vmatmul.bf16.gmra.mxu1 %v1083_v16 }
 0x5b9   : > { %v1076_v19 = vpop.f32.mrf.mxu2 }
 0x5c1   : > { %v1078_v20 = vpop.f32.mrf.mxu2 }
 0x5c2   : > { %v1084_v22 = vpack.c.bf16 %v1078_v20, %v1076_v19 }
 0x5c4   : > { %1172 = vmatmul.bf16.gmra.mxu1 %v1084_v22 }
 0x611   : > { %v1158_v60 = vpop.f32.mrf.mxu1 }
 0x612   : > { %v1182_v23 = vadd.f32 %v1420_v47, %v1158_v60 }
 0x614   : > { %v1190_v25 = vadd.f32 %v1182_v23, %v1573_v7 }
 0x616   : > { %1198 = vst [vmem:[%s386_s26] sm:$0xff] %v1190_v25 }
 0x619   : > { %v1160_v26 = vpop.f32.mrf.mxu1 }
 0x61a   : > { %v1183_v31 = vadd.f32 %v1420_v47, %v1160_v26 }
 0x61c   : > { %v1191_v32 = vadd.f32 %v1183_v31, %v1575_v8 }
 0x61e   : > { %1199 = vst [vmem:[%s386_s26 + $0x8] sm:$0xff] %v1191_v32 }
 0x621   : > { %v1163_v33 = vpop.f32.mrf.mxu1 }
 0x622   : > { %v1184_v34 = vadd.f32 %v1420_v47, %v1163_v33 }
 0x624   : > { %v1192_v10 = vadd.f32 %v1184_v34, %v1577_v9 }
 0x626   : > { %1200 = vst [vmem:[%s386_s26 + $0x10] sm:$0xff] %v1192_v10 }
 0x629   : > { %v1165_v36 = vpop.f32.mrf.mxu1 }
 0x62a   : > { %v1185_v37 = vadd.f32 %v1420_v47, %v1165_v36 }
 0x62c   : > { %v1193_v17 = vadd.f32 %v1185_v37, %v1585_v12 }
 0x62e   : > { %1201 = vst [vmem:[%s386_s26 + $0x18] sm:$0xff] %v1193_v17 }
 0x631   : > { %v1168_v39 = vpop.f32.mrf.mxu1 }
 0x632   : > { %v1186_v40 = vadd.f32 %v1420_v47, %v1168_v39 }
 0x634   : > { %v1194_v7 = vadd.f32 %v1186_v40, %v1592_v15 }
 0x636   : > { %1202 = vst [vmem:[%s386_s26 + $0x20] sm:$0xff] %v1194_v7 }
 0x639   : > { %v1170_v42 = vpop.f32.mrf.mxu1 }
 0x63a   : > { %v1187_v43 = vadd.f32 %v1420_v47, %v1170_v42 }
 0x63c   : > { %v1195_v8 = vadd.f32 %v1187_v43, %v1598_v18 }
 0x63e   : > { %1203 = vst [vmem:[%s386_s26 + $0x28] sm:$0xff] %v1195_v8 }
 0x641   : > { %v1173_v44 = vpop.f32.mrf.mxu1 }
 0x642   : > { %v1188_v57 = vadd.f32 %v1420_v47, %v1173_v44 }
 0x644   : > { %v1196_v9 = vadd.f32 %v1188_v57, %v1604_v21 }
 0x646   : > { %1204 = vst [vmem:[%s386_s26 + $0x30] sm:$0xff] %v1196_v9 }
 0x649   : > { %v1175_v30 = vpop.f32.mrf.mxu1 }
 0x64a   : > { %v1189_v49 = vadd.f32 %v1420_v47, %v1175_v30 }
 0x64c   : > { %v1197_v12 = vadd.f32 %v1189_v49, %v1610_v24 }
 0x64e   : > { %1205 = vst [vmem:[%s386_s26 + $0x38] sm:$0xff] %v1197_v12 }
 0x64f PF: > { %s21_s17 = sadd.s32 1, %s1461_s17  }
 0x650   : > { %p18_p4 = scmp.ge.s32.totalorder %s21_s17, 4  }
 0x652   :  { %20 = sbr.rel (!%p18_p4) target bundleno = 1 (0x1), region = 94 }

// kernel: res_block_with_attention.4
= control target key start
LH: loop header
LB: loop body
LE: loop exit
PB: predicated region body
PF: predicated region fallthrough
CT: control target
= control target key end

     0   :  { %s2556_s13 = smov 0   ;;  %s3228_s0 = inlined_call_operand.vmem [shape: f32[2,64,128], index: 0, kind: input, shape index: {}]   ;;  %s3229_s1 = inlined_call_operand.vmem [shape: f32[2,64,128], index: 1, kind: input, shape index: {}]   ;;  %s3230_s2 = inlined_call_operand.vmem [shape: f32[128,32], index: 2, kind: input, shape index: {}]   ;;  %s3231_s3 = inlined_call_operand.vmem [shape: f32[32,128], index: 3, kind: input, shape index: {}]   ;;  %s3232_s4 = inlined_call_operand.vmem [shape: f32[1,128], index: 4, kind: input, shape index: {}]   ;;  %s3233_s5 = inlined_call_operand.vmem [shape: f32[1,128], index: 5, kind: input, shape index: {}, may-alias: {5,7,9}]   ;;  %s3234_s6 = inlined_call_operand.vmem [shape: bf16[9,128,128], index: 6, kind: input, shape index: {}]   ;;  %s3235_s7 = inlined_call_operand.vmem [shape: f32[1,128], index: 7, kind: input, shape index: {}, may-alias: {5,7,9}]   ;;  %s3236_s8 = inlined_call_operand.vmem [shape: bf16[128,128], index: 8, kind: input, shape index: {}]   ;;  %s3237_s9 = inlined_call_operand.vmem [shape: f32[1,128], index: 9, kind: input, shape index: {}, may-alias: {5,7,9}]   ;;  %s3238_s10 = inlined_call_operand.vmem [shape: f32[2,64,128], index: 10, kind: output, shape index: {}]  }
   0x1 LB: > { %s1883_s14 = sadd.s32 4294967295, %s2498_s13   ;;  %p1887_p0 = scmp.ge.s32.totalorder %s2498_s13, 1  ;;  %s2498_s13 = sphi %s2556_s13, %s20_s13  }
   0x2   : > { %p322_p1 = scmp.lt.s32.totalorder %s2498_s13, 3 }
   0x4   : > { %p323_p2 = pnand %p1887_p0, %p322_p1 }
   0x5   : > { %p365_p3 = scmp.lt.s32.totalorder (!%p323_p2), %s1883_s14, 1 }
   0x6   : > { %326 = sbr.rel (%p323_p2) target bundleno = 960 (0x3c0), region = 60 }
   0xb   : > { %v403_v0 = vld [vmem:[%s3230_s2 + $0x78] sm:$0xff]  ;;  %v402_v1 = vld [vmem:[%s3230_s2 + $0x70] sm:$0xff]  ;;  %v401_v2 = vld [vmem:[%s3230_s2 + $0x68] sm:$0xff]  ;;  %s3240_s14 = smov (!%p365_p3, %s1883_s14), 1  ;;  %vm444_vm0 = vcmask 261120  }
   0xc   : > { %423 = vmatpush.msra.mxu0 %v403_v0  ;;  %498 = vmatpush.msra.mxu2 %v403_v0  ;;  %v400_v3 = vld [vmem:[%s3230_s2 + $0x60] sm:$0xff]  ;;  %s2576_s23 = sshll.u32 %s3240_s14, 6  ;;  %v399_v4 = vld [vmem:[%s3230_s2 + $0x58] sm:$0xff]  ;;  %v406_v6 = vld [vmem:[%s3231_s3 + $0x10] sm:$0xff] }
   0xd   : > { %s2585_s28 = scalar_lea.vmem %s3228_s0, %s2576_s23  ;;  %v407_v5 = vld [vmem:[%s3231_s3 + $0x18] sm:$0xff]  ;;  %v398_v11 = vld [vmem:[%s3230_s2 + $0x50] sm:$0xff]  ;;  %v397_v14 = vld [vmem:[%s3230_s2 + $0x48] sm:$0xff]  ;;  %s3118_s27 = scalar_lea.vmem %s3229_s1, %s2576_s23 }
   0xe   : > { %424 = vmatpush.msra.mxu0 %v402_v1  ;;  %499 = vmatpush.msra.mxu2 %v402_v1  ;;  %v2594_v7 = vld [vmem:[%s2585_s28] sm:$0xff]  ;;  %v2597_v8 = vld [vmem:[%s2585_s28 + $0x8] sm:$0xff]  ;;  %v2600_v9 = vld [vmem:[%s2585_s28 + $0x10] sm:$0xff]  ;;  %s3188_s15 = scalar_lea.vmem %s3238_s10, %s2576_s23 }
   0xf   : > { %460 = vmatpush.msra.mxu1 %v407_v5  ;;  %545 = vmatpush.msra.mxu3 %v407_v5  ;;  %v410_v10 = vadd.f32 %v2597_v8, %v2594_v7  ;;  %v2608_v12 = vld [vmem:[%s2585_s28 + $0x18] sm:$0xff]  ;;  %v2615_v15 = vld [vmem:[%s2585_s28 + $0x20] sm:$0xff]  ;;  %v2622_v18 = vld [vmem:[%s2585_s28 + $0x28] sm:$0xff] }
  0x10   : > { %425 = vmatpush.msra.mxu0 %v401_v2  ;;  %500 = vmatpush.msra.mxu2 %v401_v2  ;;  %v396_v17 = vld [vmem:[%s3230_s2 + $0x40] sm:$0xff]  ;;  %v395_v20 = vld [vmem:[%s3230_s2 + $0x38] sm:$0xff]  ;;  %v386_v21 = vld [vmem:[%s2585_s28 + $0x30] sm:$0xff] }
  0x11   : > { %461 = vmatpush.msra.mxu1 %v406_v6  ;;  %546 = vmatpush.msra.mxu3 %v406_v6  ;;  %v411_v13 = vadd.f32 %v410_v10, %v2600_v9  ;;  %v394_v23 = vld [vmem:[%s3230_s2 + $0x30] sm:$0xff]  ;;  %v387_v24 = vld [vmem:[%s2585_s28 + $0x38] sm:$0xff]  ;;  %v393_v26 = vld [vmem:[%s3230_s2 + $0x28] sm:$0xff] }
  0x12   : > { %426 = vmatpush.msra.mxu0 %v400_v3  ;;  %501 = vmatpush.msra.mxu2 %v400_v3  ;;  %v392_v28 = vld [vmem:[%s3230_s2 + $0x20] sm:$0xff]  ;;  %v391_v30 = vld [vmem:[%s3230_s2 + $0x18] sm:$0xff]  ;;  %v390_v32 = vld [vmem:[%s3230_s2 + $0x10] sm:$0xff] }
  0x13   : > { %v412_v16 = vadd.f32 %v411_v13, %v2608_v12  ;;  %v389_v34 = vld [vmem:[%s3230_s2 + $0x8] sm:$0xff]  ;;  %v388_v36 = vld [vmem:[%s3230_s2] sm:$0xff] }
  0x14   : > { %427 = vmatpush.msra.mxu0 %v399_v4  ;;  %502 = vmatpush.msra.mxu2 %v399_v4  ;;  %v405_v39 = vld [vmem:[%s3231_s3 + $0x8] sm:$0xff]  ;;  %v404_v40 = vld [vmem:[%s3231_s3] sm:$0xff] }
  0x15   : > { %v413_v19 = vadd.f32 %v412_v16, %v2615_v15  ;;  %462 = vmatpush.msra.mxu1 %v405_v39  ;;  %547 = vmatpush.msra.mxu3 %v405_v39  ;;  %v2352_v39 = vld [vmem:[%s3234_s6 + $0x18] sm:$0xff] }
  0x16   : > { %428 = vmatpush.msra.mxu0 %v398_v11  ;;  %503 = vmatpush.msra.mxu2 %v398_v11 }
  0x17   : > { %v414_v22 = vadd.f32 %v413_v19, %v2622_v18  ;;  %463 = vmatpush.msra.mxu1 %v404_v40  ;;  %548 = vmatpush.msra.mxu3 %v404_v40  ;;  %v2368_v40 = vld [vmem:[%s3234_s6 + $0x98] sm:$0xff] }
  0x18   : > { %429 = vmatpush.msra.mxu0 %v397_v14  ;;  %504 = vmatpush.msra.mxu2 %v397_v14 }
  0x19   : > { %v415_v25 = vadd.f32 %v414_v22, %v386_v21  ;;  %v2356_v22 = vld [vmem:[%s3234_s6 + $0x38] sm:$0xff] }
  0x1a   : > { %430 = vmatpush.msra.mxu0 %v396_v17  ;;  %505 = vmatpush.msra.mxu2 %v396_v17 }
  0x1b   : > { %v416_v27 = vadd.f32 %v415_v25, %v387_v24  ;;  %v2362_v25 = vld [vmem:[%s3234_s6 + $0x68] sm:$0xff]  ;;  %843 = vmatpush.bf16.msrb.mxu3 %v2356_v22  ;;  %v2365_v22 = vld [vmem:[%s3234_s6 + $0x80] sm:$0xff] }
  0x1c   : > { %431 = vmatpush.msra.mxu0 %v395_v20  ;;  %506 = vmatpush.msra.mxu2 %v395_v20  ;;  %v2364_v20 = vld [vmem:[%s3234_s6 + $0x78] sm:$0xff] }
  0x1d   : > { %v417_v29 = vrot.slane %v416_v27, 4  ;;  %766 = vmatpush.bf16.msrb.mxu1 %v2364_v20 }
  0x1e   : > { %432 = vmatpush.msra.mxu0 %v394_v23  ;;  %507 = vmatpush.msra.mxu2 %v394_v23  ;;  %v2372_v23 = vld [vmem:[%s3234_s6 + $0xb8] sm:$0xff] }
  0x1f   : > { %v418_v31 = vadd.f32 %v417_v29, %v416_v27  ;;  %v2371_v27 = vld [vmem:[%s3234_s6 + $0xb0] sm:$0xff]  ;;  %v2361_v29 = vld [vmem:[%s3234_s6 + $0x60] sm:$0xff] }
  0x20   : > { %433 = vmatpush.msra.mxu0 %v393_v26  ;;  %508 = vmatpush.msra.mxu2 %v393_v26  ;;  %v2355_v26 = vld [vmem:[%s3234_s6 + $0x30] sm:$0xff] }
  0x21   : > { %v419_v33 = vrot.slane %v418_v31, 2  ;;  %844 = vmatpush.bf16.msrb.mxu3 %v2355_v26 }
  0x22   : > { %434 = vmatpush.msra.mxu0 %v392_v28  ;;  %509 = vmatpush.msra.mxu2 %v392_v28  ;;  %v2379_v28 = vld [vmem:[%s3234_s6 + $0xf0] sm:$0xff] }
  0x23   : > { %v420_v35 = vadd.f32 %v419_v33, %v418_v31  ;;  %v2370_v31 = vld [vmem:[%s3234_s6 + $0xa8] sm:$0xff]  ;;  %v2360_v33 = vld [vmem:[%s3234_s6 + $0x58] sm:$0xff] }
  0x24   : > { %435 = vmatpush.msra.mxu0 %v391_v30  ;;  %510 = vmatpush.msra.mxu2 %v391_v30  ;;  %v2354_v30 = vld [vmem:[%s3234_s6 + $0x28] sm:$0xff] }
  0x25   : > { %v421_v37 = vrot.slane %v420_v35, 1  ;;  %845 = vmatpush.bf16.msrb.mxu3 %v2354_v30 }
  0x26   : > { %436 = vmatpush.msra.mxu0 %v390_v32  ;;  %511 = vmatpush.msra.mxu2 %v390_v32  ;;  %v2378_v32 = vld [vmem:[%s3234_s6 + $0xe8] sm:$0xff] }
  0x27   : > { %v422_v38 = vadd.f32 %v421_v37, %v420_v35  ;;  %v2369_v35 = vld [vmem:[%s3234_s6 + $0xa0] sm:$0xff]  ;;  %v2359_v37 = vld [vmem:[%s3234_s6 + $0x50] sm:$0xff] }
  0x28   : > { %437 = vmatpush.msra.mxu0 %v389_v34  ;;  %512 = vmatpush.msra.mxu2 %v389_v34  ;;  %v2353_v34 = vld [vmem:[%s3234_s6 + $0x20] sm:$0xff] }
  0x29   : > { %846 = vmatpush.bf16.msrb.mxu3 %v2353_v34 }
  0x2a   : > { %438 = vmatpush.msra.mxu0 %v388_v36  ;;  %513 = vmatpush.msra.mxu2 %v388_v36  ;;  %v2377_v36 = vld [vmem:[%s3234_s6 + $0xe0] sm:$0xff] }
  0x2b   : > { %439 = vmatmul.f32.vlgmr.msra.gmra.mxu0 %v422_v38  ;;  %v2500_v38 = vmov 0.0  }
  0x2c   : > { %949 = vmatpush.bf16.msrb.mxu0 %v2372_v23  ;;  %632 = vst [vmem:[#allocation2] sm:$0xff] %v2500_v38  ;;  %v2373_v23 = vld [vmem:[%s3234_s6 + $0xc0] sm:$0xff] }
  0x2d   : > { %633 = vst [vmem:[#allocation2 + $0x8] sm:$0x3] %v2500_v38  ;;  %847 = vmatpush.bf16.msrb.mxu3 %v2352_v39 }
  0x2e   : > { %634 = vst [vmem:[#allocation2 + $0x10] sm:$0xff] %v2500_v38 }
  0x2f   : > { %635 = vst [vmem:[#allocation2 + $0x18] sm:$0x3] %v2500_v38 }
  0x30   : > { %950 = vmatpush.bf16.msrb.mxu0 %v2371_v27  ;;  %636 = vst [vmem:[#allocation2 + $0x20] sm:$0xff] %v2500_v38 }
  0x31   : > { %637 = vst [vmem:[#allocation2 + $0x28] sm:$0x3] %v2500_v38 }
  0x32   : > { %638 = vst [vmem:[#allocation2 + $0x30] sm:$0xff] %v2500_v38 }
  0x33   : > { %639 = vst [vmem:[#allocation2 + $0x38] sm:$0x3] %v2500_v38 }
  0x34   : > { %951 = vmatpush.bf16.msrb.mxu0 %v2370_v31  ;;  %640 = vst [vmem:[#allocation2 + $0x40] sm:$0xff] %v2500_v38  ;;  %v2396_v31 = vld [vmem:[%s3234_s6 + $0x178] sm:$0xff] }
  0x35   : > { %641 = vst [vmem:[#allocation2 + $0x48] sm:$0x3] %v2500_v38 }
  0x36   : > { %642 = vst [vmem:[#allocation2 + $0x50] sm:$0xff] %v2500_v38 }
  0x37   : > { %643 = vst [vmem:[#allocation2 + $0x58] sm:$0x3] %v2500_v38 }
  0x38   : > { %952 = vmatpush.bf16.msrb.mxu0 %v2369_v35  ;;  %644 = vst [vmem:[#allocation2 + $0x60] sm:$0xff] %v2500_v38  ;;  %v2395_v35 = vld [vmem:[%s3234_s6 + $0x170] sm:$0xff] }
  0x39   : > { %645 = vst [vmem:[#allocation2 + $0x68] sm:$0x3] %v2500_v38 }
  0x3a   : > { %646 = vst [vmem:[#allocation2 + $0x70] sm:$0xff] %v2500_v38 }
  0x3b   : > { %647 = vst [vmem:[#allocation2 + $0x78] sm:$0x3] %v2500_v38 }
  0x3c   : > { %953 = vmatpush.bf16.msrb.mxu0 %v2368_v40  ;;  %648 = vst [vmem:[#allocation2 + $0x80] sm:$0xff] %v2500_v38 }
  0x3d   : > { %649 = vst [vmem:[#allocation2 + $0x88] sm:$0x3] %v2500_v38 }
  0x3e   : > { %650 = vst [vmem:[#allocation2 + $0x90] sm:$0xff] %v2500_v38 }
  0x3f   : > { %651 = vst [vmem:[#allocation2 + $0x98] sm:$0x3] %v2500_v38 }
  0xa8   : > { %v440_v41 = vpop.f32.mrf.mxu0 }
  0xa9   : > { %v443_v42 = vmul.f32 0.0078125, %v440_v41  ;;  %v2376_v41 = vld [vmem:[%s3234_s6 + $0xd8] sm:$0xff] }
  0xab   : > { %1894 = vmatmul.msk.f32.vlgmr.msra.gmra.mxu1 %vm444_vm0, %v443_v42 }
 0x128   : > { %v465_v43 = vpop.f32.mrf.mxu1 }
 0x129   : > { %v468_v44 = vperm.slane %v465_v43, 0  ;;  %v2358_v43 = vld [vmem:[%s3234_s6 + $0x48] sm:$0xff] }
 0x12b   : > { %v2660_v45 = vsub.f32 %v2594_v7, %v468_v44  ;;  %v2663_v46 = vsub.f32 %v2597_v8, %v468_v44  ;;  %v2666_v47 = vsub.f32 %v2600_v9, %v468_v44  ;;  %v2669_v48 = vsub.f32 %v2608_v12, %v468_v44 }
 0x12c   : > { %v2676_v51 = vsub.f32 %v2615_v15, %v468_v44  ;;  %v2681_v54 = vsub.f32 %v2622_v18, %v468_v44  ;;  %v2685_v57 = vsub.f32 %v386_v21, %v468_v44  ;;  %v2689_v60 = vsub.f32 %v387_v24, %v468_v44  ;;  %v2363_v21 = vld [vmem:[%s3234_s6 + $0x70] sm:$0xff]  ;;  %v2380_v24 = vld [vmem:[%s3234_s6 + $0xf8] sm:$0xff] }
 0x12d   : > { %v477_v49 = vmul.f32 %v2660_v45, %v2660_v45  ;;  %v478_v50 = vmul.f32 %v2663_v46, %v2663_v46  ;;  %v479_v52 = vmul.f32 %v2666_v47, %v2666_v47  ;;  %v480_v55 = vmul.f32 %v2669_v48, %v2669_v48  ;;  %767 = vmatpush.bf16.msrb.mxu1 %v2363_v21 }
 0x12e   : > { %v481_v58 = vmul.f32 %v2676_v51, %v2676_v51  ;;  %v482_v61 = vmul.f32 %v2681_v54, %v2681_v54  ;;  %v483_v63 = vmul.f32 %v2685_v57, %v2685_v57  ;;  %v484_v1 = vmul.f32 %v2689_v60, %v2689_v60  ;;  %1063 = vmatpush.bf16.msrb.mxu2 %v2380_v24 }
 0x12f   : > { %v485_v53 = vadd.f32 %v478_v50, %v477_v49  ;;  %v2454_v49 = vld [vmem:[%s3232_s4] ss:$0 sm:$0xff] }
 0x130   : > { %v2455_v50 = vld [vmem:[%s3233_s5] ss:$0 sm:$0xff] }
 0x131   : > { %v486_v56 = vadd.f32 %v485_v53, %v479_v52  ;;  %768 = vmatpush.bf16.msrb.mxu1 %v2362_v25 }
 0x132   : > { %1064 = vmatpush.bf16.msrb.mxu2 %v2379_v28 }
 0x133   : > { %v487_v59 = vadd.f32 %v486_v56, %v480_v55 }
 0x135   : > { %v488_v62 = vadd.f32 %v487_v59, %v481_v58  ;;  %769 = vmatpush.bf16.msrb.mxu1 %v2361_v29  ;;  %v2351_v58 = vld [vmem:[%s3234_s6 + $0x10] sm:$0xff] }
 0x136   : > { %1065 = vmatpush.bf16.msrb.mxu2 %v2378_v32  ;;  %v2367_v59 = vld [vmem:[%s3234_s6 + $0x90] sm:$0xff]  ;;  %848 = vmatpush.bf16.msrb.mxu3 %v2351_v58  ;;  %v2388_v32 = vld [vmem:[%s3234_s6 + $0x138] sm:$0xff] }
 0x137   : > { %v489_v0 = vadd.f32 %v488_v62, %v482_v61  ;;  %v2375_v61 = vld [vmem:[%s3234_s6 + $0xd0] sm:$0xff]  ;;  %954 = vmatpush.bf16.msrb.mxu0 %v2367_v59 }
 0x139   : > { %v490_v2 = vadd.f32 %v489_v0, %v483_v63  ;;  %770 = vmatpush.bf16.msrb.mxu1 %v2360_v33 }
 0x13a   : > { %1066 = vmatpush.bf16.msrb.mxu2 %v2377_v36  ;;  %v2387_v36 = vld [vmem:[%s3234_s6 + $0x130] sm:$0xff] }
 0x13b   : > { %v491_v3 = vadd.f32 %v490_v2, %v484_v1  ;;  %v2350_v2 = vld [vmem:[%s3234_s6 + $0x8] sm:$0xff] }
 0x13c   : > { %849 = vmatpush.bf16.msrb.mxu3 %v2350_v2 }
 0x13d   : > { %v492_v4 = vrot.slane %v491_v3, 4  ;;  %771 = vmatpush.bf16.msrb.mxu1 %v2359_v37 }
 0x13e   : > { %1067 = vmatpush.bf16.msrb.mxu2 %v2376_v41 }
 0x13f   : > { %v493_v5 = vadd.f32 %v492_v4, %v491_v3 }
 0x141   : > { %v494_v6 = vrot.slane %v493_v5, 2  ;;  %772 = vmatpush.bf16.msrb.mxu1 %v2358_v43 }
 0x142   : > { %1068 = vmatpush.bf16.msrb.mxu2 %v2375_v61  ;;  %v2394_v61 = vld [vmem:[%s3234_s6 + $0x168] sm:$0xff] }
 0x143   : > { %v495_v7 = vadd.f32 %v494_v6, %v493_v5 }
 0x145   : > { %v496_v8 = vrot.slane %v495_v7, 1 }
 0x147   : > { %v497_v9 = vadd.f32 %v496_v8, %v495_v7 }
 0x149   : > { %514 = vmatmul.f32.vlgmr.msra.gmra.mxu2 %v497_v9  ;;  %v2374_v9 = vld [vmem:[%s3234_s6 + $0xc8] sm:$0xff] }
 0x14a   : > { %1069 = vmatpush.bf16.msrb.mxu2 %v2374_v9 }
 0x14e   : > { %1070 = vmatpush.bf16.msrb.mxu2 %v2373_v23  ;;  %v2392_v23 = vld [vmem:[%s3234_s6 + $0x158] sm:$0xff] }
 0x1cc   : > { %v515_v10 = vpop.f32.mrf.mxu2 }
 0x1cd   : > { %v518_v11 = vmul.f32 0.0078125, %v515_v10 }
 0x1cf   : > { %v519_v12 = vadd.f32 1e-05, %v518_v11 }
 0x1d1   : > { %2458 = vrsqrt.f32 %v519_v12  ;;  %vm526_vm2 = vweird.f32 %v519_v12 }
 0x1d7   : > { %v2459_v13 = vpop.eup %2458 }
 0x1d8   : > { %v521_v14 = vmul.f32 %v2459_v13, %v519_v12  ;;  %vm527_vm1 = vweird.f32 %v2459_v13 }
 0x1d9   : > { %vm528_vm3 = vmor %vm526_vm2, %vm527_vm1 }
 0x1da   : > { %v522_v15 = vmul.f32 %v2459_v13, %v521_v14  ;;  %v2349_v14 = vld [vmem:[%s3234_s6] sm:$0xff] }
 0x1db   : > { %850 = vmatpush.bf16.msrb.mxu3 %v2349_v14 }
 0x1dc   : > { %v523_v16 = vmul.f32 0.5, %v522_v15 }
 0x1de   : > { %v524_v17 = vsub.f32 1.5, %v523_v16 }
 0x1e0   : > { %v525_v18 = vmul.f32 %v2459_v13, %v524_v17 }
 0x1e2   : > { %v529_v19 = vsel %vm528_vm3, %v2459_v13, %v525_v18 }
 0x1e3   : > { %1895 = vmatmul.msk.f32.vlgmr.msra.gmra.mxu3 %vm444_vm0, %v529_v19 }
 0x1e4   : > { %1291 = vmatpush.bf16.msra.mxu3 %v2396_v31  ;;  %v2402_v31 = vld [vmem:[%s3234_s6 + $0x1a8] sm:$0xff] }
 0x1e8   : > { %1292 = vmatpush.bf16.msra.mxu3 %v2395_v35 }
 0x1ec   : > { %1293 = vmatpush.bf16.msra.mxu3 %v2394_v61  ;;  %v2406_v61 = vld [vmem:[%s3234_s6 + $0x1c8] sm:$0xff] }
 0x266   : > { %v550_v42 = vpop.f32.mrf.mxu3 }
 0x267   : > { %v553_v44 = vperm.slane %v550_v42, 0 }
 0x269   : > { %v554_v52 = vmul.f32 %v553_v44, %v2660_v45  ;;  %v555_v53 = vmul.f32 %v553_v44, %v2663_v46  ;;  %v556_v55 = vmul.f32 %v553_v44, %v2666_v47  ;;  %v557_v56 = vmul.f32 %v553_v44, %v2669_v48 }
 0x26a   : > { %v558_v45 = vmul.f32 %v553_v44, %v2676_v51  ;;  %v559_v46 = vmul.f32 %v553_v44, %v2681_v54  ;;  %v560_v47 = vmul.f32 %v553_v44, %v2685_v57  ;;  %v561_v48 = vmul.f32 %v553_v44, %v2689_v60  ;;  %v2357_v51 = vld [vmem:[%s3234_s6 + $0x40] sm:$0xff]  ;;  %v2366_v60 = vld [vmem:[%s3234_s6 + $0x88] sm:$0xff] }
 0x26b   : > { %v565_v62 = vmul.f32 %v2454_v49, %v554_v52  ;;  %v566_v63 = vmul.f32 %v2454_v49, %v555_v53  ;;  %v567_v0 = vmul.f32 %v2454_v49, %v556_v55  ;;  %v568_v1 = vmul.f32 %v2454_v49, %v557_v56  ;;  %773 = vmatpush.bf16.msrb.mxu1 %v2357_v51 }
 0x26c   : > { %v569_v54 = vmul.f32 %v2454_v49, %v558_v45  ;;  %v570_v3 = vmul.f32 %v2454_v49, %v559_v46  ;;  %v571_v57 = vmul.f32 %v2454_v49, %v560_v47  ;;  %v572_v4 = vmul.f32 %v2454_v49, %v561_v48  ;;  %955 = vmatpush.bf16.msrb.mxu0 %v2366_v60  ;;  %v2386_v45 = vld [vmem:[%s3234_s6 + $0x128] sm:$0xff] }
 0x26d   : > { %v2803_v5 = vadd.f32 %v2455_v50, %v565_v62  ;;  %v2805_v6 = vadd.f32 %v2455_v50, %v566_v63  ;;  %v2807_v7 = vadd.f32 %v2455_v50, %v567_v0  ;;  %v2809_v8 = vadd.f32 %v2455_v50, %v568_v1  ;;  %v689_v48 = vld [vmem:[#allocation2 + $0x1] sm:$0xff] }
 0x26e   : > { %v2814_v10 = vadd.f32 %v2455_v50, %v569_v54  ;;  %v2816_v11 = vadd.f32 %v2455_v50, %v570_v3  ;;  %v2818_v12 = vadd.f32 %v2455_v50, %v571_v57  ;;  %v2820_v13 = vadd.f32 %v2455_v50, %v572_v4  ;;  %v2393_v62 = vld [vmem:[%s3234_s6 + $0x160] sm:$0xff] }
 0x26f   : > { %v584_v15 = vsub.f32 0.0, %v2803_v5  ;;  %v585_v16 = vsub.f32 0.0, %v2805_v6  ;;  %v586_v17 = vsub.f32 0.0, %v2807_v7  ;;  %v587_v18 = vsub.f32 0.0, %v2809_v8  ;;  %1177 = vmatpush.bf16.msra.mxu1 %v2388_v32  ;;  %v2385_v63 = vld [vmem:[%s3234_s6 + $0x120] sm:$0xff]  ;;  %1294 = vmatpush.bf16.msra.mxu3 %v2393_v62  ;;  %v2410_v32 = vld [vmem:[%s3234_s6 + $0x1e8] sm:$0xff] }
 0x270   : > { %v588_v19 = vsub.f32 0.0, %v2814_v10  ;;  %v589_v20 = vsub.f32 0.0, %v2816_v11  ;;  %v590_v21 = vsub.f32 0.0, %v2818_v12  ;;  %v591_v27 = vsub.f32 0.0, %v2820_v13  ;;  %956 = vmatpush.bf16.msrb.mxu0 %v2365_v22  ;;  %v2397_v62 = vld [vmem:[%s3234_s6 + $0x180] sm:$0xff] }
 0x271   : > { %v592_v24 = vmul.f32 1.442695, %v584_v15  ;;  %v594_v25 = vmul.f32 1.442695, %v585_v16  ;;  %v596_v26 = vmul.f32 1.442695, %v586_v17 }
 0x272   : > { %v598_v28 = vmul.f32 1.442695, %v587_v18  ;;  %v600_v29 = vmul.f32 1.442695, %v588_v19  ;;  %v602_v30 = vmul.f32 1.442695, %v589_v20 }
 0x273   : > { %2460 = vpow2.f32 %v592_v24  ;;  %v604_v33 = vmul.f32 1.442695, %v590_v21  ;;  %v606_v34 = vmul.f32 1.442695, %v591_v27  ;;  %1178 = vmatpush.bf16.msra.mxu1 %v2387_v36  ;;  %v872_v17 = vld [vmem:[#allocation2 + $0x2] sm:$0xff]  ;;  %v2412_v24 = vld [vmem:[%s3234_s6 + $0x1f8] sm:$0xff]  ;;  %1295 = vmatpush.bf16.msra.mxu3 %v2392_v23 }
 0x274   : > { %2462 = vpow2.f32 %v594_v25  ;;  %v2404_v25 = vld [vmem:[%s3234_s6 + $0x1b8] sm:$0xff]  ;;  %1520 = vmatpush.bf16.msra.mxu2 %v2412_v24  ;;  %v2391_v27 = vld [vmem:[%s3234_s6 + $0x150] sm:$0xff]  ;;  %v2426_v24 = vld [vmem:[%s3236_s8 + $0x28] sm:$0xff] }
 0x275   : > { %2464 = vpow2.f32 %v596_v26  ;;  %1406 = vmatpush.bf16.msra.mxu0 %v2404_v25  ;;  %v2403_v26 = vld [vmem:[%s3234_s6 + $0x1b0] sm:$0xff]  ;;  %v2418_v25 = vld [vmem:[%s3234_s6 + $0x228] sm:$0xff] }
 0x276   : > { %2466 = vpow2.f32 %v598_v28  ;;  %v2411_v28 = vld [vmem:[%s3234_s6 + $0x1f0] sm:$0xff] }
 0x277   : > { %2468 = vpow2.f32 %v600_v29  ;;  %1179 = vmatpush.bf16.msra.mxu1 %v2386_v45  ;;  %v2383_v29 = vld [vmem:[%s3234_s6 + $0x110] sm:$0xff]  ;;  %1296 = vmatpush.bf16.msra.mxu3 %v2391_v27 }
 0x278   : > { %2470 = vpow2.f32 %v602_v30  ;;  %1521 = vmatpush.bf16.msra.mxu2 %v2411_v28  ;;  %v2424_v28 = vld [vmem:[%s3236_s8 + $0x18] sm:$0xff] }
 0x279   : > { %v2461_v37 = vpop.eup %2460  ;;  %2472 = vpow2.f32 %v604_v33  ;;  %1407 = vmatpush.bf16.msra.mxu0 %v2403_v26  ;;  %v2417_v26 = vld [vmem:[%s3234_s6 + $0x220] sm:$0xff] }
 0x27a   : > { %v2463_v39 = vpop.eup %2462  ;;  %2474 = vpow2.f32 %v606_v34  ;;  %v608_v40 = vadd.f32 1.0, %v2461_v37  ;;  %v2401_v37 = vld [vmem:[%s3234_s6 + $0x1a0] sm:$0xff] }
 0x27b   : > { %v2465_v41 = vpop.eup %2464  ;;  %v609_v42 = vadd.f32 1.0, %v2463_v39  ;;  %1180 = vmatpush.bf16.msra.mxu1 %v2385_v63 }
 0x27c   : > { %v2467_v43 = vpop.eup %2466  ;;  %v610_v44 = vadd.f32 1.0, %v2465_v41  ;;  %2476 = vrcp.f32 %v608_v40  ;;  %1522 = vmatpush.bf16.msra.mxu2 %v2410_v32  ;;  %v2409_v41 = vld [vmem:[%s3234_s6 + $0x1e0] sm:$0xff]  ;;  %v1450_v32 = vld [vmem:[#allocation2 + $0x91] sm:$0xff] }
 0x27d   : > { %v2469_v49 = vpop.eup %2468  ;;  %v611_v50 = vadd.f32 1.0, %v2467_v43  ;;  %2478 = vrcp.f32 %v609_v42  ;;  %1408 = vmatpush.bf16.msra.mxu0 %v2402_v31  ;;  %v2390_v43 = vld [vmem:[%s3234_s6 + $0x148] sm:$0xff] }
 0x27e   : > { %v2471_v52 = vpop.eup %2470  ;;  %v612_v53 = vadd.f32 1.0, %v2469_v49  ;;  %2480 = vrcp.f32 %v610_v44  ;;  %v2400_v44 = vld [vmem:[%s3234_s6 + $0x198] sm:$0xff]  ;;  %1297 = vmatpush.bf16.msra.mxu3 %v2390_v43 }
 0x27f   : > { %v2473_v55 = vpop.eup %2472  ;;  %v613_v56 = vadd.f32 1.0, %v2471_v52  ;;  %2482 = vrcp.f32 %v611_v50  ;;  %v2408_v49 = vld [vmem:[%s3234_s6 + $0x1d8] sm:$0xff]  ;;  %v2382_v50 = vld [vmem:[%s3234_s6 + $0x108] sm:$0xff]  ;;  %v2389_v52 = vld [vmem:[%s3234_s6 + $0x140] sm:$0xff] }
 0x280   : > { %v2475_v58 = vpop.eup %2474  ;;  %v614_v59 = vadd.f32 1.0, %v2473_v55  ;;  %2484 = vrcp.f32 %v612_v53  ;;  %1523 = vmatpush.bf16.msra.mxu2 %v2409_v41  ;;  %v2399_v53 = vld [vmem:[%s3234_s6 + $0x190] sm:$0xff]  ;;  %v2381_v55 = vld [vmem:[%s3234_s6 + $0x100] sm:$0xff] }
 0x281   : > { %v615_v46 = vadd.f32 1.0, %v2475_v58  ;;  %2486 = vrcp.f32 %v613_v56  ;;  %1409 = vmatpush.bf16.msra.mxu0 %v2401_v37  ;;  %v2407_v58 = vld [vmem:[%s3234_s6 + $0x1d0] sm:$0xff] }
 0x282   : > { %v2477_v47 = vpop.eup %2476  ;;  %2488 = vrcp.f32 %v614_v59  ;;  %1298 = vmatpush.bf16.msra.mxu3 %v2389_v52  ;;  %v2398_v59 = vld [vmem:[%s3234_s6 + $0x188] sm:$0xff] }
 0x283   : > { %v2479_v0 = vpop.eup %2478  ;;  %2490 = vrcp.f32 %v615_v46  ;;  %v2877_v1 = vmul.f32 %v2477_v47, %v2803_v5 }
 0x284   : > { %v2481_v2 = vpop.eup %2480  ;;  %v2880_v51 = vmul.f32 %v2479_v0, %v2805_v6  ;;  %1524 = vmatpush.bf16.msra.mxu2 %v2408_v49 }
 0x285   : > { %v2483_v54 = vpop.eup %2482  ;;  %v2883_v3 = vmul.f32 %v2481_v2, %v2807_v7  ;;  %653 = vst [vmem:[#allocation2 + $0x11] sm:$0xff] %v2877_v1  ;;  %v697_v57 = vpack.c.bf16 %v2877_v1, %v689_v48  ;;  %1410 = vmatpush.bf16.msra.mxu0 %v2400_v44  ;;  %v2405_v2 = vld [vmem:[%s3234_s6 + $0x1c0] sm:$0xff] }
 0x286   : > { %v2485_v4 = vpop.eup %2484  ;;  %v2888_v60 = vmul.f32 %v2483_v54, %v2809_v8  ;;  %654 = vst [vmem:[#allocation2 + $0x21] sm:$0xff] %v2880_v51  ;;  %v1108_v5 = vpack.c.bf16 %v2880_v51, %v2877_v1  ;;  %v2423_v1 = vld [vmem:[%s3236_s8 + $0x10] sm:$0xff] }
 0x287   : > { %v2487_v6 = vpop.eup %2486  ;;  %v2894_v9 = vmul.f32 %v2485_v4, %v2814_v10  ;;  %774 = vmatmul.bf16.vlgmr.msrb.gmra.mxu1 %v697_v57  ;;  %655 = vst [vmem:[#allocation2 + $0x31] sm:$0xff] %v2883_v3  ;;  %v2947_v30 = vpack.c.bf16 %v2883_v3, %v2880_v51  ;;  %v2428_v57 = vld [vmem:[%s3236_s8 + $0x38] sm:$0xff]  ;;  %v2415_v51 = vld [vmem:[%s3234_s6 + $0x210] sm:$0xff] }
 0x288   : > { %v2489_v7 = vpop.eup %2488  ;;  %v2898_v14 = vmul.f32 %v2487_v6, %v2816_v11  ;;  %656 = vst [vmem:[#allocation2 + $0x41] sm:$0xff] %v2888_v60  ;;  %v1109_v8 = vpack.c.bf16 %v2888_v60, %v2883_v3  ;;  %1525 = vmatpush.bf16.msra.mxu2 %v2407_v58  ;;  %v2420_v4 = vld [vmem:[%s3234_s6 + $0x238] sm:$0xff]  ;;  %v2427_v6 = vld [vmem:[%s3236_s8 + $0x30] sm:$0xff]  ;;  %v2421_v3 = vld [vmem:[%s3236_s8] sm:$0xff] }
 0x289   : > { %v2491_v15 = vpop.eup %2490  ;;  %v2904_v16 = vmul.f32 %v2489_v7, %v2818_v12  ;;  %657 = vst [vmem:[#allocation2 + $0x51] sm:$0xff] %v2894_v9  ;;  %v2997_v56 = vpack.c.bf16 %v2894_v9, %v2888_v60  ;;  %1411 = vmatpush.bf16.msra.mxu0 %v2399_v53  ;;  %v2419_v7 = vld [vmem:[%s3234_s6 + $0x230] sm:$0xff]  ;;  %v2413_v60 = vld [vmem:[%s3234_s6 + $0x200] sm:$0xff] }
 0x28a   : > { %v2908_v10 = vmul.f32 %v2491_v15, %v2820_v13  ;;  %658 = vst [vmem:[#allocation2 + $0x61] sm:$0xff] %v2898_v14  ;;  %v1110_v11 = vpack.c.bf16 %v2898_v14, %v2894_v9  ;;  %v1687_v53 = vld [vmem:[%s3118_s27 + $0x20] sm:$0xff] }
 0x28b   : > { %659 = vst [vmem:[#allocation2 + $0x71] sm:$0xff] %v2904_v16  ;;  %v3041_v15 = vpack.c.bf16 %v2904_v16, %v2898_v14 }
 0x28c   : > { %v662_v18 = vld [vmem:[#allocation2 + $0x10] sm:$0xff]  ;;  %660 = vst [vmem:[#allocation2 + $0x81] sm:$0xff] %v2908_v10  ;;  %v1111_v12 = vpack.c.bf16 %v2908_v10, %v2904_v16  ;;  %1526 = vmatpush.bf16.msra.mxu2 %v2406_v61  ;;  %v1454_v14 = vpack.c.bf16 %v1450_v32, %v2908_v10 }
 0x28d   : > { %v2915_v19 = vld [vmem:[#allocation2 + $0x12] sm:$0xff]  ;;  %v669_v20 = vpack.c.bf16 %v662_v18, %v2500_v38  ;;  %v987_v21 = vld [vmem:[#allocation2 + $0x20] sm:$0xff]  ;;  %1412 = vmatpush.bf16.msra.mxu0 %v2398_v59 }
 0x28e   : > { %v880_v13 = vpack.c.bf16 %v2915_v19, %v872_v17  ;;  %v994_v22 = vpack.c.bf16 %v987_v21, %v662_v18  ;;  %v2384_v38 = vld [vmem:[%s3234_s6 + $0x118] sm:$0xff]  ;;  %v664_v33 = vld [vmem:[#allocation2 + $0x30] sm:$0xff]  ;;  %v2956_v34 = vld [vmem:[#allocation2 + $0x22] sm:$0xff] }
 0x28f   : > { %851 = vmatmul.bf16.vlgmr.msrb.gmra.mxu3 %v669_v20  ;;  %1181 = vmatpush.bf16.msra.mxu1 %v2384_v38  ;;  %v2958_v35 = vld [vmem:[#allocation2 + $0x32] sm:$0xff]  ;;  %v989_v36 = vld [vmem:[#allocation2 + $0x40] sm:$0xff]  ;;  %v2963_v39 = vpack.c.bf16 %v664_v33, %v987_v21  ;;  %v1222_v27 = vpack.c.bf16 %v2956_v34, %v2915_v19  ;;  %v2422_v19 = vld [vmem:[%s3236_s8 + $0x8] sm:$0xff] }
 0x290   : > { %957 = vmatmul.bf16.vlgmr.msrb.gmra.mxu0 %v880_v13  ;;  %1071 = vmatmul.bf16.vlgmr.msrb.gmra.mxu2 %v994_v22  ;;  %v2967_v40 = vpack.c.bf16 %v2958_v35, %v2956_v34  ;;  %v995_v42 = vpack.c.bf16 %v989_v36, %v664_v33  ;;  %v666_v45 = vld [vmem:[#allocation2 + $0x50] sm:$0xff]  ;;  %v3009_v46 = vld [vmem:[#allocation2 + $0x42] sm:$0xff] }
 0x291   : > { %v3011_v47 = vld [vmem:[#allocation2 + $0x52] sm:$0xff]  ;;  %v991_v48 = vld [vmem:[#allocation2 + $0x60] sm:$0xff]  ;;  %v3016_v63 = vpack.c.bf16 %v666_v45, %v989_v36  ;;  %1413 = vmatpush.bf16.msra.mxu0 %v2397_v62  ;;  %1527 = vmatpush.bf16.msra.mxu2 %v2405_v2 }
 0x292   : > { %v3020_v0 = vpack.c.bf16 %v3011_v47, %v3009_v46  ;;  %v996_v54 = vpack.c.bf16 %v991_v48, %v666_v45  ;;  %2437 = vmatpush.bf16.msrb.mxu3 %v2428_v57  ;;  %v668_v17 = vld [vmem:[#allocation2 + $0x70] sm:$0xff]  ;;  %v878_v18 = vld [vmem:[#allocation2 + $0x62] sm:$0xff] }
 0x293   : > { %1182 = vmatpush.bf16.msra.mxu1 %v2383_v29  ;;  %v3044_v20 = vld [vmem:[#allocation2 + $0x72] sm:$0xff]  ;;  %v3046_v13 = vld [vmem:[#allocation2 + $0x80] sm:$0xff]  ;;  %v672_v21 = vpack.c.bf16 %v668_v17, %v991_v48 }
 0x294   : > { %v3049_v22 = vpack.c.bf16 %v3044_v20, %v878_v18  ;;  %v997_v23 = vpack.c.bf16 %v3046_v13, %v668_v17  ;;  %v2425_v38 = vld [vmem:[%s3236_s8 + $0x20] sm:$0xff]  ;;  %v2416_v29 = vld [vmem:[%s3234_s6 + $0x218] sm:$0xff]  ;;  %v1340_v9 = vpack.c.bf16 0.0, %v3046_v13  ;;  %v1685_v16 = vld [vmem:[%s3118_s27 + $0x10] sm:$0xff] }
 0x295   : > { %1759 = vmatpush.bf16.msrb.mxu2 %v2428_v57  ;;  %1634 = vmatpush.bf16.msrb.mxu0 %v2420_v4  ;;  %v1221_v31 = vld [vmem:[#allocation2 + $0x82] sm:$0xff]  ;;  %v1564_v62 = vld [vmem:[#allocation2 + $0x92] sm:$0xff] }
 0x296   : > { %2438 = vmatpush.bf16.msrb.mxu3 %v2427_v6  ;;  %v1225_v33 = vpack.c.bf16 %v1221_v31, %v3044_v20  ;;  %v1683_v34 = vld [vmem:[%s3118_s27] sm:$0xff] }
 0x297   : > { %779 = vmatmul.bf16.gmra.mxu1 %v2947_v30 }
 0x298   : > { %1183 = vmatpush.bf16.msra.mxu1 %v2382_v50 }
 0x299   : > { %1635 = vmatpush.bf16.msrb.mxu0 %v2419_v7  ;;  %1760 = vmatpush.bf16.msrb.mxu2 %v2427_v6 }
 0x29a   : > { %2439 = vmatpush.bf16.msrb.mxu3 %v2426_v24 }
 0x29c   : > { %1184 = vmatpush.bf16.msra.mxu1 %v2381_v55  ;;  %v1688_v55 = vld [vmem:[%s3118_s27 + $0x28] sm:$0xff] }
 0x29d   : > { %1636 = vmatpush.bf16.msrb.mxu0 %v2418_v25  ;;  %1761 = vmatpush.bf16.msrb.mxu2 %v2426_v24  ;;  %v1693_v61 = vpack.c.bf16 %v1688_v55, %v1687_v53 }
 0x29e   : > { %2440 = vmatpush.bf16.msrb.mxu3 %v2425_v38 }
 0x29f   : > { %856 = vmatmul.bf16.gmra.mxu3 %v2963_v39 }
 0x2a0   : > { %962 = vmatmul.bf16.gmra.mxu0 %v2967_v40  ;;  %1076 = vmatmul.bf16.gmra.mxu2 %v995_v42 }
 0x2a1   : > { %2429 = vmatpush.bf16.msrb.mxu1 %v2420_v4  ;;  %1637 = vmatpush.bf16.msrb.mxu0 %v2417_v26  ;;  %v1568_v4 = vpack.c.bf16 %v1564_v62, %v1221_v31 }
 0x2a2   : > { %1762 = vmatpush.bf16.msrb.mxu2 %v2425_v38  ;;  %2441 = vmatpush.bf16.msrb.mxu3 %v2424_v28 }
 0x2a5   : > { %2430 = vmatpush.bf16.msrb.mxu1 %v2419_v7  ;;  %1638 = vmatpush.bf16.msrb.mxu0 %v2416_v29  ;;  %v1689_v7 = vld [vmem:[%s3118_s27 + $0x30] sm:$0xff] }
 0x2a6   : > { %1763 = vmatpush.bf16.msrb.mxu2 %v2424_v28  ;;  %2442 = vmatpush.bf16.msrb.mxu3 %v2423_v1 }
 0x2a7   : > { %784 = vmatmul.bf16.gmra.mxu1 %v2997_v56 }
 0x2a9   : > { %2431 = vmatpush.bf16.msrb.mxu1 %v2418_v25  ;;  %1639 = vmatpush.bf16.msrb.mxu0 %v2415_v51 }
 0x2aa   : > { %1764 = vmatpush.bf16.msrb.mxu2 %v2423_v1  ;;  %2443 = vmatpush.bf16.msrb.mxu3 %v2422_v19 }
 0x2ad   : > { %2432 = vmatpush.bf16.msrb.mxu1 %v2417_v26 }
 0x2ae   : > { %1765 = vmatpush.bf16.msrb.mxu2 %v2422_v19  ;;  %2444 = vmatpush.bf16.msrb.mxu3 %v2421_v3 }
 0x2af   : > { %861 = vmatmul.bf16.gmra.mxu3 %v3016_v63 }
 0x2b0   : > { %967 = vmatmul.bf16.gmra.mxu0 %v3020_v0  ;;  %1081 = vmatmul.bf16.gmra.mxu2 %v996_v54 }
 0x2b1   : > { %2433 = vmatpush.bf16.msrb.mxu1 %v2416_v29 }
 0x2b2   : > { %1766 = vmatpush.bf16.msrb.mxu2 %v2421_v3 }
 0x2b5   : > { %2434 = vmatpush.bf16.msrb.mxu1 %v2415_v51 }
 0x2b7   : > { %789 = vmatmul.bf16.gmra.mxu1 %v3041_v15 }
 0x2bf   : > { %866 = vmatmul.bf16.gmra.mxu3 %v672_v21 }
 0x2c0   : > { %972 = vmatmul.bf16.gmra.mxu0 %v3049_v22  ;;  %1086 = vmatmul.bf16.gmra.mxu2 %v997_v23 }
 0x2c7   : > { %1185 = vmatmul.bf16.vlgmr.msra.gmra.mxu1 %v1108_v5  ;;  %v1223_v5 = vpack.c.bf16 %v3009_v46, %v2958_v35  ;;  %v1684_v35 = vld [vmem:[%s3118_s27 + $0x8] sm:$0xff] }
 0x2c8   : > { %v1691_v37 = vpack.c.bf16 %v1684_v35, %v1683_v34 }
 0x2cf   : > { %1299 = vmatmul.bf16.vlgmr.msra.gmra.mxu3 %v1222_v27 }
 0x2d0   : > { %1414 = vmatmul.bf16.vlgmr.msra.gmra.mxu0 %v2963_v39  ;;  %1528 = vmatmul.bf16.vlgmr.msra.gmra.mxu2 %v2947_v30  ;;  %v2414_v30 = vld [vmem:[%s3234_s6 + $0x208] sm:$0xff] }
 0x2d1   : > { %2435 = vmatpush.bf16.msrb.mxu1 %v2414_v30  ;;  %1640 = vmatpush.bf16.msrb.mxu0 %v2414_v30 }
 0x2d5   : > { %2436 = vmatpush.bf16.msrb.mxu1 %v2413_v60  ;;  %1641 = vmatpush.bf16.msrb.mxu0 %v2413_v60 }
 0x2d7   : > { %1190 = vmatmul.bf16.gmra.mxu1 %v1109_v8  ;;  %v1224_v8 = vpack.c.bf16 %v878_v18, %v3011_v47 }
 0x2df   : > { %1304 = vmatmul.bf16.gmra.mxu3 %v1223_v5 }
 0x2e0   : > { %1419 = vmatmul.bf16.gmra.mxu0 %v3016_v63  ;;  %1533 = vmatmul.bf16.gmra.mxu2 %v2997_v56 }
 0x2e7   : > { %1195 = vmatmul.bf16.gmra.mxu1 %v1110_v11 }
 0x2ef   : > { %1309 = vmatmul.bf16.gmra.mxu3 %v1224_v8 }
 0x2f0   : > { %1424 = vmatmul.bf16.gmra.mxu0 %v672_v21  ;;  %1538 = vmatmul.bf16.gmra.mxu2 %v3041_v15  ;;  %v1690_v15 = vld [vmem:[%s3118_s27 + $0x38] sm:$0xff] }
 0x2f1   : > { %v1694_v13 = vpack.c.bf16 %v1690_v15, %v1689_v7 }
 0x2f7   : > { %1200 = vmatmul.bf16.gmra.mxu1 %v1111_v12  ;;  %v1686_v12 = vld [vmem:[%s3118_s27 + $0x18] sm:$0xff] }
 0x2f8   : > { %v1692_v10 = vpack.c.bf16 %v1686_v12, %v1685_v16 }
 0x2ff   : > { %1314 = vmatmul.bf16.gmra.mxu3 %v1225_v33 }
 0x300   : > { %1429 = vmatmul.bf16.gmra.mxu0 %v1340_v9  ;;  %1543 = vmatmul.bf16.gmra.mxu2 %v1454_v14 }
 0x304   : > { %v775_v11 = vpop.f32.mrf.mxu1 }
 0x307   : > { %1647 = vmatmul.bf16.vlgmr.msrb.gmra.mxu1 %v3020_v0 }
 0x30c   : > { %v777_v39 = vpop.f32.mrf.mxu1 }
 0x30d   : > { %v958_v36 = vpop.f32.mrf.mxu0 }
 0x30f   : > { %1772 = vmatmul.bf16.vlgmr.msrb.gmra.mxu3 %v1692_v10 }
 0x310   : > { %1642 = vmatmul.bf16.vlgmr.msrb.gmra.mxu0 %v2967_v40  ;;  %1767 = vmatmul.bf16.vlgmr.msrb.gmra.mxu2 %v1691_v37 }
 0x312   : > { %v852_v41 = vpop.f32.mrf.mxu3 }
 0x313   : > { %v853_v42 = vadd.f32 %v852_v41, %v775_v11  ;;  %v1072_v43 = vpop.f32.mrf.mxu2 }
 0x314   : > { %v780_v49 = vpop.f32.mrf.mxu1 }
 0x315   : > { %v960_v44 = vpop.f32.mrf.mxu0  ;;  %v978_v50 = vadd.f32 %v958_v36, %v853_v42 }
 0x317   : > { %v3126_v52 = vadd.f32 %v1072_v43, %v978_v50  ;;  %1652 = vmatmul.bf16.gmra.mxu1 %v3049_v22 }
 0x31a   : > { %v854_v56 = vpop.f32.mrf.mxu3 }
 0x31b   : > { %v855_v58 = vadd.f32 %v854_v56, %v777_v39  ;;  %v1074_v59 = vpop.f32.mrf.mxu2 }
 0x31c   : > { %v782_v45 = vpop.f32.mrf.mxu1 }
 0x31d   : > { %v963_v40 = vpop.f32.mrf.mxu0  ;;  %v979_v46 = vadd.f32 %v960_v44, %v855_v58 }
 0x31f   : > { %v3131_v47 = vadd.f32 %v1074_v59, %v979_v46  ;;  %1777 = vmatmul.bf16.gmra.mxu3 %v1693_v61 }
 0x322   : > { %v857_v48 = vpop.f32.mrf.mxu3 }
 0x323   : > { %v858_v63 = vadd.f32 %v857_v48, %v780_v49  ;;  %v1077_v0 = vpop.f32.mrf.mxu2 }
 0x324   : > { %v785_v54 = vpop.f32.mrf.mxu1 }
 0x325   : > { %v965_v2 = vpop.f32.mrf.mxu0  ;;  %v980_v57 = vadd.f32 %v963_v40, %v858_v63 }
 0x327   : > { %v3133_v6 = vadd.f32 %v1077_v0, %v980_v57  ;;  %1657 = vmatmul.bf16.gmra.mxu1 %v1568_v4 }
 0x32a   : > { %v859_v17 = vpop.f32.mrf.mxu3 }
 0x32b   : > { %v860_v18 = vadd.f32 %v859_v17, %v782_v45  ;;  %v1079_v20 = vpop.f32.mrf.mxu2 }
 0x32c   : > { %v787_v22 = vpop.f32.mrf.mxu1 }
 0x32d   : > { %v968_v21 = vpop.f32.mrf.mxu0  ;;  %v981_v23 = vadd.f32 %v965_v2, %v860_v18 }
 0x32f   : > { %v3137_v24 = vadd.f32 %v1079_v20, %v981_v23  ;;  %1782 = vmatmul.bf16.gmra.mxu3 %v1694_v13 }
 0x332   : > { %v862_v25 = vpop.f32.mrf.mxu3 }
 0x333   : > { %v863_v38 = vadd.f32 %v862_v25, %v785_v54  ;;  %v1082_v26 = vpop.f32.mrf.mxu2 }
 0x334   : > { %v790_v28 = vpop.f32.mrf.mxu1 }
 0x335   : > { %v970_v27 = vpop.f32.mrf.mxu0  ;;  %v982_v29 = vadd.f32 %v968_v21, %v863_v38 }
 0x337   : > { %v3139_v1 = vadd.f32 %v1082_v26, %v982_v29 }
 0x33a   : > { %v864_v51 = vpop.f32.mrf.mxu3 }
 0x33b   : > { %v865_v5 = vadd.f32 %v864_v51, %v787_v22  ;;  %v1084_v19 = vpop.f32.mrf.mxu2 }
 0x33c   : > { %v792_v3 = vpop.f32.mrf.mxu1 }
 0x33d   : > { %v973_v30 = vpop.f32.mrf.mxu0  ;;  %v983_v60 = vadd.f32 %v970_v27, %v865_v5 }
 0x33f   : > { %v3141_v8 = vadd.f32 %v1084_v19, %v983_v60  ;;  %v3174_v60 = vld [vmem:[%s3235_s7] ss:$0 sm:$0xff] }
 0x342   : > { %v867_v31 = vpop.f32.mrf.mxu3 }
 0x343   : > { %v868_v32 = vadd.f32 %v867_v31, %v790_v28  ;;  %v1087_v33 = vpop.f32.mrf.mxu2 }
 0x344   : > { %v1186_v14 = vpop.f32.mrf.mxu1 }
 0x345   : > { %v975_v9 = vpop.f32.mrf.mxu0  ;;  %v984_v11 = vadd.f32 %v973_v30, %v868_v32  ;;  %v1206_v17 = vadd.f32 %v1186_v14, %v3126_v52 }
 0x347   : > { %v3143_v16 = vadd.f32 %v1087_v33, %v984_v11  ;;  %v3180_v33 = vld [vmem:[%s3237_s9] ss:$0 sm:$0xff] }
 0x34a   : > { %v869_v12 = vpop.f32.mrf.mxu3 }
 0x34b   : > { %v870_v34 = vadd.f32 %v869_v12, %v792_v3  ;;  %v1089_v35 = vpop.f32.mrf.mxu2 }
 0x34c   : > { %v1188_v36 = vpop.f32.mrf.mxu1 }
 0x34d   : > { %v1415_v10 = vpop.f32.mrf.mxu0  ;;  %v985_v37 = vadd.f32 %v975_v9, %v870_v34  ;;  %v1207_v27 = vadd.f32 %v1188_v36, %v3131_v47 }
 0x34f   : > { %v3145_v39 = vadd.f32 %v1089_v35, %v985_v37 }
 0x352   : > { %v1300_v41 = vpop.f32.mrf.mxu3 }
 0x353   : > { %v1529_v42 = vpop.f32.mrf.mxu2  ;;  %v1320_v21 = vadd.f32 %v1300_v41, %v1206_v17 }
 0x354   : > { %v1191_v44 = vpop.f32.mrf.mxu1 }
 0x355   : > { %v1417_v43 = vpop.f32.mrf.mxu0  ;;  %v1208_v15 = vadd.f32 %v1191_v44, %v3133_v6  ;;  %v1435_v38 = vadd.f32 %v1415_v10, %v1320_v21 }
 0x357   : > { %v1549_v51 = vadd.f32 %v1529_v42, %v1435_v38 }
 0x35a   : > { %v1302_v49 = vpop.f32.mrf.mxu3 }
 0x35b   : > { %v1531_v50 = vpop.f32.mrf.mxu2  ;;  %v1321_v5 = vadd.f32 %v1302_v49, %v1207_v27 }
 0x35c   : > { %v1193_v55 = vpop.f32.mrf.mxu1 }
 0x35d   : > { %v1420_v53 = vpop.f32.mrf.mxu0  ;;  %v1209_v26 = vadd.f32 %v1193_v55, %v3137_v24  ;;  %v1436_v47 = vadd.f32 %v1417_v43, %v1321_v5 }
 0x35f   : > { %v1550_v36 = vadd.f32 %v1531_v50, %v1436_v47 }
 0x362   : > { %v1305_v56 = vpop.f32.mrf.mxu3 }
 0x363   : > { %v1534_v58 = vpop.f32.mrf.mxu2  ;;  %v1322_v20 = vadd.f32 %v1305_v56, %v1208_v15 }
 0x364   : > { %v1196_v61 = vpop.f32.mrf.mxu1 }
 0x365   : > { %v1422_v59 = vpop.f32.mrf.mxu0  ;;  %v1437_v25 = vadd.f32 %v1420_v53, %v1322_v20  ;;  %v1210_v32 = vadd.f32 %v1196_v61, %v3139_v1 }
 0x367   : > { %v1551_v6 = vadd.f32 %v1534_v58, %v1437_v25 }
 0x36a   : > { %v1307_v40 = vpop.f32.mrf.mxu3 }
 0x36b   : > { %v1536_v45 = vpop.f32.mrf.mxu2  ;;  %v1323_v29 = vadd.f32 %v1307_v40, %v1209_v26 }
 0x36c   : > { %v1198_v48 = vpop.f32.mrf.mxu1 }
 0x36d   : > { %v1425_v46 = vpop.f32.mrf.mxu0  ;;  %v1438_v31 = vadd.f32 %v1422_v59, %v1323_v29  ;;  %v1211_v50 = vadd.f32 %v1198_v48, %v3141_v8 }
 0x36f   : > { %v1552_v12 = vadd.f32 %v1536_v45, %v1438_v31 }
 0x372   : > { %v1310_v62 = vpop.f32.mrf.mxu3 }
 0x373   : > { %v1539_v63 = vpop.f32.mrf.mxu2  ;;  %v1324_v34 = vadd.f32 %v1310_v62, %v1210_v32 }
 0x374   : > { %v3149_v2 = vpop.f32.mrf.mxu1 }
 0x375   : > { %v3147_v0 = vpop.f32.mrf.mxu0  ;;  %v1439_v53 = vadd.f32 %v1425_v46, %v1324_v34  ;;  %v1212_v8 = vadd.f32 %v3149_v2, %v3143_v16 }
 0x377   : > { %v1553_v59 = vadd.f32 %v1539_v63, %v1439_v53 }
 0x37a   : > { %v1312_v54 = vpop.f32.mrf.mxu3 }
 0x37b   : > { %v3151_v57 = vpop.f32.mrf.mxu2  ;;  %v1325_v61 = vadd.f32 %v1312_v54, %v1211_v50 }
 0x37c   : > { %v3155_v7 = vpop.f32.mrf.mxu1 }
 0x37d   : > { %v3153_v4 = vpop.f32.mrf.mxu0  ;;  %v1440_v21 = vadd.f32 %v3147_v0, %v1325_v61 }
 0x37f   : > { %v1554_v54 = vadd.f32 %v3151_v57, %v1440_v21 }
 0x382   : > { %v3159_v18 = vpop.f32.mrf.mxu3 }
 0x383   : > { %v3161_v13 = vpop.f32.mrf.mxu2 }
 0x384   : > { %v1648_v23 = vpop.f32.mrf.mxu1 }
 0x385   : > { %v3163_v22 = vpop.f32.mrf.mxu0  ;;  %v1665_v3 = vadd.f32 %v1648_v23, %v1551_v6  ;;  %v1326_v23 = vadd.f32 %v3159_v18, %v1212_v8  ;;  %v1213_v6 = vadd.f32 %v3155_v7, %v3145_v39 }
 0x387   : > { %v1677_v9 = vadd.f32 %v3174_v60, %v1665_v3  ;;  %v1441_v27 = vadd.f32 %v3153_v4, %v1326_v23 }
 0x389   : > { %v1555_v57 = vadd.f32 %v3161_v13, %v1441_v27 }
 0x38a   : > { %v3167_v28 = vpop.f32.mrf.mxu3 }
 0x38b   : > { %v3169_v52 = vpop.f32.mrf.mxu2  ;;  %v1327_v18 = vadd.f32 %v3167_v28, %v1213_v6 }
 0x38c   : > { %v1650_v30 = vpop.f32.mrf.mxu1 }
 0x38d   : > { %v1643_v19 = vpop.f32.mrf.mxu0  ;;  %v1666_v43 = vadd.f32 %v1650_v30, %v1552_v12  ;;  %v1442_v4 = vadd.f32 %v3163_v22, %v1327_v18 }
 0x38e   : > { %v1663_v24 = vadd.f32 %v1643_v19, %v1549_v51 }
 0x38f   : > { %v1678_v55 = vadd.f32 %v3174_v60, %v1666_v43  ;;  %v1556_v7 = vadd.f32 %v3169_v52, %v1442_v4 }
 0x390   : > { %v1675_v14 = vadd.f32 %v3174_v60, %v1663_v24 }
 0x392   : > { %v1773_v11 = vpop.f32.mrf.mxu3 }
 0x393   : > { %v1768_v35 = vpop.f32.mrf.mxu2  ;;  %v1790_v10 = vadd.f32 %v1773_v11, %v1677_v9 }
 0x394   : > { %v1788_v1 = vadd.f32 %v1768_v35, %v1675_v14  ;;  %v1653_v41 = vpop.f32.mrf.mxu1 }
 0x395   : > { %v1645_v37 = vpop.f32.mrf.mxu0  ;;  %v1802_v42 = vadd.f32 %v3180_v33, %v1790_v10  ;;  %v1667_v46 = vadd.f32 %v1653_v41, %v1553_v59 }
 0x396   : > { %v1800_v44 = vadd.f32 %v3180_v33, %v1788_v1  ;;  %v1664_v49 = vadd.f32 %v1645_v37, %v1550_v36 }
 0x397   : > { %1810 = vst [vmem:[%s3188_s15 + $0x10] sm:$0xff] %v1802_v42  ;;  %v1679_v48 = vadd.f32 %v3174_v60, %v1667_v46 }
 0x398   : > { %1808 = vst [vmem:[%s3188_s15] sm:$0xff] %v1800_v44  ;;  %v1676_v56 = vadd.f32 %v3174_v60, %v1664_v49 }
 0x39a   : > { %v1775_v58 = vpop.f32.mrf.mxu3 }
 0x39b   : > { %v1770_v40 = vpop.f32.mrf.mxu2  ;;  %v1791_v45 = vadd.f32 %v1775_v58, %v1678_v55 }
 0x39c   : > { %v1789_v62 = vadd.f32 %v1770_v40, %v1676_v56  ;;  %v1655_v20 = vpop.f32.mrf.mxu1 }
 0x39d   : > { %v1803_v15 = vadd.f32 %v3180_v33, %v1791_v45  ;;  %v1668_v26 = vadd.f32 %v1655_v20, %v1554_v54 }
 0x39e   : > { %v1801_v17 = vadd.f32 %v3180_v33, %v1789_v62 }
 0x39f   : > { %1811 = vst [vmem:[%s3188_s15 + $0x18] sm:$0xff] %v1803_v15  ;;  %v1680_v16 = vadd.f32 %v3174_v60, %v1668_v26 }
 0x3a0   : > { %1809 = vst [vmem:[%s3188_s15 + $0x8] sm:$0xff] %v1801_v17 }
 0x3a2   : > { %v1778_v63 = vpop.f32.mrf.mxu3 }
 0x3a3   : > { %v1792_v25 = vadd.f32 %v1778_v63, %v1679_v48 }
 0x3a4   : > { %v1658_v0 = vpop.f32.mrf.mxu1 }
 0x3a5   : > { %v1804_v38 = vadd.f32 %v3180_v33, %v1792_v25  ;;  %v1669_v5 = vadd.f32 %v1658_v0, %v1555_v57 }
 0x3a7   : > { %1812 = vst [vmem:[%s3188_s15 + $0x20] sm:$0xff] %v1804_v38  ;;  %v1681_v19 = vadd.f32 %v3174_v60, %v1669_v5 }
 0x3aa   : > { %v1780_v2 = vpop.f32.mrf.mxu3 }
 0x3ab   : > { %v1793_v29 = vadd.f32 %v1780_v2, %v1680_v16 }
 0x3ac   : > { %v1660_v39 = vpop.f32.mrf.mxu1 }
 0x3ad   : > { %v1805_v51 = vadd.f32 %v3180_v33, %v1793_v29  ;;  %v1670_v13 = vadd.f32 %v1660_v39, %v1556_v7 }
 0x3af   : > { %1813 = vst [vmem:[%s3188_s15 + $0x28] sm:$0xff] %v1805_v51  ;;  %v1682_v28 = vadd.f32 %v3174_v60, %v1670_v13 }
 0x3b2   : > { %v1783_v30 = vpop.f32.mrf.mxu3 }
 0x3b3   : > { %v1794_v3 = vadd.f32 %v1783_v30, %v1681_v19 }
 0x3b5   : > { %v1806_v24 = vadd.f32 %v3180_v33, %v1794_v3 }
 0x3b7   : > { %1814 = vst [vmem:[%s3188_s15 + $0x30] sm:$0xff] %v1806_v24 }
 0x3ba   : > { %v1785_v31 = vpop.f32.mrf.mxu3 }
 0x3bb   : > { %v1795_v47 = vadd.f32 %v1785_v31, %v1682_v28 }
 0x3bd   : > { %v1807_v32 = vadd.f32 %v3180_v33, %v1795_v47 }
 0x3bf   : > { %1815 = vst [vmem:[%s3188_s15 + $0x38] sm:$0xff] %v1807_v32 }
 0x3c0 PF: > { %s20_s13 = sadd.s32 1, %s2498_s13  }
 0x3c1   : > { %p17_p4 = scmp.ge.s32.totalorder %s20_s13, 4  }
 0x3c3   :  { %19 = sbr.rel (!%p17_p4) target bundleno = 1 (0x1), region = 103 }

// kernel: res_block_with_attention.3
= control target key start
LH: loop header
LB: loop body
LE: loop exit
PB: predicated region body
PF: predicated region fallthrough
CT: control target
= control target key end

     0   :  { %15 = vsyncpa [#allocation4], 0  ;;  %s2462_s13 = smov 0   ;;  %s2840_s0 = inlined_call_operand.vmem [shape: f32[2,64,128], index: 0, kind: input, shape index: {}]   ;;  %s2841_s1 = inlined_call_operand.vmem [shape: f32[2,1,128], index: 1, kind: input, shape index: {}]   ;;  %s2842_s2 = inlined_call_operand.vmem [shape: f32[128,32], index: 2, kind: input, shape index: {}]   ;;  %s2843_s3 = inlined_call_operand.vmem [shape: f32[32,128], index: 3, kind: input, shape index: {}]   ;;  %s2844_s4 = inlined_call_operand.vmem [shape: f32[1,128], index: 4, kind: input, shape index: {}]   ;;  %s2845_s5 = inlined_call_operand.vmem [shape: f32[1,128], index: 5, kind: input, shape index: {}, may-alias: {5,7,9}]   ;;  %s2846_s6 = inlined_call_operand.hbm [shape: bf16[9,128,128], index: 6, kind: input, shape index: {}]   ;;  %s2847_s7 = inlined_call_operand.vmem [shape: f32[1,128], index: 7, kind: input, shape index: {}, may-alias: {5,7,9}]   ;;  %s2848_s8 = inlined_call_operand.vmem [shape: bf16[128,128], index: 8, kind: input, shape index: {}]   ;;  %s2849_s9 = inlined_call_operand.vmem [shape: f32[1,128], index: 9, kind: input, shape index: {}, may-alias: {5,7,9}]   ;;  %s2850_s10 = inlined_call_operand.vmem [shape: f32[2,64,128], index: 10, kind: output, shape index: {}]  }
   0x1 LB: > { %s295_s16 = sshll.u32 %s2846_s6, 4  ;;  %s1873_s17 = sadd.s32 4294967295, %s2401_s13   ;;  %s2401_s13 = sphi %s2462_s13, %s21_s13   ;;  %s296_s16 = int_to_ptr.hbm [resolvable:$true] %s295_s16 }
   0x2   : > { %p1875_p0 = scmp.ge.s32.totalorder %s2401_s13, 1  ;;  %p272_p1 = scmp.lt.s32.totalorder %s2401_s13, 3 }
   0x3   : > { %p2306_p2 = scmp.eq.s32.totalorder %s1873_s17, 0  ;;  %s2403_s18 = smov [#allocation3]  }
   0x4   : > { %p273_p3 = pnand %p1875_p0, %p272_p1  ;;  %s297_s19 = sshll.u32 %s2403_s18, 4  ;;  %s298_s19 = int_to_ptr.vmem [resolvable:$true] %s297_s19 }
   0x5   : > { %s2404_s20 = smov 64   ;;  %s2405_s21 = smov 4  }
   0x6   : > { %p2302_p4 = pneg %p273_p3  ;;  %336 = sbr.rel (%p273_p3) target bundleno = 952 (0x3b8), region = 60 }
   0x8   : > { %p2303_p5 = pnand %p2306_p2, %p2302_p4 }
   0xa   : > { %2305 = dma.hbm_to_vmem [thread:$0]  (!%p2303_p5), %s296_s16, 9216, %s298_s19, [#allocation4], %s2404_s20, %s2404_s20, %s2405_s21  }
   0xb   : > { %2396 = dma.done.wait (%p2306_p2), [#allocation4], 9216  }
   0xc   : > { %2398 = vsyncadd (%p2306_p2), [#allocation4], 4294958080  ;;  %p378_p6 = scmp.lt.s32.totalorder %s1873_s17, 1  ;;  %v414_v0 = vld [vmem:[%s2842_s2 + $0x78] sm:$0xff]  ;;  %v413_v1 = vld [vmem:[%s2842_s2 + $0x70] sm:$0xff]  ;;  %vm455_vm0 = vcmask 261120  }
   0xd   : > { %434 = vmatpush.msra.mxu0 %v414_v0  ;;  %509 = vmatpush.msra.mxu2 %v414_v0  ;;  %v412_v2 = vld [vmem:[%s2842_s2 + $0x68] sm:$0xff]  ;;  %v411_v3 = vld [vmem:[%s2842_s2 + $0x60] sm:$0xff]  ;;  %v410_v6 = vld [vmem:[%s2842_s2 + $0x58] sm:$0xff] }
   0xe   : > { %s2852_s17 = smov (!%p378_p6, %s1873_s17), 1  ;;  %v409_v9 = vld [vmem:[%s2842_s2 + $0x50] sm:$0xff]  ;;  %v418_v12 = vld [vmem:[%s2843_s3 + $0x18] sm:$0xff]  ;;  %v408_v15 = vld [vmem:[%s2842_s2 + $0x48] sm:$0xff] }
   0xf   : > { %s2208_s22 = sshll.u32 %s2852_s17, 6  ;;  %435 = vmatpush.msra.mxu0 %v413_v1  ;;  %510 = vmatpush.msra.mxu2 %v413_v1  ;;  %v417_v13 = vld [vmem:[%s2843_s3 + $0x10] sm:$0xff]  ;;  %v407_v18 = vld [vmem:[%s2842_s2 + $0x40] sm:$0xff]  ;;  %v406_v21 = vld [vmem:[%s2842_s2 + $0x38] sm:$0xff]  ;;  %s385_s18 = scalar_lea.vmem %s2841_s1, %s2852_s17 }
  0x10   : > { %s2490_s11 = scalar_lea.vmem %s2840_s0, %s2208_s22  ;;  %471 = vmatpush.msra.mxu1 %v418_v12  ;;  %v405_v24 = vld [vmem:[%s2842_s2 + $0x30] sm:$0xff]  ;;  %v404_v26 = vld [vmem:[%s2842_s2 + $0x28] sm:$0xff]  ;;  %v403_v28 = vld [vmem:[%s2842_s2 + $0x20] sm:$0xff]  ;;  %s390_s27 = scalar_lea.vmem %s2850_s10, %s2208_s22 }
  0x11   : > { %436 = vmatpush.msra.mxu0 %v412_v2  ;;  %v2496_v4 = vld [vmem:[%s2490_s11] sm:$0xff]  ;;  %v2499_v5 = vld [vmem:[%s2490_s11 + $0x8] sm:$0xff]  ;;  %511 = vmatpush.msra.mxu2 %v412_v2  ;;  %v2505_v7 = vld [vmem:[%s2490_s11 + $0x10] sm:$0xff] }
  0x12   : > { %v421_v8 = vadd.f32 %v2499_v5, %v2496_v4  ;;  %v2513_v10 = vld [vmem:[%s2490_s11 + $0x18] sm:$0xff]  ;;  %v2523_v14 = vld [vmem:[%s2490_s11 + $0x20] sm:$0xff]  ;;  %v2530_v17 = vld [vmem:[%s2490_s11 + $0x28] sm:$0xff]  ;;  %472 = vmatpush.msra.mxu1 %v417_v13 }
  0x13   : > { %437 = vmatpush.msra.mxu0 %v411_v3  ;;  %512 = vmatpush.msra.mxu2 %v411_v3  ;;  %v2537_v20 = vld [vmem:[%s2490_s11 + $0x30] sm:$0xff]  ;;  %v2544_v23 = vld [vmem:[%s2490_s11 + $0x38] sm:$0xff]  ;;  %v400_v34 = vld [vmem:[%s2842_s2 + $0x8] sm:$0xff] }
  0x14   : > { %v422_v11 = vadd.f32 %v421_v8, %v2505_v7  ;;  %v402_v30 = vld [vmem:[%s2842_s2 + $0x18] sm:$0xff]  ;;  %v401_v32 = vld [vmem:[%s2842_s2 + $0x10] sm:$0xff]  ;;  %v399_v36 = vld [vmem:[%s2842_s2] sm:$0xff] }
  0x15   : > { %438 = vmatpush.msra.mxu0 %v410_v6  ;;  %513 = vmatpush.msra.mxu2 %v410_v6  ;;  %v416_v39 = vld [vmem:[%s2843_s3 + $0x8] sm:$0xff]  ;;  %v415_v40 = vld [vmem:[%s2843_s3] sm:$0xff] }
  0x16   : > { %v423_v16 = vadd.f32 %v422_v11, %v2513_v10  ;;  %473 = vmatpush.msra.mxu1 %v416_v39 }
  0x17   : > { %439 = vmatpush.msra.mxu0 %v409_v9  ;;  %514 = vmatpush.msra.mxu2 %v409_v9 }
  0x18   : > { %v424_v19 = vadd.f32 %v423_v16, %v2523_v14  ;;  %474 = vmatpush.msra.mxu1 %v415_v40 }
  0x19   : > { %440 = vmatpush.msra.mxu0 %v408_v15  ;;  %515 = vmatpush.msra.mxu2 %v408_v15 }
  0x1a   : > { %v425_v22 = vadd.f32 %v424_v19, %v2530_v17 }
  0x1b   : > { %441 = vmatpush.msra.mxu0 %v407_v18  ;;  %516 = vmatpush.msra.mxu2 %v407_v18 }
  0x1c   : > { %v426_v25 = vadd.f32 %v425_v22, %v2537_v20  ;;  %v2233_v22 = vld [vmem:[#allocation3 + $0xb8] sm:$0xff] }
  0x1d   : > { %442 = vmatpush.msra.mxu0 %v406_v21  ;;  %517 = vmatpush.msra.mxu2 %v406_v21  ;;  %v2224_v21 = vld [vmem:[#allocation3 + $0x70] sm:$0xff] }
  0x1e   : > { %v427_v27 = vadd.f32 %v426_v25, %v2544_v23  ;;  %v2232_v25 = vld [vmem:[#allocation3 + $0xb0] sm:$0xff] }
  0x1f   : > { %443 = vmatpush.msra.mxu0 %v405_v24  ;;  %518 = vmatpush.msra.mxu2 %v405_v24  ;;  %v2223_v24 = vld [vmem:[#allocation3 + $0x68] sm:$0xff] }
  0x20   : > { %v428_v29 = vrot.slane %v427_v27, 4 }
  0x21   : > { %444 = vmatpush.msra.mxu0 %v404_v26  ;;  %519 = vmatpush.msra.mxu2 %v404_v26  ;;  %v2240_v26 = vld [vmem:[#allocation3 + $0xf0] sm:$0xff] }
  0x22   : > { %v429_v31 = vadd.f32 %v428_v29, %v427_v27  ;;  %v2222_v27 = vld [vmem:[#allocation3 + $0x60] sm:$0xff]  ;;  %v2239_v29 = vld [vmem:[#allocation3 + $0xe8] sm:$0xff] }
  0x23   : > { %445 = vmatpush.msra.mxu0 %v403_v28  ;;  %520 = vmatpush.msra.mxu2 %v403_v28  ;;  %v2231_v28 = vld [vmem:[#allocation3 + $0xa8] sm:$0xff] }
  0x24   : > { %v430_v33 = vrot.slane %v429_v31, 2 }
  0x25   : > { %446 = vmatpush.msra.mxu0 %v402_v30  ;;  %521 = vmatpush.msra.mxu2 %v402_v30  ;;  %v2221_v30 = vld [vmem:[#allocation3 + $0x58] sm:$0xff] }
  0x26   : > { %v431_v35 = vadd.f32 %v430_v33, %v429_v31  ;;  %v2230_v31 = vld [vmem:[#allocation3 + $0xa0] sm:$0xff]  ;;  %v2220_v33 = vld [vmem:[#allocation3 + $0x50] sm:$0xff] }
  0x27   : > { %447 = vmatpush.msra.mxu0 %v401_v32  ;;  %522 = vmatpush.msra.mxu2 %v401_v32  ;;  %v2238_v32 = vld [vmem:[#allocation3 + $0xe0] sm:$0xff] }
  0x28   : > { %v432_v37 = vrot.slane %v431_v35, 1 }
  0x29   : > { %448 = vmatpush.msra.mxu0 %v400_v34  ;;  %523 = vmatpush.msra.mxu2 %v400_v34  ;;  %v2406_v34 = vmov 0.0  }
  0x2a   : > { %v433_v38 = vadd.f32 %v432_v37, %v431_v35  ;;  %643 = vst [vmem:[#allocation2] sm:$0xff] %v2406_v34  ;;  %v2229_v35 = vld [vmem:[#allocation3 + $0x98] sm:$0xff]  ;;  %v2219_v37 = vld [vmem:[#allocation3 + $0x48] sm:$0xff] }
  0x2b   : > { %449 = vmatpush.msra.mxu0 %v399_v36  ;;  %524 = vmatpush.msra.mxu2 %v399_v36  ;;  %v2237_v36 = vld [vmem:[#allocation3 + $0xd8] sm:$0xff]  ;;  %644 = vst [vmem:[#allocation2 + $0x8] sm:$0x3] %v2406_v34 }
  0x2c   : > { %450 = vmatmul.f32.vlgmr.msra.gmra.mxu0 %v433_v38  ;;  %645 = vst [vmem:[#allocation2 + $0x10] sm:$0xff] %v2406_v34 }
  0x2d   : > { %556 = vmatpush.msrb.mxu0 %v418_v12  ;;  %646 = vst [vmem:[#allocation2 + $0x18] sm:$0x3] %v2406_v34 }
  0x2e   : > { %647 = vst [vmem:[#allocation2 + $0x20] sm:$0xff] %v2406_v34 }
  0x2f   : > { %557 = vmatpush.msrb.mxu0 %v417_v13  ;;  %648 = vst [vmem:[#allocation2 + $0x28] sm:$0x3] %v2406_v34 }
  0x30   : > { %649 = vst [vmem:[#allocation2 + $0x30] sm:$0xff] %v2406_v34 }
  0x31   : > { %558 = vmatpush.msrb.mxu0 %v416_v39  ;;  %650 = vst [vmem:[#allocation2 + $0x38] sm:$0x3] %v2406_v34 }
  0x32   : > { %651 = vst [vmem:[#allocation2 + $0x40] sm:$0xff] %v2406_v34 }
  0x33   : > { %559 = vmatpush.msrb.mxu0 %v415_v40  ;;  %v2320_v40 = vld [vmem:[%s2844_s4] ss:$0 sm:$0xff]  ;;  %652 = vst [vmem:[#allocation2 + $0x48] sm:$0x3] %v2406_v34 }
  0x34   : > { %653 = vst [vmem:[#allocation2 + $0x50] sm:$0xff] %v2406_v34 }
  0x35   : > { %960 = vmatpush.bf16.msra.mxu0 %v2233_v22  ;;  %654 = vst [vmem:[#allocation2 + $0x58] sm:$0x3] %v2406_v34 }
  0x36   : > { %655 = vst [vmem:[#allocation2 + $0x60] sm:$0xff] %v2406_v34 }
  0x37   : > { %656 = vst [vmem:[#allocation2 + $0x68] sm:$0x3] %v2406_v34 }
  0x38   : > { %657 = vst [vmem:[#allocation2 + $0x70] sm:$0xff] %v2406_v34 }
  0x39   : > { %961 = vmatpush.bf16.msra.mxu0 %v2232_v25  ;;  %658 = vst [vmem:[#allocation2 + $0x78] sm:$0x3] %v2406_v34 }
  0x3a   : > { %659 = vst [vmem:[#allocation2 + $0x80] sm:$0xff] %v2406_v34 }
  0x3b   : > { %660 = vst [vmem:[#allocation2 + $0x88] sm:$0x3] %v2406_v34 }
  0x3c   : > { %661 = vst [vmem:[#allocation2 + $0x90] sm:$0xff] %v2406_v34 }
  0x3d   : > { %962 = vmatpush.bf16.msra.mxu0 %v2231_v28  ;;  %662 = vst [vmem:[#allocation2 + $0x98] sm:$0x3] %v2406_v34 }
  0x41   : > { %963 = vmatpush.bf16.msra.mxu0 %v2230_v31  ;;  %v2214_v31 = vld [vmem:[#allocation3 + $0x20] sm:$0xff] }
  0x45   : > { %964 = vmatpush.bf16.msra.mxu0 %v2229_v35 }
  0xa9   : > { %v451_v41 = vpop.f32.mrf.mxu0 }
  0xaa   : > { %v454_v42 = vmul.f32 0.015625, %v451_v41  ;;  %v2321_v41 = vld [vmem:[%s2845_s5] ss:$0 sm:$0xff] }
  0xac   : > { %1884 = vmatmul.msk.f32.vlgmr.msra.gmra.mxu1 %vm455_vm0, %v454_v42 }
 0x129   : > { %v476_v43 = vpop.f32.mrf.mxu1 }
 0x12a   : > { %v479_v44 = vperm.slane %v476_v43, 0 }
 0x12c   : > { %v2577_v45 = vsub.f32 %v2496_v4, %v479_v44  ;;  %v2580_v46 = vsub.f32 %v2499_v5, %v479_v44  ;;  %v2583_v47 = vsub.f32 %v2505_v7, %v479_v44  ;;  %v2586_v48 = vsub.f32 %v2513_v10, %v479_v44 }
 0x12d   : > { %v2593_v51 = vsub.f32 %v2523_v14, %v479_v44  ;;  %v2598_v54 = vsub.f32 %v2530_v17, %v479_v44  ;;  %v2603_v57 = vsub.f32 %v2537_v20, %v479_v44  ;;  %v2608_v60 = vsub.f32 %v2544_v23, %v479_v44  ;;  %v2225_v20 = vld [vmem:[#allocation3 + $0x78] sm:$0xff] }
 0x12e   : > { %v488_v49 = vmul.f32 %v2577_v45, %v2577_v45  ;;  %v489_v50 = vmul.f32 %v2580_v46, %v2580_v46  ;;  %v490_v52 = vmul.f32 %v2583_v47, %v2583_v47  ;;  %v491_v55 = vmul.f32 %v2586_v48, %v2586_v48  ;;  %777 = vmatpush.bf16.msrb.mxu1 %v2225_v20  ;;  %v2241_v23 = vld [vmem:[#allocation3 + $0xf8] sm:$0xff] }
 0x12f   : > { %v492_v58 = vmul.f32 %v2593_v51, %v2593_v51  ;;  %v493_v61 = vmul.f32 %v2598_v54, %v2598_v54  ;;  %v494_v63 = vmul.f32 %v2603_v57, %v2603_v57  ;;  %v495_v1 = vmul.f32 %v2608_v60, %v2608_v60  ;;  %2290 = vmatpush.bf16.msra.mxu3 %v2225_v20 }
 0x130   : > { %v496_v53 = vadd.f32 %v489_v50, %v488_v49  ;;  %1074 = vmatpush.bf16.msrb.mxu2 %v2241_v23  ;;  %v2228_v50 = vld [vmem:[#allocation3 + $0x90] sm:$0xff] }
 0x131   : > { %965 = vmatpush.bf16.msra.mxu0 %v2228_v50  ;;  %v2245_v50 = vld [vmem:[#allocation3 + $0x118] sm:$0xff] }
 0x132   : > { %v497_v56 = vadd.f32 %v496_v53, %v490_v52  ;;  %778 = vmatpush.bf16.msrb.mxu1 %v2224_v21  ;;  %v2236_v52 = vld [vmem:[#allocation3 + $0xd0] sm:$0xff]  ;;  %v2218_v53 = vld [vmem:[#allocation3 + $0x40] sm:$0xff] }
 0x133   : > { %2291 = vmatpush.bf16.msra.mxu3 %v2224_v21 }
 0x134   : > { %v498_v59 = vadd.f32 %v497_v56, %v491_v55  ;;  %1075 = vmatpush.bf16.msrb.mxu2 %v2240_v26  ;;  %v2248_v26 = vld [vmem:[#allocation3 + $0x130] sm:$0xff] }
 0x136   : > { %v499_v62 = vadd.f32 %v498_v59, %v492_v58  ;;  %779 = vmatpush.bf16.msrb.mxu1 %v2223_v24 }
 0x137   : > { %2292 = vmatpush.bf16.msra.mxu3 %v2223_v24 }
 0x138   : > { %v500_v0 = vadd.f32 %v499_v62, %v493_v61  ;;  %1076 = vmatpush.bf16.msrb.mxu2 %v2239_v29 }
 0x13a   : > { %v501_v2 = vadd.f32 %v500_v0, %v494_v63  ;;  %780 = vmatpush.bf16.msrb.mxu1 %v2222_v27 }
 0x13b   : > { %2293 = vmatpush.bf16.msra.mxu3 %v2222_v27  ;;  %v2215_v27 = vld [vmem:[#allocation3 + $0x28] sm:$0xff] }
 0x13c   : > { %v502_v3 = vadd.f32 %v501_v2, %v495_v1  ;;  %1077 = vmatpush.bf16.msrb.mxu2 %v2238_v32  ;;  %v2217_v2 = vld [vmem:[#allocation3 + $0x38] sm:$0xff] }
 0x13e   : > { %v503_v4 = vrot.slane %v502_v3, 4  ;;  %781 = vmatpush.bf16.msrb.mxu1 %v2221_v30 }
 0x13f   : > { %2294 = vmatpush.bf16.msra.mxu3 %v2221_v30  ;;  %v2247_v30 = vld [vmem:[#allocation3 + $0x128] sm:$0xff] }
 0x140   : > { %v504_v5 = vadd.f32 %v503_v4, %v502_v3  ;;  %1078 = vmatpush.bf16.msrb.mxu2 %v2237_v36  ;;  %v2249_v4 = vld [vmem:[#allocation3 + $0x138] sm:$0xff]  ;;  %v2246_v36 = vld [vmem:[#allocation3 + $0x120] sm:$0xff] }
 0x142   : > { %v505_v6 = vrot.slane %v504_v5, 2  ;;  %782 = vmatpush.bf16.msrb.mxu1 %v2220_v33 }
 0x143   : > { %2295 = vmatpush.bf16.msra.mxu3 %v2220_v33 }
 0x144   : > { %v506_v7 = vadd.f32 %v505_v6, %v504_v5  ;;  %1079 = vmatpush.bf16.msrb.mxu2 %v2236_v52 }
 0x146   : > { %v507_v8 = vrot.slane %v506_v7, 1  ;;  %783 = vmatpush.bf16.msrb.mxu1 %v2219_v37 }
 0x147   : > { %2296 = vmatpush.bf16.msra.mxu3 %v2219_v37 }
 0x148   : > { %v508_v9 = vadd.f32 %v507_v8, %v506_v7 }
 0x14a   : > { %525 = vmatmul.f32.vlgmr.msra.gmra.mxu2 %v508_v9  ;;  %784 = vmatpush.bf16.msrb.mxu1 %v2218_v53  ;;  %v2226_v9 = vld [vmem:[#allocation3 + $0x80] sm:$0xff] }
 0x14b   : > { %2297 = vmatpush.bf16.msra.mxu3 %v2218_v53 }
 0x14e   : > { %1188 = vmatpush.bf16.msra.mxu1 %v2249_v4 }
 0x14f   : > { %854 = vmatpush.bf16.msrb.mxu3 %v2217_v2 }
 0x152   : > { %1189 = vmatpush.bf16.msra.mxu1 %v2248_v26  ;;  %v2265_v26 = vld [vmem:[#allocation3 + $0x1b8] sm:$0xff] }
 0x156   : > { %1190 = vmatpush.bf16.msra.mxu1 %v2247_v30  ;;  %v2264_v30 = vld [vmem:[#allocation3 + $0x1b0] sm:$0xff] }
 0x15a   : > { %1191 = vmatpush.bf16.msra.mxu1 %v2246_v36 }
 0x15e   : > { %1192 = vmatpush.bf16.msra.mxu1 %v2245_v50  ;;  %v2255_v50 = vld [vmem:[#allocation3 + $0x168] sm:$0xff] }
 0x1cd   : > { %v526_v10 = vpop.f32.mrf.mxu2 }
 0x1ce   : > { %v529_v11 = vmul.f32 0.015625, %v526_v10 }
 0x1d0   : > { %v530_v12 = vadd.f32 1e-05, %v529_v11 }
 0x1d2   : > { %2323 = vrsqrt.f32 %v530_v12  ;;  %vm537_vm2 = vweird.f32 %v530_v12 }
 0x1d8   : > { %v2324_v13 = vpop.eup %2323 }
 0x1d9   : > { %v532_v14 = vmul.f32 %v2324_v13, %v530_v12  ;;  %vm538_vm1 = vweird.f32 %v2324_v13 }
 0x1da   : > { %vm539_vm3 = vmor %vm537_vm2, %vm538_vm1 }
 0x1db   : > { %v533_v15 = vmul.f32 %v2324_v13, %v532_v14 }
 0x1dd   : > { %v534_v16 = vmul.f32 0.5, %v533_v15 }
 0x1df   : > { %v535_v17 = vsub.f32 1.5, %v534_v16 }
 0x1e1   : > { %v536_v18 = vmul.f32 %v2324_v13, %v535_v17  ;;  %v2234_v17 = vld [vmem:[#allocation3 + $0xc0] sm:$0xff] }
 0x1e3   : > { %v540_v19 = vsel %vm539_vm3, %v2324_v13, %v536_v18  ;;  %v2216_v18 = vld [vmem:[#allocation3 + $0x30] sm:$0xff] }
 0x1e4   : > { %1885 = vmatmul.msk.f32.vlgmr.msrb.gmra.mxu0 %vm455_vm0, %v540_v19  ;;  %855 = vmatpush.bf16.msrb.mxu3 %v2216_v18 }
 0x1e8   : > { %856 = vmatpush.bf16.msrb.mxu3 %v2215_v27  ;;  %v2273_v27 = vld [vmem:[#allocation3 + $0x1f8] sm:$0xff] }
 0x1ec   : > { %857 = vmatpush.bf16.msrb.mxu3 %v2214_v31  ;;  %v2272_v31 = vld [vmem:[#allocation3 + $0x1f0] sm:$0xff] }
 0x261   : > { %v561_v38 = vpop.f32.mrf.mxu0 }
 0x262   : > { %v564_v39 = vperm.slane %v561_v38, 0 }
 0x264   : > { %v565_v42 = vmul.f32 %v564_v39, %v2577_v45  ;;  %v566_v43 = vmul.f32 %v564_v39, %v2580_v46  ;;  %v567_v44 = vmul.f32 %v564_v39, %v2583_v47  ;;  %v568_v49 = vmul.f32 %v564_v39, %v2586_v48  ;;  %v2227_v48 = vld [vmem:[#allocation3 + $0x88] sm:$0xff] }
 0x265   : > { %v569_v55 = vmul.f32 %v564_v39, %v2593_v51  ;;  %v570_v56 = vmul.f32 %v564_v39, %v2598_v54  ;;  %v571_v58 = vmul.f32 %v564_v39, %v2603_v57  ;;  %v572_v59 = vmul.f32 %v564_v39, %v2608_v60  ;;  %v2235_v51 = vld [vmem:[#allocation3 + $0xc8] sm:$0xff]  ;;  %966 = vmatpush.bf16.msra.mxu0 %v2227_v48  ;;  %v2213_v39 = vld [vmem:[#allocation3 + $0x18] sm:$0xff] }
 0x266   : > { %v576_v45 = vmul.f32 %v2320_v40, %v565_v42  ;;  %v577_v46 = vmul.f32 %v2320_v40, %v566_v43  ;;  %v578_v47 = vmul.f32 %v2320_v40, %v567_v44  ;;  %v579_v61 = vmul.f32 %v2320_v40, %v568_v49  ;;  %1080 = vmatpush.bf16.msrb.mxu2 %v2235_v51 }
 0x267   : > { %v580_v62 = vmul.f32 %v2320_v40, %v569_v55  ;;  %v581_v63 = vmul.f32 %v2320_v40, %v570_v56  ;;  %v582_v0 = vmul.f32 %v2320_v40, %v571_v58  ;;  %v583_v1 = vmul.f32 %v2320_v40, %v572_v59  ;;  %858 = vmatpush.bf16.msrb.mxu3 %v2213_v39  ;;  %v2212_v58 = vld [vmem:[#allocation3 + $0x10] sm:$0xff] }
 0x268   : > { %v2638_v54 = vadd.f32 %v2321_v41, %v576_v45  ;;  %v2640_v57 = vadd.f32 %v2321_v41, %v577_v46  ;;  %v2642_v60 = vadd.f32 %v2321_v41, %v578_v47  ;;  %v2644_v3 = vadd.f32 %v2321_v41, %v579_v61  ;;  %v700_v46 = vld [vmem:[#allocation2 + $0x1] sm:$0xff]  ;;  %v2244_v47 = vld [vmem:[#allocation3 + $0x110] sm:$0xff] }
 0x269   : > { %v2646_v5 = vadd.f32 %v2321_v41, %v580_v62  ;;  %v2648_v6 = vadd.f32 %v2321_v41, %v581_v63  ;;  %v2650_v7 = vadd.f32 %v2321_v41, %v582_v0  ;;  %v2652_v8 = vadd.f32 %v2321_v41, %v583_v1  ;;  %967 = vmatpush.bf16.msra.mxu0 %v2226_v9  ;;  %v2211_v62 = vld [vmem:[#allocation3 + $0x8] sm:$0xff] }
 0x26a   : > { %v595_v10 = vsub.f32 0.0, %v2638_v54  ;;  %v596_v11 = vsub.f32 0.0, %v2640_v57  ;;  %v597_v12 = vsub.f32 0.0, %v2642_v60  ;;  %v598_v13 = vsub.f32 0.0, %v2644_v3  ;;  %1081 = vmatpush.bf16.msrb.mxu2 %v2234_v17  ;;  %1193 = vmatpush.bf16.msra.mxu1 %v2244_v47  ;;  %v2259_v47 = vld [vmem:[#allocation3 + $0x188] sm:$0xff] }
 0x26b   : > { %v599_v14 = vsub.f32 0.0, %v2646_v5  ;;  %v600_v15 = vsub.f32 0.0, %v2648_v6  ;;  %v601_v16 = vsub.f32 0.0, %v2650_v7  ;;  %v602_v22 = vsub.f32 0.0, %v2652_v8  ;;  %859 = vmatpush.bf16.msrb.mxu3 %v2212_v58  ;;  %v2260_v58 = vld [vmem:[#allocation3 + $0x190] sm:$0xff] }
 0x26c   : > { %v603_v19 = vmul.f32 1.442695, %v595_v10  ;;  %v605_v20 = vmul.f32 1.442695, %v596_v11  ;;  %v607_v21 = vmul.f32 1.442695, %v597_v12 }
 0x26d   : > { %v609_v23 = vmul.f32 1.442695, %v598_v13  ;;  %v611_v24 = vmul.f32 1.442695, %v599_v14  ;;  %v613_v25 = vmul.f32 1.442695, %v600_v15  ;;  %1417 = vmatpush.bf16.msrb.mxu0 %v2265_v26 }
 0x26e   : > { %2325 = vpow2.f32 %v603_v19  ;;  %v615_v28 = vmul.f32 1.442695, %v601_v16  ;;  %v617_v29 = vmul.f32 1.442695, %v602_v22  ;;  %v2242_v15 = vld [vmem:[#allocation3 + $0x100] sm:$0xff]  ;;  %1531 = vmatpush.bf16.msra.mxu2 %v2273_v27  ;;  %v2276_v26 = vld [vmem:[#allocation3 + $0x210] sm:$0xff] }
 0x26f   : > { %2327 = vpow2.f32 %v605_v20  ;;  %860 = vmatpush.bf16.msrb.mxu3 %v2211_v62  ;;  %v2267_v62 = vld [vmem:[#allocation3 + $0x1c8] sm:$0xff]  ;;  %v2250_v27 = vld [vmem:[#allocation3 + $0x140] sm:$0xff] }
 0x270   : > { %2329 = vpow2.f32 %v607_v21 }
 0x271   : > { %2331 = vpow2.f32 %v609_v23  ;;  %1418 = vmatpush.bf16.msrb.mxu0 %v2264_v30  ;;  %v2289_v30 = vld [vmem:[%s2848_s8 + $0x38] sm:$0xff] }
 0x272   : > { %2333 = vpow2.f32 %v611_v24  ;;  %v2257_v24 = vld [vmem:[#allocation3 + $0x178] sm:$0xff]  ;;  %1532 = vmatpush.bf16.msra.mxu2 %v2272_v31  ;;  %v2288_v31 = vld [vmem:[%s2848_s8 + $0x30] sm:$0xff] }
 0x273   : > { %2335 = vpow2.f32 %v613_v25 }
 0x274   : > { %v2326_v32 = vpop.eup %2325  ;;  %2337 = vpow2.f32 %v615_v28 }
 0x275   : > { %v2328_v33 = vpop.eup %2327  ;;  %2339 = vpow2.f32 %v617_v29  ;;  %v619_v35 = vadd.f32 1.0, %v2326_v32  ;;  %v2256_v29 = vld [vmem:[#allocation3 + $0x170] sm:$0xff]  ;;  %v2281_v32 = vld [vmem:[#allocation3 + $0x238] sm:$0xff] }
 0x276   : > { %v2330_v37 = vpop.eup %2329  ;;  %v620_v38 = vadd.f32 1.0, %v2328_v33 }
 0x277   : > { %v2332_v40 = vpop.eup %2331  ;;  %v621_v41 = vadd.f32 1.0, %v2330_v37  ;;  %2341 = vrcp.f32 %v619_v35  ;;  %v2263_v37 = vld [vmem:[#allocation3 + $0x1a8] sm:$0xff] }
 0x278   : > { %v2334_v42 = vpop.eup %2333  ;;  %v622_v43 = vadd.f32 1.0, %v2332_v40  ;;  %2343 = vrcp.f32 %v620_v38  ;;  %v2271_v38 = vld [vmem:[#allocation3 + $0x1e8] sm:$0xff]  ;;  %1419 = vmatpush.bf16.msrb.mxu0 %v2263_v37 }
 0x279   : > { %v2336_v44 = vpop.eup %2335  ;;  %v623_v49 = vadd.f32 1.0, %v2334_v42  ;;  %2345 = vrcp.f32 %v621_v41  ;;  %1533 = vmatpush.bf16.msra.mxu2 %v2271_v38  ;;  %v2262_v42 = vld [vmem:[#allocation3 + $0x1a0] sm:$0xff] }
 0x27a   : > { %v2338_v52 = vpop.eup %2337  ;;  %v624_v53 = vadd.f32 1.0, %v2336_v44  ;;  %2347 = vrcp.f32 %v622_v43  ;;  %v2270_v44 = vld [vmem:[#allocation3 + $0x1e0] sm:$0xff] }
 0x27b   : > { %v2340_v55 = vpop.eup %2339  ;;  %v625_v56 = vadd.f32 1.0, %v2338_v52  ;;  %2349 = vrcp.f32 %v623_v49  ;;  %v2261_v52 = vld [vmem:[#allocation3 + $0x198] sm:$0xff] }
 0x27c   : > { %v626_v59 = vadd.f32 1.0, %v2340_v55  ;;  %2351 = vrcp.f32 %v624_v53  ;;  %1420 = vmatpush.bf16.msrb.mxu0 %v2262_v42  ;;  %v2269_v53 = vld [vmem:[#allocation3 + $0x1d8] sm:$0xff]  ;;  %v2280_v55 = vld [vmem:[#allocation3 + $0x230] sm:$0xff] }
 0x27d   : > { %v2342_v45 = vpop.eup %2341  ;;  %2353 = vrcp.f32 %v625_v56  ;;  %1534 = vmatpush.bf16.msra.mxu2 %v2270_v44  ;;  %v2254_v56 = vld [vmem:[#allocation3 + $0x160] sm:$0xff] }
 0x27e   : > { %v2344_v61 = vpop.eup %2343  ;;  %2355 = vrcp.f32 %v626_v59  ;;  %v2676_v48 = vmul.f32 %v2342_v45, %v2638_v54  ;;  %v2243_v54 = vld [vmem:[#allocation3 + $0x108] sm:$0xff] }
 0x27f   : > { %v2346_v63 = vpop.eup %2345  ;;  %v2679_v0 = vmul.f32 %v2344_v61, %v2640_v57  ;;  %1194 = vmatpush.bf16.msra.mxu1 %v2243_v54  ;;  %v2279_v59 = vld [vmem:[#allocation3 + $0x228] sm:$0xff] }
 0x280   : > { %v2348_v1 = vpop.eup %2347  ;;  %v2682_v51 = vmul.f32 %v2346_v63, %v2642_v60  ;;  %664 = vst [vmem:[#allocation2 + $0x11] sm:$0xff] %v2676_v48  ;;  %v708_v2 = vpack.c.bf16 %v2676_v48, %v700_v46  ;;  %1421 = vmatpush.bf16.msrb.mxu0 %v2261_v52  ;;  %v2268_v46 = vld [vmem:[#allocation3 + $0x1d0] sm:$0xff] }
 0x281   : > { %v2350_v4 = vpop.eup %2349  ;;  %v2687_v9 = vmul.f32 %v2348_v1, %v2644_v3  ;;  %665 = vst [vmem:[#allocation2 + $0x21] sm:$0xff] %v2679_v0  ;;  %v2210_v3 = vld [vmem:[#allocation3] sm:$0xff]  ;;  %v1119_v45 = vpack.c.bf16 %v2679_v0, %v2676_v48  ;;  %1535 = vmatpush.bf16.msra.mxu2 %v2269_v53 }
 0x282   : > { %v2352_v10 = vpop.eup %2351  ;;  %v2691_v57 = vmul.f32 %v2350_v4, %v2646_v5  ;;  %785 = vmatmul.bf16.vlgmr.msrb.gmra.mxu1 %v708_v2  ;;  %666 = vst [vmem:[#allocation2 + $0x31] sm:$0xff] %v2682_v51  ;;  %861 = vmatpush.bf16.msrb.mxu3 %v2210_v3  ;;  %v2740_v35 = vpack.c.bf16 %v2682_v51, %v2679_v0  ;;  %v2253_v2 = vld [vmem:[#allocation3 + $0x158] sm:$0xff]  ;;  %v2258_v4 = vld [vmem:[#allocation3 + $0x180] sm:$0xff] }
 0x283   : > { %v2354_v60 = vpop.eup %2353  ;;  %v2695_v11 = vmul.f32 %v2352_v10, %v2648_v6  ;;  %667 = vst [vmem:[#allocation2 + $0x41] sm:$0xff] %v2687_v9  ;;  %v883_v6 = vld [vmem:[#allocation2 + $0x2] sm:$0xff]  ;;  %1195 = vmatpush.bf16.msra.mxu1 %v2242_v15  ;;  %v1120_v3 = vpack.c.bf16 %v2687_v9, %v2682_v51 }
 0x284   : > { %v2356_v12 = vpop.eup %2355  ;;  %v2699_v13 = vmul.f32 %v2354_v60, %v2650_v7  ;;  %668 = vst [vmem:[#allocation2 + $0x51] sm:$0xff] %v2691_v57  ;;  %v2704_v5 = vpack.c.bf16 %v2691_v57, %v2687_v9  ;;  %1422 = vmatpush.bf16.msrb.mxu0 %v2260_v58  ;;  %v2266_v0 = vld [vmem:[#allocation3 + $0x1c0] sm:$0xff]  ;;  %v2277_v60 = vld [vmem:[#allocation3 + $0x218] sm:$0xff]  ;;  %v2275_v51 = vld [vmem:[#allocation3 + $0x208] sm:$0xff] }
 0x285   : > { %v2707_v14 = vmul.f32 %v2356_v12, %v2652_v8  ;;  %669 = vst [vmem:[#allocation2 + $0x61] sm:$0xff] %v2695_v11  ;;  %1536 = vmatpush.bf16.msra.mxu2 %v2268_v46  ;;  %v2278_v10 = vld [vmem:[#allocation3 + $0x220] sm:$0xff]  ;;  %v1121_v9 = vpack.c.bf16 %v2695_v11, %v2691_v57 }
 0x286   : > { %795 = vmatmul.bf16.vlgmr.msra.gmra.mxu3 %v2704_v5  ;;  %670 = vst [vmem:[#allocation2 + $0x71] sm:$0xff] %v2699_v13  ;;  %v2747_v39 = vpack.c.bf16 %v2699_v13, %v2695_v11  ;;  %v2287_v11 = vld [vmem:[%s2848_s8 + $0x28] sm:$0xff] }
 0x287   : > { %671 = vst [vmem:[#allocation2 + $0x81] sm:$0xff] %v2707_v14  ;;  %v2713_v7 = vld [vmem:[#allocation2 + $0x12] sm:$0xff]  ;;  %v1122_v8 = vpack.c.bf16 %v2707_v14, %v2699_v13  ;;  %1302 = vmatpush.bf16.msra.mxu3 %v2257_v24  ;;  %1645 = vmatpush.bf16.msrb.mxu1 %v2281_v32  ;;  %v2286_v32 = vld [vmem:[%s2848_s8 + $0x20] sm:$0xff] }
 0x288   : > { %v2715_v16 = vld [vmem:[#allocation2 + $0x10] sm:$0xff]  ;;  %v891_v17 = vpack.c.bf16 %v2713_v7, %v883_v6  ;;  %v2720_v18 = vld [vmem:[#allocation2 + $0x20] sm:$0xff]  ;;  %1423 = vmatpush.bf16.msrb.mxu0 %v2259_v47  ;;  %v2285_v13 = vld [vmem:[%s2848_s8 + $0x18] sm:$0xff] }
 0x289   : > { %v2722_v19 = vld [vmem:[#allocation2 + $0x22] sm:$0xff]  ;;  %v1005_v20 = vpack.c.bf16 %v2720_v18, %v2715_v16  ;;  %v2726_v21 = vld [vmem:[#allocation2 + $0x32] sm:$0xff]  ;;  %v680_v61 = vpack.c.bf16 %v2715_v16, %v2406_v34  ;;  %1537 = vmatpush.bf16.msra.mxu2 %v2267_v62 }
 0x28a   : > { %v1233_v22 = vpack.c.bf16 %v2722_v19, %v2713_v7  ;;  %968 = vmatmul.bf16.vlgmr.msra.gmra.mxu0 %v891_v17  ;;  %v2730_v23 = vld [vmem:[#allocation2 + $0x42] sm:$0xff]  ;;  %v999_v40 = vld [vmem:[#allocation2 + $0x30] sm:$0xff]  ;;  %v2754_v43 = vpack.c.bf16 %v2726_v21, %v2722_v19 }
 0x28b   : > { %1082 = vmatmul.bf16.vlgmr.msrb.gmra.mxu2 %v1005_v20  ;;  %v1234_v25 = vpack.c.bf16 %v2730_v23, %v2726_v21  ;;  %v2734_v28 = vld [vmem:[#allocation2 + $0x52] sm:$0xff]  ;;  %1303 = vmatpush.bf16.msra.mxu3 %v2256_v29  ;;  %v2750_v41 = vld [vmem:[#allocation2 + $0x40] sm:$0xff]  ;;  %v681_v12 = vpack.c.bf16 %v999_v40, %v2720_v18  ;;  %v2251_v17 = vld [vmem:[#allocation3 + $0x148] sm:$0xff] }
 0x28c   : > { %v2736_v33 = vld [vmem:[#allocation2 + $0x62] sm:$0xff]  ;;  %v1006_v49 = vpack.c.bf16 %v2750_v41, %v999_v40  ;;  %1646 = vmatpush.bf16.msrb.mxu1 %v2280_v55  ;;  %v1001_v63 = vld [vmem:[#allocation2 + $0x50] sm:$0xff]  ;;  %v893_v48 = vpack.c.bf16 %v2734_v28, %v2730_v23  ;;  %1424 = vmatpush.bf16.msrb.mxu0 %v2258_v4 }
 0x28d   : > { %v1235_v36 = vpack.c.bf16 %v2736_v33, %v2734_v28  ;;  %v1002_v1 = vld [vmem:[#allocation2 + $0x60] sm:$0xff]  ;;  %v2252_v34 = vld [vmem:[#allocation3 + $0x150] sm:$0xff]  ;;  %1538 = vmatpush.bf16.msra.mxu2 %v2266_v0  ;;  %v682_v29 = vpack.c.bf16 %v1001_v63, %v2750_v41 }
 0x28e   : > { %v1007_v54 = vpack.c.bf16 %v1002_v1, %v1001_v63  ;;  %v2767_v6 = vld [vmem:[#allocation2 + $0x72] sm:$0xff]  ;;  %v1004_v16 = vld [vmem:[#allocation2 + $0x80] sm:$0xff] }
 0x28f   : > { %1304 = vmatpush.bf16.msra.mxu3 %v2255_v50  ;;  %v1003_v15 = vld [vmem:[#allocation2 + $0x70] sm:$0xff]  ;;  %v894_v20 = vpack.c.bf16 %v2767_v6, %v2736_v33  ;;  %v2274_v18 = vld [vmem:[#allocation3 + $0x200] sm:$0xff]  ;;  %v1351_v19 = vpack.c.bf16 0.0, %v1004_v16 }
 0x290   : > { %1647 = vmatpush.bf16.msrb.mxu1 %v2279_v59  ;;  %v1008_v24 = vpack.c.bf16 %v1004_v16, %v1003_v15  ;;  %v683_v57 = vpack.c.bf16 %v1003_v15, %v1002_v1  ;;  %v1461_v7 = vld [vmem:[#allocation2 + $0x91] sm:$0xff]  ;;  %v2282_v21 = vld [vmem:[%s2848_s8] sm:$0xff] }
 0x291   : > { %v1575_v40 = vld [vmem:[#allocation2 + $0x92] sm:$0xff] }
 0x292   : > { %790 = vmatmul.bf16.gmra.mxu1 %v2740_v35 }
 0x293   : > { %1305 = vmatpush.bf16.msra.mxu3 %v2254_v56 }
 0x294   : > { %1648 = vmatpush.bf16.msrb.mxu1 %v2278_v10 }
 0x296   : > { %800 = vmatmul.bf16.gmra.mxu3 %v2747_v39 }
 0x297   : > { %1306 = vmatpush.bf16.msra.mxu3 %v2253_v2 }
 0x298   : > { %1649 = vmatpush.bf16.msrb.mxu1 %v2277_v60 }
 0x29a   : > { %973 = vmatmul.bf16.gmra.mxu0 %v2754_v43 }
 0x29b   : > { %1087 = vmatmul.bf16.gmra.mxu2 %v1006_v49  ;;  %1307 = vmatpush.bf16.msra.mxu3 %v2252_v34 }
 0x29c   : > { %1650 = vmatpush.bf16.msrb.mxu1 %v2276_v26 }
 0x29f   : > { %1308 = vmatpush.bf16.msra.mxu3 %v2251_v17 }
 0x2a0   : > { %1651 = vmatpush.bf16.msrb.mxu1 %v2275_v51 }
 0x2a2   : > { %1196 = vmatmul.bf16.vlgmr.msra.gmra.mxu1 %v1119_v45 }
 0x2a3   : > { %1309 = vmatpush.bf16.msra.mxu3 %v2250_v27 }
 0x2a4   : > { %1652 = vmatpush.bf16.msrb.mxu1 %v2274_v18 }
 0x2a6   : > { %862 = vmatmul.bf16.vlgmr.msrb.gmra.mxu3 %v680_v61 }
 0x2a7   : > { %1755 = vmatpush.bf16.msrb.mxu3 %v2289_v30 }
 0x2aa   : > { %978 = vmatmul.bf16.gmra.mxu0 %v893_v48 }
 0x2ab   : > { %1092 = vmatmul.bf16.gmra.mxu2 %v1007_v54  ;;  %1756 = vmatpush.bf16.msrb.mxu3 %v2288_v31 }
 0x2af   : > { %1757 = vmatpush.bf16.msrb.mxu3 %v2287_v11 }
 0x2b2   : > { %1201 = vmatmul.bf16.gmra.mxu1 %v1120_v3 }
 0x2b3   : > { %1758 = vmatpush.bf16.msrb.mxu3 %v2286_v32 }
 0x2b6   : > { %867 = vmatmul.bf16.gmra.mxu3 %v681_v12 }
 0x2b7   : > { %1759 = vmatpush.bf16.msrb.mxu3 %v2285_v13 }
 0x2ba   : > { %983 = vmatmul.bf16.gmra.mxu0 %v894_v20 }
 0x2bb   : > { %1097 = vmatmul.bf16.gmra.mxu2 %v1008_v24 }
 0x2c2   : > { %1206 = vmatmul.bf16.gmra.mxu1 %v1121_v9 }
 0x2c6   : > { %872 = vmatmul.bf16.gmra.mxu3 %v682_v29 }
 0x2ca   : > { %1425 = vmatmul.bf16.vlgmr.msrb.gmra.mxu0 %v681_v12 }
 0x2cb   : > { %1539 = vmatmul.bf16.vlgmr.msra.gmra.mxu2 %v2740_v35  ;;  %v1682_v35 = vld [vmem:[%s385_s18] sm:$0x1] }
 0x2cc   : > { %v1683_v23 = vsub.f32 0.0, %v1682_v35 }
 0x2d2   : > { %1211 = vmatmul.bf16.gmra.mxu1 %v1122_v8  ;;  %v2283_v8 = vld [vmem:[%s2848_s8 + $0x8] sm:$0xff] }
 0x2d6   : > { %877 = vmatmul.bf16.gmra.mxu3 %v683_v57 }
 0x2da   : > { %1430 = vmatmul.bf16.gmra.mxu0 %v682_v29 }
 0x2db   : > { %1544 = vmatmul.bf16.gmra.mxu2 %v2704_v5  ;;  %v2284_v5 = vld [vmem:[%s2848_s8 + $0x10] sm:$0xff] }
 0x2dc   : > { %1760 = vmatpush.bf16.msrb.mxu3 %v2284_v5 }
 0x2e0   : > { %1761 = vmatpush.bf16.msrb.mxu3 %v2283_v8 }
 0x2e2   : > { %1653 = vmatmul.bf16.vlgmr.msrb.gmra.mxu1 %v2754_v43 }
 0x2e4   : > { %1762 = vmatpush.bf16.msrb.mxu3 %v2282_v21 }
 0x2e6   : > { %1310 = vmatmul.bf16.vlgmr.msra.gmra.mxu3 %v1233_v22  ;;  %v1465_v22 = vpack.c.bf16 %v1461_v7, %v2707_v14 }
 0x2ea   : > { %1435 = vmatmul.bf16.gmra.mxu0 %v683_v57 }
 0x2eb   : > { %1549 = vmatmul.bf16.gmra.mxu2 %v2747_v39  ;;  %v1232_v39 = vld [vmem:[#allocation2 + $0x82] sm:$0xff] }
 0x2ec   : > { %v1579_v44 = vpack.c.bf16 %v1575_v40, %v1232_v39  ;;  %v1236_v53 = vpack.c.bf16 %v1232_v39, %v2767_v6 }
 0x2f2   : > { %1658 = vmatmul.bf16.gmra.mxu1 %v893_v48 }
 0x2f6   : > { %1315 = vmatmul.bf16.gmra.mxu3 %v1234_v25  ;;  %v1684_v25 = vmul.f32 1.442695, %v1683_v23 }
 0x2f8   : > { %2357 = vpow2.f32 %v1684_v25 }
 0x2fa   : > { %1440 = vmatmul.bf16.gmra.mxu0 %v1351_v19 }
 0x2fb   : > { %1554 = vmatmul.bf16.gmra.mxu2 %v1465_v22 }
 0x2fe   : > { %v2358_v41 = vpop.eup %2357 }
 0x2ff   : > { %v786_v37 = vpop.f32.mrf.mxu1  ;;  %v1686_v50 = vadd.f32 1.0, %v2358_v41 }
 0x301   : > { %2359 = vrcp.f32 %v1686_v50 }
 0x302   : > { %1663 = vmatmul.bf16.gmra.mxu1 %v894_v20 }
 0x306   : > { %1320 = vmatmul.bf16.gmra.mxu3 %v1235_v36 }
 0x307   : > { %v788_v14 = vpop.f32.mrf.mxu1  ;;  %v969_v42 = vpop.f32.mrf.mxu0 }
 0x308   : > { %v2360_v36 = vpop.eup %2359 }
 0x309   : > { %v796_v38 = vpop.f32.mrf.mxu3  ;;  %v1688_v58 = vmul.f32 %v2360_v36, %v1682_v35 }
 0x30b   : > { %v1689_v47 = vpack.c.bf16 %v1688_v58, %v1688_v58 }
 0x30e   : > { %v1083_v52 = vpop.f32.mrf.mxu2 }
 0x30f   : > { %v791_v43 = vpop.f32.mrf.mxu1  ;;  %v971_v28 = vpop.f32.mrf.mxu0 }
 0x311   : > { %v798_v49 = vpop.f32.mrf.mxu3 }
 0x312   : > { %1668 = vmatmul.bf16.gmra.mxu1 %v1579_v44 }
 0x316   : > { %1325 = vmatmul.bf16.gmra.mxu3 %v1236_v53  ;;  %v1085_v56 = vpop.f32.mrf.mxu2 }
 0x317   : > { %v793_v55 = vpop.f32.mrf.mxu1  ;;  %v974_v46 = vpop.f32.mrf.mxu0 }
 0x319   : > { %v801_v33 = vpop.f32.mrf.mxu3 }
 0x31e   : > { %v1088_v61 = vpop.f32.mrf.mxu2 }
 0x31f   : > { %v1197_v59 = vpop.f32.mrf.mxu1  ;;  %v976_v2 = vpop.f32.mrf.mxu0 }
 0x321   : > { %v803_v45 = vpop.f32.mrf.mxu3 }
 0x326   : > { %1763 = vmatmul.bf16.vlgmr.msrb.gmra.mxu3 %v1689_v47  ;;  %v1090_v54 = vpop.f32.mrf.mxu2 }
 0x327   : > { %v1199_v62 = vpop.f32.mrf.mxu1  ;;  %v979_v12 = vpop.f32.mrf.mxu0 }
 0x329   : > { %v863_v63 = vpop.f32.mrf.mxu3 }
 0x32a   : > { %v864_v1 = vadd.f32 %v863_v63, %v786_v37 }
 0x32c   : > { %v989_v4 = vadd.f32 %v969_v42, %v864_v1 }
 0x32e   : > { %v1103_v48 = vadd.f32 %v1083_v52, %v989_v4  ;;  %v1093_v20 = vpop.f32.mrf.mxu2 }
 0x32f   : > { %v1202_v0 = vpop.f32.mrf.mxu1  ;;  %v981_v9 = vpop.f32.mrf.mxu0 }
 0x330   : > { %v2820_v10 = vadd.f32 %v1197_v59, %v1103_v48 }
 0x331   : > { %v865_v34 = vpop.f32.mrf.mxu3 }
 0x332   : > { %v866_v60 = vadd.f32 %v865_v34, %v788_v14 }
 0x334   : > { %v990_v3 = vadd.f32 %v971_v28, %v866_v60 }
 0x336   : > { %v1104_v6 = vadd.f32 %v1085_v56, %v990_v3  ;;  %v1095_v31 = vpop.f32.mrf.mxu2 }
 0x337   : > { %v1204_v15 = vpop.f32.mrf.mxu1  ;;  %v984_v7 = vpop.f32.mrf.mxu0 }
 0x338   : > { %v2822_v16 = vadd.f32 %v1199_v62, %v1104_v6 }
 0x339   : > { %v868_v17 = vpop.f32.mrf.mxu3 }
 0x33a   : > { %v869_v24 = vadd.f32 %v868_v17, %v791_v43 }
 0x33c   : > { %v991_v26 = vadd.f32 %v974_v46, %v869_v24 }
 0x33e   : > { %v1105_v27 = vadd.f32 %v1088_v61, %v991_v26  ;;  %v1098_v22 = vpop.f32.mrf.mxu2 }
 0x33f   : > { %v1207_v51 = vpop.f32.mrf.mxu1  ;;  %v986_v14 = vpop.f32.mrf.mxu0 }
 0x340   : > { %v1219_v18 = vadd.f32 %v1202_v0, %v1105_v27 }
 0x341   : > { %v870_v29 = vpop.f32.mrf.mxu3 }
 0x342   : > { %v871_v30 = vadd.f32 %v870_v29, %v793_v55 }
 0x344   : > { %v992_v57 = vadd.f32 %v976_v2, %v871_v30 }
 0x346   : > { %v1106_v11 = vadd.f32 %v1090_v54, %v992_v57  ;;  %v1100_v41 = vpop.f32.mrf.mxu2 }
 0x347   : > { %v1209_v32 = vpop.f32.mrf.mxu1  ;;  %v1426_v52 = vpop.f32.mrf.mxu0 }
 0x348   : > { %v1220_v13 = vadd.f32 %v1204_v15, %v1106_v11 }
 0x349   : > { %v873_v5 = vpop.f32.mrf.mxu3 }
 0x34a   : > { %v874_v8 = vadd.f32 %v873_v5, %v796_v38 }
 0x34c   : > { %v993_v19 = vadd.f32 %v979_v12, %v874_v8 }
 0x34e   : > { %v1107_v35 = vadd.f32 %v1093_v20, %v993_v19  ;;  %v1540_v55 = vpop.f32.mrf.mxu2 }
 0x34f   : > { %v1212_v25 = vpop.f32.mrf.mxu1  ;;  %v1428_v36 = vpop.f32.mrf.mxu0 }
 0x350   : > { %v1221_v37 = vadd.f32 %v1207_v51, %v1107_v35 }
 0x351   : > { %v875_v21 = vpop.f32.mrf.mxu3 }
 0x352   : > { %v876_v23 = vadd.f32 %v875_v21, %v798_v49 }
 0x354   : > { %v994_v39 = vadd.f32 %v981_v9, %v876_v23 }
 0x356   : > { %v1108_v40 = vadd.f32 %v1095_v31, %v994_v39  ;;  %v1542_v58 = vpop.f32.mrf.mxu2 }
 0x357   : > { %v1214_v50 = vpop.f32.mrf.mxu1  ;;  %v1431_v49 = vpop.f32.mrf.mxu0 }
 0x358   : > { %v1222_v42 = vadd.f32 %v1209_v32, %v1108_v40 }
 0x359   : > { %v878_v43 = vpop.f32.mrf.mxu3 }
 0x35a   : > { %v879_v44 = vadd.f32 %v878_v43, %v801_v33 }
 0x35c   : > { %v995_v3 = vadd.f32 %v984_v7, %v879_v44  ;;  %v1706_v44 = vld [vmem:[%s2849_s9] sm:$0x1] }
 0x35e   : > { %v1545_v47 = vpop.f32.mrf.mxu2  ;;  %v1109_v20 = vadd.f32 %v1098_v22, %v995_v3 }
 0x35f   : > { %v1654_v38 = vpop.f32.mrf.mxu1  ;;  %v1433_v63 = vpop.f32.mrf.mxu0 }
 0x360   : > { %v1223_v31 = vadd.f32 %v1212_v25, %v1109_v20 }
 0x361   : > { %v880_v53 = vpop.f32.mrf.mxu3 }
 0x362   : > { %v881_v28 = vadd.f32 %v880_v53, %v803_v45 }
 0x364   : > { %v996_v12 = vadd.f32 %v986_v14, %v881_v28 }
 0x366   : > { %v1547_v1 = vpop.f32.mrf.mxu2  ;;  %v1110_v51 = vadd.f32 %v1100_v41, %v996_v12 }
 0x367   : > { %v1656_v59 = vpop.f32.mrf.mxu1  ;;  %v1436_v33 = vpop.f32.mrf.mxu0 }
 0x368   : > { %v1224_v8 = vadd.f32 %v1214_v50, %v1110_v51 }
 0x369   : > { %v1311_v56 = vpop.f32.mrf.mxu3 }
 0x36a   : > { %v1331_v24 = vadd.f32 %v1311_v56, %v2820_v10 }
 0x36c   : > { %v1446_v57 = vadd.f32 %v1426_v52, %v1331_v24 }
 0x36e   : > { %v1550_v0 = vpop.f32.mrf.mxu2  ;;  %v1560_v10 = vadd.f32 %v1540_v55, %v1446_v57 }
 0x36f   : > { %v1659_v62 = vpop.f32.mrf.mxu1  ;;  %v1438_v34 = vpop.f32.mrf.mxu0 }
 0x370   : > { %v1674_v41 = vadd.f32 %v1654_v38, %v1560_v10 }
 0x371   : > { %v1313_v46 = vpop.f32.mrf.mxu3 }
 0x372   : > { %v1332_v26 = vadd.f32 %v1313_v46, %v2822_v16 }
 0x374   : > { %v1447_v32 = vadd.f32 %v1428_v36, %v1332_v26 }
 0x376   : > { %v1552_v60 = vpop.f32.mrf.mxu2  ;;  %v1561_v16 = vadd.f32 %v1542_v58, %v1447_v32 }
 0x377   : > { %v1661_v4 = vpop.f32.mrf.mxu1  ;;  %v1441_v17 = vpop.f32.mrf.mxu0 }
 0x378   : > { %v1675_v50 = vadd.f32 %v1656_v59, %v1561_v16 }
 0x379   : > { %v1316_v61 = vpop.f32.mrf.mxu3 }
 0x37a   : > { %v1333_v27 = vadd.f32 %v1316_v61, %v1219_v18 }
 0x37c   : > { %v1448_v5 = vadd.f32 %v1431_v49, %v1333_v27 }
 0x37e   : > { %v1555_v29 = vpop.f32.mrf.mxu2  ;;  %v1562_v18 = vadd.f32 %v1545_v47, %v1448_v5 }
 0x37f   : > { %v1664_v54 = vpop.f32.mrf.mxu1  ;;  %v1443_v39 = vpop.f32.mrf.mxu0 }
 0x380   : > { %v1676_v52 = vadd.f32 %v1659_v62, %v1562_v18 }
 0x381   : > { %v1318_v2 = vpop.f32.mrf.mxu3 }
 0x382   : > { %v1334_v9 = vadd.f32 %v1318_v2, %v1220_v13 }
 0x384   : > { %v1449_v19 = vadd.f32 %v1433_v63, %v1334_v9 }
 0x386   : > { %v1563_v40 = vadd.f32 %v1547_v1, %v1449_v19  ;;  %v1557_v53 = vpop.f32.mrf.mxu2 }
 0x387   : > { %v1666_v6 = vpop.f32.mrf.mxu1 }
 0x388   : > { %v1677_v28 = vadd.f32 %v1661_v4, %v1563_v40 }
 0x389   : > { %v1321_v48 = vpop.f32.mrf.mxu3 }
 0x38a   : > { %v1335_v30 = vadd.f32 %v1321_v48, %v1221_v37 }
 0x38c   : > { %v1450_v21 = vadd.f32 %v1436_v33, %v1335_v30 }
 0x38e   : > { %v1564_v25 = vadd.f32 %v1550_v0, %v1450_v21 }
 0x38f   : > { %v1669_v22 = vpop.f32.mrf.mxu1 }
 0x390   : > { %v1678_v58 = vadd.f32 %v1664_v54, %v1564_v25 }
 0x391   : > { %v1323_v45 = vpop.f32.mrf.mxu3 }
 0x392   : > { %v1336_v11 = vadd.f32 %v1323_v45, %v1222_v42  ;;  %v2322_v42 = vld [vmem:[%s2847_s7] ss:$0 sm:$0xff] }
 0x393   : > { %v1772_v38 = vadd.f32 %v2322_v42, %v1674_v41  ;;  %v1773_v47 = vadd.f32 %v2322_v42, %v1675_v50  ;;  %v1774_v61 = vadd.f32 %v2322_v42, %v1676_v52  ;;  %v1775_v59 = vadd.f32 %v2322_v42, %v1677_v28 }
 0x394   : > { %v1451_v14 = vadd.f32 %v1438_v34, %v1336_v11  ;;  %v1776_v33 = vadd.f32 %v2322_v42, %v1678_v58 }
 0x396   : > { %v1565_v43 = vadd.f32 %v1552_v60, %v1451_v14 }
 0x397   : > { %v1671_v1 = vpop.f32.mrf.mxu1 }
 0x398   : > { %v1679_v49 = vadd.f32 %v1666_v6, %v1565_v43 }
 0x399   : > { %v1326_v15 = vpop.f32.mrf.mxu3 }
 0x39a   : > { %v1337_v7 = vadd.f32 %v1326_v15, %v1223_v31  ;;  %v1777_v54 = vadd.f32 %v2322_v42, %v1679_v49 }
 0x39c   : > { %v1452_v13 = vadd.f32 %v1441_v17, %v1337_v7 }
 0x39e   : > { %v1566_v55 = vadd.f32 %v1555_v29, %v1452_v13 }
 0x3a0   : > { %v1680_v63 = vadd.f32 %v1669_v22, %v1566_v55 }
 0x3a1   : > { %v1328_v35 = vpop.f32.mrf.mxu3 }
 0x3a2   : > { %v1338_v23 = vadd.f32 %v1328_v35, %v1224_v8  ;;  %v1778_v45 = vadd.f32 %v2322_v42, %v1680_v63 }
 0x3a4   : > { %v1453_v37 = vadd.f32 %v1443_v39, %v1338_v23 }
 0x3a6   : > { %v1567_v36 = vadd.f32 %v1557_v53, %v1453_v37 }
 0x3a8   : > { %v1681_v62 = vadd.f32 %v1671_v1, %v1567_v36 }
 0x3a9   : > { %v1764_v56 = vpop.f32.mrf.mxu3 }
 0x3aa   : > { %v1765_v46 = vadd.f32 %v1764_v56, %v1706_v44  ;;  %v1779_v3 = vadd.f32 %v2322_v42, %v1681_v62 }
 0x3ac   : > { %v1780_v2 = vperm.slane %v1765_v46, 0 }
 0x3ae   : > { %v1781_v4 = vadd.f32 %v1780_v2, %v1772_v38  ;;  %v1782_v48 = vadd.f32 %v1780_v2, %v1773_v47  ;;  %v1783_v0 = vadd.f32 %v1780_v2, %v1774_v61  ;;  %v1784_v34 = vadd.f32 %v1780_v2, %v1775_v59 }
 0x3af   : > { %v1785_v60 = vadd.f32 %v1780_v2, %v1776_v33  ;;  %v1786_v12 = vadd.f32 %v1780_v2, %v1777_v54  ;;  %v1787_v15 = vadd.f32 %v1780_v2, %v1778_v45  ;;  %v1788_v17 = vadd.f32 %v1780_v2, %v1779_v3 }
 0x3b0   : > { %1789 = vst [vmem:[%s390_s27] sm:$0xff] %v1781_v4 }
 0x3b1   : > { %1790 = vst [vmem:[%s390_s27 + $0x8] sm:$0xff] %v1782_v48  ;;  %v1766_v6 = vpop.f32.mrf.mxu3 }
 0x3b2   : > { %1791 = vst [vmem:[%s390_s27 + $0x10] sm:$0xff] %v1783_v0 }
 0x3b3   : > { %1792 = vst [vmem:[%s390_s27 + $0x18] sm:$0xff] %v1784_v34 }
 0x3b4   : > { %1793 = vst [vmem:[%s390_s27 + $0x20] sm:$0xff] %v1785_v60 }
 0x3b5   : > { %1794 = vst [vmem:[%s390_s27 + $0x28] sm:$0xff] %v1786_v12 }
 0x3b6   : > { %1795 = vst [vmem:[%s390_s27 + $0x30] sm:$0xff] %v1787_v15 }
 0x3b7   : > { %1796 = vst [vmem:[%s390_s27 + $0x38] sm:$0xff] %v1788_v17 }
 0x3b8 PF: > { %s21_s13 = sadd.s32 1, %s2401_s13  }
 0x3b9   : > { %p18_p7 = scmp.ge.s32.totalorder %s21_s13, 4  }
 0x3bb   :  { %20 = sbr.rel (!%p18_p7) target bundleno = 1 (0x1), region = 108 }
 0x3c0   :  { %1818 = vsyncpa [#allocation4], 1 }
 0x3c1   :  { %1820 = vsyncpa [#allocation4 + $0x1], 1 }

</bundles_post_ra>
